<compile_context>
chip_gen: v7x
topology: tpu7x:2x2x1
jax: 0.10.0
libtpu: 0.0.40
codegen_flags: <defaults>
</compile_context>

<pallas_src>
import math
import numpy as np

import jax
import jax.numpy as jnp
from jax import lax
from jax.experimental import pallas as pl
from jax.experimental.pallas import tpu as pltpu

# Keep f32 matmul precision high in both the kernels and the pure-JAX reference.
jax.config.update("jax_default_matmul_precision", "highest")

_BN_EPS = 1e-5


# ---------------------------------------------------------------------------
# Helpers
# ---------------------------------------------------------------------------
def _fold_bn(bn):
    scale = bn['gamma'] / jnp.sqrt(bn['var'] + _BN_EPS)
    shift = bn['beta'] - bn['mean'] * scale
    return scale.astype(jnp.float32), shift.astype(jnp.float32)


# ---------------------------------------------------------------------------
# Pallas kernels
# ---------------------------------------------------------------------------
def _make_stem_kernel(Ho, Wo, C):
    """conv0 (as im2col matmul) + bn0 + relu0 + dense 3x3 max (stride-1)."""
    def kernel(p_ref, w_ref, s_ref, b_ref, o_ref, pad_ref):
        p = p_ref[0]                                              # (Ho*Wo, K)
        y = jnp.dot(p, w_ref[...], preferred_element_type=jnp.float32)
        y = jnp.maximum(y * s_ref[...] + b_ref[...], 0.0)         # BN0 + ReLU
        # zero padding is exact for the max-pool because values are >= 0 post-ReLU
        pad_ref[...] = jnp.zeros_like(pad_ref)
        pad_ref[1:Ho + 1, 1:Wo + 1, :] = y.reshape(Ho, Wo, C)
        z = pad_ref[0:Ho, 0:Wo, :]
        for dy in range(3):
            for dx in range(3):
                if dy == 0 and dx == 0:
                    continue
                z = jnp.maximum(z, pad_ref[dy:dy + Ho, dx:dx + Wo, :])
        o_ref[0] = z
    return kernel


def _make_dense_layer_kernel(H, W, Cin, Cmid, Cout, dil):
    """norm1 -> relu1 -> conv1(1x1) -> norm2 -> relu2 -> conv2(3x3, dilation)."""
    HW = H * W

    def kernel(x_ref, w1_ref, s1_ref, b1_ref, w2_ref, s2_ref, b2_ref,
               o_ref, pad_ref):
        x = x_ref[0].reshape(HW, Cin)
        t0 = jnp.maximum(x * s1_ref[...] + b1_ref[...], 0.0)      # BN1 + ReLU
        mid = jnp.dot(t0, w1_ref[...], preferred_element_type=jnp.float32)
        t1 = jnp.maximum(mid * s2_ref[...] + b2_ref[...], 0.0)    # BN2 + ReLU
        # zero-padded copy for the (possibly dilated) 3x3 conv
        pad_ref[...] = jnp.zeros_like(pad_ref)
        pad_ref[dil:dil + H, dil:dil + W, :] = t1.reshape(H, W, Cmid)
        w2 = w2_ref[...]                                          # (3, 3, Cmid, Cout)
        acc = jnp.zeros((HW, Cout), jnp.float32)
        for ky in range(3):
            for kx in range(3):
                win = pad_ref[ky * dil:ky * dil + H, kx * dil:kx * dil + W, :]
                acc = acc + jnp.dot(win.reshape(HW, Cmid), w2[ky, kx],
                                    preferred_element_type=jnp.float32)
        o_ref[0] = acc.reshape(H, W, Cout)
    return kernel


def _make_transition_kernel(H, W, Cin, Cout, downsample):
    """norm -> relu -> conv(1x1) -> AvgPool2d(2,2) (pool as a matmul) or identity."""
    HW = H * W
    Ho, Wo = (H // 2, W // 2) if downsample else (H, W)

    def kernel(*refs):
        if downsample:
            x_ref, w_ref, s_ref, b_ref, pool_ref, o_ref = refs
        else:
            x_ref, w_ref, s_ref, b_ref, o_ref = refs
        x = x_ref[0].reshape(HW, Cin)
        t = jnp.maximum(x * s_ref[...] + b_ref[...], 0.0)         # BN + ReLU
        y = jnp.dot(t, w_ref[...], preferred_element_type=jnp.float32)   # (HW, Cout)
        if downsample:
            y = jnp.dot(pool_ref[...], y, preferred_element_type=jnp.float32)
        o_ref[0] = y.reshape(Ho, Wo, Cout)
    return kernel


# ---------------------------------------------------------------------------
# pallas_call wrappers
# ---------------------------------------------------------------------------
def _stem(x_nhwc, w_conv0, bn0):
    N, Hin, Win, Cin = x_nhwc.shape
    KH, KW, _, C = w_conv0.shape
    stride, pad = 2, 3
    Ho = (Hin + 2 * pad - KH) // stride + 1
    Wo = (Win + 2 * pad - KW) // stride + 1
    scale, shift = _fold_bn(bn0)

    # im2col for the 7x7 / stride-2 stem conv (host-side layout glue).
    xp = jnp.pad(x_nhwc, ((0, 0), (pad, pad), (pad, pad), (0, 0)))
    patches = []
    for ky in range(KH):
        for kx in range(KW):
            patches.append(xp[:, ky:ky + stride * (Ho - 1) + 1:stride,
                               kx:kx + stride * (Wo - 1) + 1:stride, :])
    K = KH * KW * Cin
    p = jnp.concatenate(patches, axis=-1).reshape(N, Ho * Wo, K)
    w = w_conv0.reshape(K, C)

    z = pl.pallas_call(
        _make_stem_kernel(Ho, Wo, C),
        out_shape=jax.ShapeDtypeStruct((N, Ho, Wo, C), jnp.float32),
        grid=(N,),
        in_specs=[
            pl.BlockSpec((1, Ho * Wo, K), lambda n: (n, 0, 0)),
            pl.BlockSpec((K, C), lambda n: (0, 0)),
            pl.BlockSpec((1, C), lambda n: (0, 0)),
            pl.BlockSpec((1, C), lambda n: (0, 0)),
        ],
        out_specs=pl.BlockSpec((1, Ho, Wo, C), lambda n: (n, 0, 0, 0)),
        scratch_shapes=[pltpu.VMEM((Ho + 2, Wo + 2, C), jnp.float32)],
        compiler_params=pltpu.CompilerParams(dimension_semantics=("parallel",)),
    )(p, w, scale.reshape(1, C), shift.reshape(1, C))
    # dense stride-1 3x3 max was computed in-kernel; stride-2 subsample of it is
    # exactly MaxPool2d(kernel_size=3, stride=2, padding=1).
    return z[:, ::2, ::2, :]


def _dense_layer(x, layer, dil):
    N, H, W, Cin = x.shape
    w1 = layer['conv1'].reshape(Cin, -1)               # (Cin, Cmid)
    w2 = layer['conv2']                                # (3, 3, Cmid, Cout)
    Cmid, Cout = w2.shape[2], w2.shape[3]
    s1, b1 = _fold_bn(layer['bn1'])
    s2, b2 = _fold_bn(layer['bn2'])

    return pl.pallas_call(
        _make_dense_layer_kernel(H, W, Cin, Cmid, Cout, dil),
        out_shape=jax.ShapeDtypeStruct((N, H, W, Cout), jnp.float32),
        grid=(N,),
        in_specs=[
            pl.BlockSpec((1, H, W, Cin), lambda n: (n, 0, 0, 0)),
            pl.BlockSpec((Cin, Cmid), lambda n: (0, 0)),
            pl.BlockSpec((1, Cin), lambda n: (0, 0)),
            pl.BlockSpec((1, Cin), lambda n: (0, 0)),
            pl.BlockSpec((3, 3, Cmid, Cout), lambda n: (0, 0, 0, 0)),
            pl.BlockSpec((1, Cmid), lambda n: (0, 0)),
            pl.BlockSpec((1, Cmid), lambda n: (0, 0)),
        ],
        out_specs=pl.BlockSpec((1, H, W, Cout), lambda n: (n, 0, 0, 0)),
        scratch_shapes=[pltpu.VMEM((H + 2 * dil, W + 2 * dil, Cmid), jnp.float32)],
        compiler_params=pltpu.CompilerParams(dimension_semantics=("parallel",)),
    )(x, w1, s1.reshape(1, Cin), b1.reshape(1, Cin),
      w2, s2.reshape(1, Cmid), b2.reshape(1, Cmid))


def _transition(x, trans):
    N, H, W, Cin = x.shape
    w = trans['conv'].reshape(Cin, -1)                 # (Cin, Cout)
    Cout = w.shape[1]
    s, b = _fold_bn(trans['bn'])
    downsample = bool(trans['downsample'])

    in_arrays = [x, w, s.reshape(1, Cin), b.reshape(1, Cin)]
    in_specs = [
        pl.BlockSpec((1, H, W, Cin), lambda n: (n, 0, 0, 0)),
        pl.BlockSpec((Cin, Cout), lambda n: (0, 0)),
        pl.BlockSpec((1, Cin), lambda n: (0, 0)),
        pl.BlockSpec((1, Cin), lambda n: (0, 0)),
    ]
    if downsample:
        Ho, Wo = H // 2, W // 2
        pool_np = np.zeros((Ho * Wo, H * W), np.float32)
        for i in range(H):
            for j in range(W):
                pool_np[(i // 2) * Wo + (j // 2), i * W + j] = 0.25
        in_arrays.append(jnp.asarray(pool_np))
        in_specs.append(pl.BlockSpec((Ho * Wo, H * W), lambda n: (0, 0)))
    else:
        Ho, Wo = H, W            # AvgPool2d(kernel_size=1, stride=1) == identity

    return pl.pallas_call(
        _make_transition_kernel(H, W, Cin, Cout, downsample),
        out_shape=jax.ShapeDtypeStruct((N, Ho, Wo, Cout), jnp.float32),
        grid=(N,),
        in_specs=in_specs,
        out_specs=pl.BlockSpec((1, Ho, Wo, Cout), lambda n: (n, 0, 0, 0)),
        compiler_params=pltpu.CompilerParams(dimension_semantics=("parallel",)),
    )(*in_arrays)


# ---------------------------------------------------------------------------
# Full DenseNet forward (Pallas path)
# ---------------------------------------------------------------------------
def densenet_forward(x_nchw, params):
    x = jnp.transpose(x_nchw, (0, 2, 3, 1)).astype(jnp.float32)   # NHWC
    out = _stem(x, params['conv0'], params['bn0'])

    deep = None
    for i, stage in enumerate(params['stages']):
        if stage['type'] == 'dense':
            dil = 2 if stage['index'] == 3 else 1      # index==3 -> dilated 3x3
            for layer in stage['layers']:
                new = _dense_layer(out, layer, dil)
                out = jnp.concatenate([out, new], axis=-1)
        else:
            out = _transition(out, stage)
        if i == 5:
            deep = out

    out_nchw = jnp.transpose(out, (0, 3, 1, 2))
    deep_nchw = None if deep is None else jnp.transpose(deep, (0, 3, 1, 2))
    return out_nchw, deep_nchw


# ---------------------------------------------------------------------------
# Parameter construction (random init; pretrained weights are not loaded)
# ---------------------------------------------------------------------------
def init_densenet_params(key, block_config=(2, 2, 2, 2), num_init_features=16,
                         growth_rate=8, bn_size=4):
    counter = [0]

    def next_key():
        counter[0] += 1
        return jax.random.fold_in(key, counter[0])

    def conv_w(kh, kw, cin, cout):
        fan_in = kh * kw * cin
        return (jax.random.normal(next_key(), (kh, kw, cin, cout), jnp.float32)
                * math.sqrt(2.0 / fan_in))

    def bn_p(c):
        return dict(
            gamma=1.0 + 0.1 * jax.random.normal(next_key(), (c,), jnp.float32),
            beta=0.1 * jax.random.normal(next_key(), (c,), jnp.float32),
            mean=0.1 * jax.random.normal(next_key(), (c,), jnp.float32),
            var=jax.random.uniform(next_key(), (c,), jnp.float32, 0.5, 1.5),
        )

    params = dict(conv0=conv_w(7, 7, 3, num_init_features),
                  bn0=bn_p(num_init_features), stages=[])
    nf = num_init_features
    for i, nl in enumerate(block_config):
        layers = []
        for l in range(nl):
            cin = nf + l * growth_rate
            layers.append(dict(
                bn1=bn_p(cin),
                conv1=conv_w(1, 1, cin, bn_size * growth_rate),
                bn2=bn_p(bn_size * growth_rate),
                conv2=conv_w(3, 3, bn_size * growth_rate, growth_rate),
            ))
        params['stages'].append(dict(type='dense', index=i, layers=layers))
        nf += nl * growth_rate
        if i != len(block_config) - 1:
            params['stages'].append(dict(
                type='transition', downsample=(i < 1),
                bn=bn_p(nf), conv=conv_w(1, 1, nf, nf // 2)))
            nf //= 2
    return params


# ---------------------------------------------------------------------------
# Pure-JAX reference (mirrors the torch forward with eval-mode BN)
# ---------------------------------------------------------------------------
def _bn_ref(x, bn):
    return (x - bn['mean']) * (bn['gamma'] / jnp.sqrt(bn['var'] + _BN_EPS)) + bn['beta']


def _conv_ref(x, w, stride=1, padding=0, dilation=1):
    return lax.conv_general_dilated(
        x, w, window_strides=(stride, stride),
        padding=[(padding, padding), (padding, padding)],
        rhs_dilation=(dilation, dilation),
        dimension_numbers=('NHWC', 'HWIO', 'NHWC'),
        precision=lax.Precision.HIGHEST)


def densenet_reference(x_nchw, params):
    x = jnp.transpose(x_nchw, (0, 2, 3, 1)).astype(jnp.float32)
    y = _conv_ref(x, params['conv0'], stride=2, padding=3)
    y = jax.nn.relu(_bn_ref(y, params['bn0']))
    y = lax.reduce_window(y, -jnp.inf, lax.max, (1, 3, 3, 1), (1, 2, 2, 1),
                          [(0, 0), (1, 1), (1, 1), (0, 0)])
    out, deep = y, None
    for i, stage in enumerate(params['stages']):
        if stage['type'] == 'dense':
            dil = 2 if stage['index'] == 3 else 1
            for layer in stage['layers']:
                t = jax.nn.relu(_bn_ref(out, layer['bn1']))
                t = _conv_ref(t, layer['conv1'])
                t = jax.nn.relu(_bn_ref(t, layer['bn2']))
                t = _conv_ref(t, layer['conv2'], padding=dil, dilation=dil)
                out = jnp.concatenate([out, t], axis=-1)
        else:
            t = jax.nn.relu(_bn_ref(out, stage['bn']))
            t = _conv_ref(t, stage['conv'])
            if stage['downsample']:
                t = lax.reduce_window(t, 0.0, lax.add, (1, 2, 2, 1),
                                      (1, 2, 2, 1), 'VALID') * 0.25
            out = t
        if i == 5:
            deep = out
    return jnp.transpose(out, (0, 3, 1, 2)), jnp.transpose(deep, (0, 3, 1, 2))


# ---------------------------------------------------------------------------
# Main
# ---------------------------------------------------------------------------
if __name__ == "__main__":
    key = jax.random.PRNGKey(0)
    # Small configuration consistent with the module (defaults: growth_rate=8,
    # num_init_features=16, bn_size=4; block_config shrunk from (6,12,24,16)).
    block_config = (2, 2, 2, 2)
    params = init_densenet_params(key, block_config=block_config,
                                  num_init_features=16, growth_rate=8, bn_size=4)
    x = jax.random.normal(jax.random.fold_in(key, 12345), (2, 3, 32, 32),
                          jnp.float32)

    out, deep = densenet_forward(x, params)
    out = jax.block_until_ready(out)
    deep = jax.block_until_ready(deep)

    ref_out, ref_deep = densenet_reference(x, params)
    ref_out = jax.block_until_ready(ref_out)
    ref_deep = jax.block_until_ready(ref_deep)

    assert out.shape == (2, 32, 4, 4), out.shape
    assert deep.shape == (2, 16, 4, 4), deep.shape
    np.testing.assert_allclose(np.asarray(out), np.asarray(ref_out),
                               rtol=5e-3, atol=5e-3)
    np.testing.assert_allclose(np.asarray(deep), np.asarray(ref_deep),
                               rtol=5e-3, atol=5e-3)
    print("KERNEL_OK")
</pallas_src>

<mosaic_0001>
module attributes {stable_mosaic.version = 11 : i64} {
  func.func @kernel(%arg0: i32, %arg1: memref<1x256x147xf32, #tpu.memory_space<vmem>>, %arg2: memref<147x16xf32, #tpu.memory_space<vmem>>, %arg3: memref<1x16xf32, #tpu.memory_space<vmem>>, %arg4: memref<1x16xf32, #tpu.memory_space<vmem>>, %arg5: memref<1x16x16x16xf32, #tpu.memory_space<vmem>>, %arg6: memref<18x18x16xf32, #tpu.memory_space<vmem>>) attributes {dimension_semantics = [#tpu.dimension_semantics<parallel>], iteration_bounds = array<i64: 2>, scalar_prefetch = 0 : i64, scratch_operands = 1 : i64, tpu.core_type = #tpu.core_type<tc>, window_params = [{transform_indices = @transform_0, window_bounds = array<i64: 1, 256, 147>}, {pipeline_mode = #tpu.pipeline_mode<synchronous>, transform_indices = @transform_1, window_bounds = array<i64: 147, 16>}, {pipeline_mode = #tpu.pipeline_mode<synchronous>, transform_indices = @transform_2, window_bounds = array<i64: 1, 16>}, {pipeline_mode = #tpu.pipeline_mode<synchronous>, transform_indices = @transform_3, window_bounds = array<i64: 1, 16>}, {transform_indices = @transform_4, window_bounds = array<i64: 1, 16, 16, 16>}]} {
    %c0 = arith.constant 0 : index
    %c0_0 = arith.constant 0 : index
    %c0_1 = arith.constant 0 : index
    %0 = vector.load %arg1[%c0, %c0_0, %c0_1] : memref<1x256x147xf32, #tpu.memory_space<vmem>>, vector<1x256x147xf32>
    %1 = vector.shape_cast %0 : vector<1x256x147xf32> to vector<256x147xf32>
    %c0_2 = arith.constant 0 : index
    %c0_3 = arith.constant 0 : index
    %2 = vector.load %arg2[%c0_2, %c0_3] : memref<147x16xf32, #tpu.memory_space<vmem>>, vector<147x16xf32>
    %cst = arith.constant dense<0.000000e+00> : vector<256x16xf32>
    %3 = tpu.matmul %1, %2, %cst {dimension_numbers = #tpu.dot_dimension_numbers<[1], [0], [0], [1], [0, 0, 1, 1], [], []>, precision = #tpu.contract_precision<fp32>} : vector<256x147xf32>, vector<147x16xf32>, vector<256x16xf32> -> vector<256x16xf32>
    %c0_4 = arith.constant 0 : index
    %c0_5 = arith.constant 0 : index
    %4 = vector.load %arg3[%c0_4, %c0_5] : memref<1x16xf32, #tpu.memory_space<vmem>>, vector<1x16xf32>
    %5 = vector.broadcast %4 : vector<1x16xf32> to vector<256x16xf32>
    %6 = arith.mulf %3, %5 : vector<256x16xf32>
    %c0_6 = arith.constant 0 : index
    %c0_7 = arith.constant 0 : index
    %7 = vector.load %arg4[%c0_6, %c0_7] : memref<1x16xf32, #tpu.memory_space<vmem>>, vector<1x16xf32>
    %8 = vector.broadcast %7 : vector<1x16xf32> to vector<256x16xf32>
    %9 = arith.addf %6, %8 : vector<256x16xf32>
    %cst_8 = arith.constant 0.000000e+00 : f32
    %10 = vector.broadcast %cst_8 : f32 to vector<256x16xf32>
    %11 = arith.maximumf %9, %10 : vector<256x16xf32>
    %cst_9 = arith.constant 0.000000e+00 : f32
    %12 = vector.broadcast %cst_9 : f32 to vector<18x18x16xf32>
    %c0_10 = arith.constant 0 : index
    %c0_11 = arith.constant 0 : index
    %c0_12 = arith.constant 0 : index
    %13 = vector.load %arg6[%c0_10, %c0_11, %c0_12] : memref<18x18x16xf32, #tpu.memory_space<vmem>>, vector<18x18x16xf32>
    tpu.vector_store %arg6[%c0_10, %c0_11, %c0_12], %12 {strides = array<i32>} : memref<18x18x16xf32, #tpu.memory_space<vmem>>, vector<18x18x16xf32>,
    %14 = vector.shape_cast %11 : vector<256x16xf32> to vector<16x16x16xf32>
    %c1 = arith.constant 1 : index
    %c1_13 = arith.constant 1 : index
    %c0_14 = arith.constant 0 : index
    %15 = vector.load %arg6[%c1, %c1_13, %c0_14] : memref<18x18x16xf32, #tpu.memory_space<vmem>>, vector<16x16x16xf32>
    tpu.vector_store %arg6[%c1, %c1_13, %c0_14], %14 {strides = array<i32>} : memref<18x18x16xf32, #tpu.memory_space<vmem>>, vector<16x16x16xf32>,
    %c0_15 = arith.constant 0 : index
    %c0_16 = arith.constant 0 : index
    %c0_17 = arith.constant 0 : index
    %16 = vector.load %arg6[%c0_15, %c0_16, %c0_17] : memref<18x18x16xf32, #tpu.memory_space<vmem>>, vector<16x16x16xf32>
    %c0_18 = arith.constant 0 : index
    %c1_19 = arith.constant 1 : index
    %c0_20 = arith.constant 0 : index
    %17 = vector.load %arg6[%c0_18, %c1_19, %c0_20] : memref<18x18x16xf32, #tpu.memory_space<vmem>>, vector<16x16x16xf32>
    %18 = arith.maximumf %16, %17 : vector<16x16x16xf32>
    %c0_21 = arith.constant 0 : index
    %c2 = arith.constant 2 : index
    %c0_22 = arith.constant 0 : index
    %19 = vector.load %arg6[%c0_21, %c2, %c0_22] : memref<18x18x16xf32, #tpu.memory_space<vmem>>, vector<16x16x16xf32>
    %20 = arith.maximumf %18, %19 : vector<16x16x16xf32>
    %c1_23 = arith.constant 1 : index
    %c0_24 = arith.constant 0 : index
    %c0_25 = arith.constant 0 : index
    %21 = vector.load %arg6[%c1_23, %c0_24, %c0_25] : memref<18x18x16xf32, #tpu.memory_space<vmem>>, vector<16x16x16xf32>
    %22 = arith.maximumf %20, %21 : vector<16x16x16xf32>
    %c1_26 = arith.constant 1 : index
    %c1_27 = arith.constant 1 : index
    %c0_28 = arith.constant 0 : index
    %23 = vector.load %arg6[%c1_26, %c1_27, %c0_28] : memref<18x18x16xf32, #tpu.memory_space<vmem>>, vector<16x16x16xf32>
    %24 = arith.maximumf %22, %23 : vector<16x16x16xf32>
    %c1_29 = arith.constant 1 : index
    %c2_30 = arith.constant 2 : index
    %c0_31 = arith.constant 0 : index
    %25 = vector.load %arg6[%c1_29, %c2_30, %c0_31] : memref<18x18x16xf32, #tpu.memory_space<vmem>>, vector<16x16x16xf32>
    %26 = arith.maximumf %24, %25 : vector<16x16x16xf32>
    %c2_32 = arith.constant 2 : index
    %c0_33 = arith.constant 0 : index
    %c0_34 = arith.constant 0 : index
    %27 = vector.load %arg6[%c2_32, %c0_33, %c0_34] : memref<18x18x16xf32, #tpu.memory_space<vmem>>, vector<16x16x16xf32>
    %28 = arith.maximumf %26, %27 : vector<16x16x16xf32>
    %c2_35 = arith.constant 2 : index
    %c1_36 = arith.constant 1 : index
    %c0_37 = arith.constant 0 : index
    %29 = vector.load %arg6[%c2_35, %c1_36, %c0_37] : memref<18x18x16xf32, #tpu.memory_space<vmem>>, vector<16x16x16xf32>
    %30 = arith.maximumf %28, %29 : vector<16x16x16xf32>
    %c2_38 = arith.constant 2 : index
    %c2_39 = arith.constant 2 : index
    %c0_40 = arith.constant 0 : index
    %31 = vector.load %arg6[%c2_38, %c2_39, %c0_40] : memref<18x18x16xf32, #tpu.memory_space<vmem>>, vector<16x16x16xf32>
    %32 = arith.maximumf %30, %31 : vector<16x16x16xf32>
    %c0_41 = arith.constant 0 : index
    %c0_42 = arith.constant 0 : index
    %c0_43 = arith.constant 0 : index
    %c0_44 = arith.constant 0 : index
    %33 = vector.load %arg5[%c0_41, %c0_42, %c0_43, %c0_44] : memref<1x16x16x16xf32, #tpu.memory_space<vmem>>, vector<1x16x16x16xf32>
    %34 = vector.shape_cast %33 : vector<1x16x16x16xf32> to vector<16x16x16xf32>
    %35 = vector.shape_cast %32 : vector<16x16x16xf32> to vector<1x16x16x16xf32>
    tpu.vector_store %arg5[%c0_41, %c0_42, %c0_43, %c0_44], %35 {strides = array<i32>} : memref<1x16x16x16xf32, #tpu.memory_space<vmem>>, vector<1x16x16x16xf32>,
    return
  }
  func.func @transform_0(%arg0: i32) -> (i32, i32, i32) {
    %c0_i32 = arith.constant 0 : i32
    %c0_i32_0 = arith.constant 0 : i32
    %c0_i32_1 = arith.constant 0 : i32
    return %arg0, %c0_i32, %c0_i32_0 : i32, i32, i32
  }
  func.func @transform_1(%arg0: i32) -> (i32, i32) {
    %c0_i32 = arith.constant 0 : i32
    %c0_i32_0 = arith.constant 0 : i32
    %c0_i32_1 = arith.constant 0 : i32
    return %c0_i32, %c0_i32_0 : i32, i32
  }
  func.func @transform_2(%arg0: i32) -> (i32, i32) {
    %c0_i32 = arith.constant 0 : i32
    %c0_i32_0 = arith.constant 0 : i32
    %c0_i32_1 = arith.constant 0 : i32
    return %c0_i32, %c0_i32_0 : i32, i32
  }
  func.func @transform_3(%arg0: i32) -> (i32, i32) {
    %c0_i32 = arith.constant 0 : i32
    %c0_i32_0 = arith.constant 0 : i32
    %c0_i32_1 = arith.constant 0 : i32
    return %c0_i32, %c0_i32_0 : i32, i32
  }
  func.func @transform_4(%arg0: i32) -> (i32, i32, i32, i32) {
    %c0_i32 = arith.constant 0 : i32
    %c0_i32_0 = arith.constant 0 : i32
    %c0_i32_1 = arith.constant 0 : i32
    %c0_i32_2 = arith.constant 0 : i32
    return %arg0, %c0_i32, %c0_i32_0, %c0_i32_1 : i32, i32, i32, i32
  }
}

</mosaic_0001>

<bundles_post_ra>
// kernel: tpu_custom_call.1
= control target key start
LH: loop header
LB: loop body
LE: loop exit
PB: predicated region body
PF: predicated region fallthrough
CT: control target
= control target key end

     0   :  { %9 = vsyncpa [#allocation4], 0  ;;  %s6087_s0 = inlined_call_operand.vmem [shape: f32[2,256,147], index: 0, kind: input, shape index: {}]   ;;  %s6088_s1 = inlined_call_operand.vmem [shape: f32[147,16], index: 1, kind: input, shape index: {}]   ;;  %s6089_s2 = inlined_call_operand.vmem [shape: f32[1,16], index: 2, kind: input, shape index: {}]   ;;  %s6090_s3 = inlined_call_operand.vmem [shape: f32[1,16], index: 3, kind: input, shape index: {}]   ;;  %s6091_s4 = inlined_call_operand.hbm [shape: f32[2,16,16,16], index: 4, kind: output, shape index: {}]  }
   0x1   :  { %11 = vsyncpa [#allocation4 + $0x1], 0  ;;  %s4266_s15 = smov 0   ;;  %s4268_s16 = smov 0  }
   0x2   :  { %s4270_s17 = smov 0   ;;  %s4272_s18 = smov 0  }
   0x3 LB: > { %s4287_s19 = sadd.s32 4294967295, %s4234_s18   ;;  %s3661_s20 = sadd.s32 4294967294, %s4234_s18   ;;  %s4234_s18 = sphi %s4272_s18, %s6645_s18   ;;  %s4230_s17 = sphi %s4270_s17, %s6644_s17   ;;  %s4226_s16 = sphi %s4268_s16, %s6643_s16   ;;  %s4222_s15 = sphi %s4266_s15, %s6642_s15  }
   0x4   : > { %s4291_s21 = sadd.s32 1, %s4234_s18   ;;  %s113_s22 = sadd.s32 1, %s4230_s17 }
   0x5   : > { %s110_s23 = ssub.s32 %s4234_s18, %s4291_s21  ;;  %p123_p0 = scmp.ne.s32.totalorder %s4230_s17, %s4226_s16 }
   0x6   : > { %p111_p1 = scmp.eq.s32.totalorder %s110_s23, 0  ;;  %p124_p2 = scmp.eq.s32.totalorder %s4287_s19, 1 }
   0x7   : > { %p129_p3 = scmp.ne.s32.totalorder %s4226_s16, %s4222_s15  ;;  %p130_p4 = scmp.eq.s32.totalorder %s3661_s20, 1 }
   0x8   : > { %s4302_s24 = scalar_select %p111_p1, %s4230_s17, %s113_s22  }
   0x9   : > { %p4304_p5 = por %p124_p2, %p123_p0  ;;  %p4308_p6 = por %p130_p4, %p129_p3 }
   0xa   : > { %p3664_p7 = scmp.ge.s32.totalorder %s4234_s18, 1  ;;  %p165_p8 = scmp.lt.s32.totalorder %s4234_s18, 3 }
   0xc   : > { %p166_p9 = pnand %p3664_p7, %p165_p8 }
   0xe   : > { %169 = sbr.rel (%p166_p9) target bundleno = 704 (0x2c0), region = 36 }
  0x15   : > { %v260_v0 = vld [vmem:[%s6088_s1] sm:$0xff]  ;;  %v4320_v1 = vld [vmem:[%s6088_s1 + $0x8] sm:$0xff]  ;;  %v4325_v2 = vld [vmem:[%s6088_s1 + $0x10] sm:$0xff]  ;;  %v6098_v3 = vmov 0.0|0.0   ;;  %p191_p10 = scmp.lt.s32.totalorder %s4287_s19, 1  ;;  %vm279_vm0 = vcmask 154624  }
  0x16   : > { %3677 = vmatprep.subr.bf16.mxu1 %v6098_v3  ;;  %3758 = vmatprep.subr.bf16.mxu0 %v6098_v3  ;;  %v381_v4 = vand.u32 4294901760, %v260_v0  ;;  %v384_v5 = vand.u32 4294901760, %v4320_v1  ;;  %v4333_v6 = vld [vmem:[%s6088_s1 + $0x18] sm:$0xff]  ;;  %v387_v7 = vand.u32 4294901760, %v4325_v2  ;;  %v4340_v9 = vld [vmem:[%s6088_s1 + $0x20] sm:$0xff]  ;;  %v4345_v10 = vld [vmem:[%s6088_s1 + $0x28] sm:$0xff] }
  0x17   : > { %v390_v8 = vand.u32 4294901760, %v4333_v6  ;;  %v393_v13 = vand.u32 4294901760, %v4340_v9  ;;  %v396_v14 = vand.u32 4294901760, %v4345_v10  ;;  %v4365_v15 = vld [vmem:[%s6088_s1 + $0x30] sm:$0xff]  ;;  %v4370_v16 = vld [vmem:[%s6088_s1 + $0x38] sm:$0xff]  ;;  %v4375_v17 = vld [vmem:[%s6088_s1 + $0x80] sm:$0xff] }
  0x18   : > { %v4347_v11 = vpack.c.bf16 %v384_v5, %v381_v4  ;;  %s192_s28 = scalar_select %p191_p10, %s4287_s19, 1  ;;  %v4381_v18 = vld [vmem:[%s6088_s1 + $0x88] sm:$0xff]  ;;  %v399_v20 = vand.u32 4294901760, %v4365_v15  ;;  %v402_v21 = vand.u32 4294901760, %v4370_v16  ;;  %v4396_v22 = vld [vmem:[%s6088_s1 + $0x40] sm:$0xff]  ;;  %v429_v24 = vand.u32 4294901760, %v4375_v17 }
  0x19   : > { %v4356_v12 = vpack.c.bf16 %v390_v8, %v387_v7  ;;  %v4389_v19 = vpack.c.bf16 %v396_v14, %v393_v13  ;;  %v4403_v23 = vld [vmem:[%s6088_s1 + $0x48] sm:$0xff]  ;;  %v432_v25 = vand.u32 4294901760, %v4381_v18  ;;  %v405_v27 = vand.u32 4294901760, %v4396_v22  ;;  %v4438_v32 = vld [vmem:[%s6088_s1 + $0x50] sm:$0xff]  ;;  %v4443_v33 = vld [vmem:[%s6088_s1 + $0x58] sm:$0xff]  ;;  %s188_s14 = sand.u32 1, %s4226_s16  }
  0x1a   : > { %3679 = vmatpush1.bf16.msra.mxu1 %v4347_v11  ;;  %3760 = vmatpush1.bf16.msra.mxu0 %v4347_v11  ;;  %s3675_s7 = sshll.u32 %s192_s28, 9  ;;  %v4417_v28 = vsub.f32 %v4375_v17, %v429_v24  ;;  %v4425_v29 = vpack.c.bf16 %v402_v21, %v399_v20  ;;  %v408_v30 = vand.u32 4294901760, %v4403_v23  ;;  %v6097_v37 = vand.u32 4294901760, %v4438_v32  ;;  %v4469_v42 = vld [vmem:[%s6088_s1 + $0x60] sm:$0xff]  ;;  %v4474_v43 = vld [vmem:[%s6088_s1 + $0x68] sm:$0xff]  ;;  %v4500_v54 = vld [vmem:[%s6088_s1 + $0x70] sm:$0xff] }
  0x1b   : > { %6288 = vst [vmem:[#allocation6_spill] sm:$0xff] %v4356_v12  ;;  %3680 = vmatprep.subr.bf16.mxu1 %v6098_v3  ;;  %3761 = vmatprep.subr.bf16.mxu0 %v6098_v3  ;;  %6289 = vst [vmem:[#allocation7_spill] sm:$0xff] %v4389_v19  ;;  %s4409_s12 = scalar_lea.vmem %s6087_s0, %s3675_s7  ;;  %v4431_v31 = vsub.f32 %v4381_v18, %v432_v25  ;;  %v6094_v38 = vand.u32 4294901760, %v4443_v33  ;;  %v4462_v41 = vsub.f32 %v260_v0, %v381_v4  ;;  %v4505_v55 = vld [vmem:[%s6088_s1 + $0x78] sm:$0xff]  ;;  %vm376_vm1 = vcmask 1042432   ;;  %s3665_s20 = sshll.u32 %s188_s14, 8 }
  0x1c   : > { %v197_v26 = vld [vmem:[%s4409_s12 + $0x8] sm:$0xff]  ;;  %6290 = vst [vmem:[#allocation8_spill] sm:$0xff] %v4425_v29  ;;  %v4454_v36 = vpack.c.bf16 %v408_v30, %v405_v27  ;;  %v199_v40 = vld [vmem:[%s4409_s12 + $0x18] sm:$0xff]  ;;  %v4477_v44 = vsub.f32 %v4320_v1, %v384_v5  ;;  %v196_v46 = vld [vmem:[%s4409_s12] sm:$0xff]  ;;  %v6093_v50 = vand.u32 4294901760, %v4469_v42  ;;  %v6092_v51 = vand.u32 4294901760, %v4474_v43 }
  0x1d   : > { %v281_v34 = vsel %vm279_vm0, %v197_v26, 0  ;;  %v284_v47 = vsel %vm279_vm0, %v199_v40, 0  ;;  %v201_v48 = vld [vmem:[%s4409_s12 + $0x28] sm:$0xff]  ;;  %v4489_v49 = vpack.c.bf16 %v6094_v38, %v6097_v37  ;;  %v198_v53 = vld [vmem:[%s4409_s12 + $0x10] sm:$0xff]  ;;  %v4507_v56 = vand.u32 4294901760, %v196_v46  ;;  %v200_v63 = vld [vmem:[%s4409_s12 + $0x20] sm:$0xff] }
  0x1e   : > { %3682 = vmatpush1.bf16.msra.mxu1 %v4356_v12  ;;  %3763 = vmatpush1.bf16.msra.mxu0 %v4356_v12  ;;  %v4446_v35 = vand.u32 4294901760, %v281_v34  ;;  %6291 = vst [vmem:[#allocation9_spill] sm:$0xff] %v4454_v36  ;;  %v947_v57 = vand.u32 4294901760, %v4462_v41  ;;  %v954_v59 = vand.u32 4294901760, %v4477_v44  ;;  %v4511_v60 = vand.u32 4294901760, %v284_v47  ;;  %v203_v0 = vld [vmem:[%s4409_s12 + $0x38] sm:$0xff] }
  0x1f   : > { %3683 = vmatprep.subr.bf16.mxu1 %v6098_v3  ;;  %3764 = vmatprep.subr.bf16.mxu0 %v6098_v3  ;;  %6293 = vst [vmem:[#allocation11_spill] sm:$0xff] %v4489_v49  ;;  %v287_v61 = vsel %vm279_vm0, %v201_v48, 0  ;;  %v4514_v62 = vand.u32 4294901760, %v198_v53  ;;  %v4524_v1 = vpack.c.bf16 %v6092_v51, %v6093_v50  ;;  %v6096_v4 = vand.u32 4294901760, %v4500_v54  ;;  %v205_v38 = vld [vmem:[%s4409_s12 + $0x48] sm:$0xff]  ;;  %s5883_s22 = scalar_lea.vmem [#allocation3], %s3665_s20 }
  0x20   : > { %v4459_v39 = vsub.f32 %v281_v34, %v4446_v35  ;;  %v6095_v5 = vand.u32 4294901760, %v4505_v55  ;;  %v4531_v26 = vsub.f32 %v4325_v2, %v387_v7  ;;  %v278_v34 = vld [vmem:[%s6088_s1 + $0x90] sm:$0x7]  ;;  %v4539_v40 = vsub.f32 %v196_v46, %v4507_v56  ;;  %s3676_s30 = sshll.u32 %s4287_s19, 12  ;;  %s3599_s5 = sshll.u32 %s5883_s22, 4  ;;  %s6040_s5 = int_to_ptr.vmem [resolvable:$true] %s3599_s5 }
  0x21   : > { %6294 = vst [vmem:[#allocation12_spill] sm:$0xff] %v4524_v1  ;;  %v4544_v48 = vand.u32 4294901760, %v287_v61  ;;  %v955_v2 = vsub.f32 %v4477_v44, %v954_v59  ;;  %v4550_v7 = vsub.f32 %v284_v47, %v4511_v60  ;;  %v290_v46 = vsel %vm279_vm0, %v203_v0, 0  ;;  %s6038_s8 = scalar_lea.hbm %s6091_s4, %s3676_s30  ;;  %s6046_s19 = scalar_lea.sflag [#allocation4], %s188_s14 }
  0x22   : > { %3685 = vmatpush1.bf16.msra.mxu1 %v4389_v19  ;;  %3766 = vmatpush1.bf16.msra.mxu0 %v4389_v19  ;;  %6292 = vst [vmem:[#allocation10_spill] sm:$0xff] %v4459_v39  ;;  %v465_v45 = vand.u32 4294901760, %v4459_v39  ;;  %6295 = vst [vmem:[#allocation13_spill] sm:$0xff] %v4539_v40  ;;  %v4558_v51 = vsub.f32 %v4333_v6, %v390_v8  ;;  %v4568_v50 = vsub.f32 %v4345_v10, %v396_v14  ;;  %v202_v10 = vld [vmem:[%s4409_s12 + $0x30] sm:$0xff]  ;;  %vm2919_vm2 = vcmask 130048   ;;  %s4172_s9 = scalar_lea.vmem %s6040_s5, 4096 }
  0x23   : > { %3686 = vmatprep.subr.bf16.mxu1 %v6098_v3  ;;  %3767 = vmatprep.subr.bf16.mxu0 %v6098_v3  ;;  %6296 = vst [vmem:[#allocation14_spill] sm:$0xff] %v4550_v7  ;;  %v4571_v47 = vsub.f32 %v198_v53, %v4514_v62  ;;  %v4577_v0 = vsub.f32 %v4365_v15, %v399_v20  ;;  %v956_v20 = vand.u32 4294901760, %v955_v2  ;;  %v4620_v2 = vand.u32 4294901760, %v202_v10  ;;  %p4173_p11 = scmp.ne.s32.totalorder %s6040_s5, %s4172_s9  ;;  %s4238_s10 = smov [#allocation3]  }
  0x24   : > { %v466_v52 = vsub.f32 %v4459_v39, %v465_v45  ;;  %1805 = vmatprep.mubr.f32.mxu0 %v465_v45  ;;  %v948_v45 = vsub.f32 %v4462_v41, %v947_v57  ;;  %v4582_v6 = vsub.f32 %v4370_v16, %v402_v21  ;;  %v4590_v8 = vpack.c.bf16 %v6095_v5, %v6096_v4  ;;  %s4176_s11 = sshll.u32 %s4238_s10, 4  ;;  %s4177_s11 = int_to_ptr.vmem [resolvable:$false] %s4176_s11 }
  0x25   : > { %6298 = vst [vmem:[#allocation16_spill] sm:$0xff] %v4571_v47  ;;  %v4600_v15 = vsub.f32 %v287_v61, %v4544_v48  ;;  %v4602_v16 = vand.u32 4294901760, %v290_v46  ;;  %v6102_v21 = vand.u32 4294901760, %v4550_v7  ;;  %v4612_v5 = vsub.f32 %v4396_v22, %v405_v27  ;;  %6303 = vst [vmem:[#allocation21_spill] sm:$0xff] %v4620_v2  ;;  %p4174_p12 = pnand %p4173_p11, %p4304_p5  ;;  %p4179_p0 = scmp.lt.s32.totalorder %s6040_s5, %s4177_s11 }
  0x26   : > { %3688 = vmatpush1.bf16.msra.mxu1 %v4425_v29  ;;  %3769 = vmatpush1.bf16.msra.mxu0 %v4425_v29  ;;  %v467_v58 = vand.u32 4294901760, %v466_v52  ;;  %v4552_v52 = vand.u32 4294901760, %v200_v63  ;;  %6299 = vst [vmem:[#allocation17_spill] sm:$0xff] %v4590_v8  ;;  %v949_v14 = vand.u32 4294901760, %v948_v45  ;;  %v4617_v61 = vsub.f32 %v4403_v23, %v408_v30  ;;  %v204_v30 = vld [vmem:[%s4409_s12 + $0x40] sm:$0xff] }
  0x27   : > { %3689 = vmatprep.subr.bf16.mxu1 %v6098_v3  ;;  %3770 = vmatprep.subr.bf16.mxu0 %v6098_v3  ;;  %6300 = vst [vmem:[#allocation18_spill] sm:$0xff] %v4600_v15  ;;  %6301 = vst [vmem:[#allocation19_spill] sm:$0xff] %v4602_v16  ;;  %v6103_v45 = vand.u32 4294901760, %v4571_v47  ;;  %v961_v23 = vand.u32 4294901760, %v4531_v26  ;;  %v968_v27 = vand.u32 4294901760, %v4558_v51  ;;  %v3786_v37 = vpack.c.bf16 %v954_v59, %v947_v57  ;;  %p4175_p13 = pneg %p4174_p12 }
  0x28   : > { %468 = vmatprep.mubr.f32.mxu1 %v467_v58  ;;  %6297 = vst [vmem:[#allocation15_spill] sm:$0xff] %v4552_v52  ;;  %v4563_v58 = vsub.f32 %v4340_v9, %v393_v13  ;;  %v4593_v9 = vsel %vm376_vm1, %v278_v34, 0  ;;  %v6100_v13 = vand.u32 4294901760, %v4539_v40  ;;  %v4606_v53 = vsub.f32 %v200_v63, %v4552_v52  ;;  %v207_v63 = vld [vmem:[%s4409_s12 + $0x58] sm:$0xff] }
  0x29   : > { %v293_v34 = vsel %vm279_vm0, %v205_v38, 0  ;;  %v4628_v38 = vpack.c.bf16 %v432_v25, %v429_v24  ;;  %v4631_v22 = vand.u32 4294901760, %v4593_v9  ;;  %v4644_v24 = vsub.f32 %v290_v46, %v4602_v16 }
  0x2a   : > { %3691 = vmatpush1.bf16.msra.mxu1 %v4454_v36  ;;  %3772 = vmatpush1.bf16.msra.mxu0 %v4454_v36  ;;  %6302 = vst [vmem:[#allocation20_spill] sm:$0xff] %v4606_v53  ;;  %v472_v17 = vsub.f32 %v4539_v40, %v6100_v13  ;;  %v4646_v25 = vand.u32 4294901760, %v293_v34  ;;  %v3705_v4 = vpack.c.bf16 %v956_v20, %v949_v14  ;;  %v4662_v39 = vand.u32 4294901760, %v204_v30  ;;  %v209_v20 = vld [vmem:[%s4409_s12 + $0x68] sm:$0xff] }
  0x2b   : > { %3692 = vmatprep.subr.bf16.mxu1 %v6098_v3  ;;  %3773 = vmatprep.subr.bf16.mxu0 %v6098_v3  ;;  %6304 = vst [vmem:[#allocation22_spill] sm:$0xff] %v4628_v38  ;;  %6305 = vst [vmem:[#allocation23_spill] sm:$0xff] %v4644_v24  ;;  %v487_v18 = vsub.f32 %v4571_v47, %v6103_v45  ;;  %v4660_v46 = vsub.f32 %v202_v10, %v4620_v2  ;;  %v296_v14 = vsel %vm279_vm0, %v207_v63, 0  ;;  %v6110_v10 = vmov 0.0  }
  0x2c   : > { %6306 = vst [vmem:[#allocation24_spill] sm:$0xff] %v4646_v25  ;;  %6308 = vst [vmem:[#allocation26_spill] sm:$0xff] %v4662_v39  ;;  %v962_v57 = vsub.f32 %v4531_v26, %v961_v23  ;;  %v969_v59 = vsub.f32 %v4558_v51, %v968_v27  ;;  %v473_v63 = vand.u32 4294901760, %v472_v17  ;;  %v6311_v45 = vand.u32 4294901760, %v4606_v53 }
  0x2d   : > { %6307 = vst [vmem:[#allocation25_spill] sm:$0xff] %v4660_v46  ;;  %v4687_v29 = vand.u32 4294901760, %v296_v14  ;;  %v299_v17 = vsel %vm279_vm0, %v209_v20, 0  ;;  %v6314_v19 = vand.u32 4294901760, %v4563_v58  ;;  %v6317_v16 = vand.u32 4294901760, %v4644_v24 }
  0x2e   : > { %3694 = vmatpush1.bf16.msra.mxu1 %v4489_v49  ;;  %3775 = vmatpush1.bf16.msra.mxu0 %v4489_v49  ;;  %v4680_v49 = vsub.f32 %v293_v34, %v4646_v25  ;;  %v4685_v36 = vsub.f32 %v4606_v53, %v6311_v45  ;;  %v211_v34 = vld [vmem:[%s4409_s12 + $0x78] sm:$0xff]  ;;  %v970_v45 = vand.u32 4294901760, %v969_v59  ;;  %v208_v25 = vld [vmem:[%s4409_s12 + $0x60] sm:$0xff]  ;;  %v4711_v59 = vand.u32 4294901760, %v299_v17 }
  0x2f   : > { %3695 = vmatprep.subr.bf16.mxu1 %v6098_v3  ;;  %3776 = vmatprep.subr.bf16.mxu0 %v6098_v3  ;;  %6312 = vst [vmem:[#allocation28_spill] sm:$0xff] %v4687_v29  ;;  %v976_v20 = vsub.f32 %v4563_v58, %v6314_v19  ;;  %v511_v52 = vsub.f32 %v4644_v24, %v6317_v16  ;;  %v6319_v12 = vand.u32 4294901760, %v4539_v40  ;;  %v6321_v16 = vand.u32 4294901760, %v4660_v46 }
  0x30   : > { %6310 = vst [vmem:[#allocation27_spill] sm:$0xff] %v4680_v49  ;;  %6318 = vst [vmem:[#allocation30_spill] sm:$0xff] %v4711_v59  ;;  %v503_v19 = vand.u32 4294901760, %v4685_v36  ;;  %v4730_v36 = vand.u32 4294901760, %v208_v25  ;;  %vm2922_vm3 = vcmask 123904  }
  0x32   : > { %3697 = vmatpush1.bf16.msra.mxu1 %v4524_v1  ;;  %3778 = vmatpush1.bf16.msra.mxu0 %v4524_v1  ;;  %6323 = vst [vmem:[#allocation33_spill] sm:$0xff] %v4730_v36 }
  0x33   : > { %3698 = vmatprep.subr.bf16.mxu1 %v6098_v3  ;;  %3779 = vmatprep.subr.bf16.mxu0 %v6098_v3 }
  0x36   : > { %3700 = vmatpush1.bf16.msra.mxu1 %v4590_v8  ;;  %3781 = vmatpush1.bf16.msra.mxu0 %v4590_v8  ;;  %v6309_v8 = vand.u32 4294901760, %v4600_v15 }
  0x37   : > { %3701 = vmatprep.subr.bf16.mxu1 %v6098_v3  ;;  %3782 = vmatprep.subr.bf16.mxu0 %v6098_v3  ;;  %v481_v3 = vsub.f32 %v4550_v7, %v6102_v21  ;;  %v206_v21 = vld [vmem:[%s4409_s12 + $0x50] sm:$0xff] }
  0x38   : > { %v4694_v1 = vand.u32 4294901760, %v206_v21 }
  0x39   : > { %v482_v13 = vand.u32 4294901760, %v481_v3  ;;  %v963_v3 = vand.u32 4294901760, %v962_v57  ;;  %v4724_v57 = vsub.f32 %v4660_v46, %v6321_v16  ;;  %v512_v16 = vand.u32 4294901760, %v511_v52 }
  0x3a   : > { %3703 = vmatpush1.bf16.msra.mxu1 %v4628_v38  ;;  %3784 = vmatpush1.bf16.msra.mxu0 %v4628_v38  ;;  %v496_v38 = vsub.f32 %v4600_v15, %v6309_v8  ;;  %v4692_v8 = vsub.f32 %v204_v30, %v4662_v39  ;;  %v6316_v30 = vmov 0.0|0.0   ;;  %v4728_v40 = vsub.f32 %v206_v21, %v4694_v1 }
  0x3b   : > { %434 = vmatprep.subr.mxu1 %v6110_v10  ;;  %1773 = vmatprep.subr.mxu0 %v6110_v10  ;;  %v488_v10 = vand.u32 4294901760, %v487_v18  ;;  %v6315_v18 = vand.u32 4294901760, %v4568_v50  ;;  %v6325_v21 = vand.u32 4294901760, %v4680_v49 }
  0x3c   : > { %6313 = vst [vmem:[#allocation29_spill] sm:$0xff] %v4692_v8  ;;  %v497_v39 = vand.u32 4294901760, %v496_v38  ;;  %v4718_v38 = vsub.f32 %v296_v14, %v4687_v29  ;;  %6322 = vst [vmem:[#allocation32_spill] sm:$0xff] %v4728_v40  ;;  %v3708_v14 = vpack.c.bf16 %v970_v45, %v963_v3  ;;  %v989_v29 = vand.u32 4294901760, %v4577_v0 }
  0x3d   : > { %v983_v2 = vsub.f32 %v4568_v50, %v6315_v18  ;;  %v302_v18 = vsel %vm279_vm0, %v211_v34, 0  ;;  %v210_v34 = vld [vmem:[%s4409_s12 + $0x70] sm:$0xff]  ;;  %v6327_v3 = vand.u32 4294901760, %v4571_v47  ;;  %v996_v45 = vand.u32 4294901760, %v4582_v6 }
  0x3e   : > { %436 = vmatpush1.msra.mxu1 %v4631_v22  ;;  %1775 = vmatpush1.msra.mxu0 %v4631_v22  ;;  %6320 = vst [vmem:[#allocation31_spill] sm:$0xff] %v4718_v38 }
  0x3f   : > { %474 = vmatmul.mubr.f32.vlgmr.msra.gmra.mrb[0].mxu1 %v473_v63  ;;  %3704 = vmatprep.subr.bf16.mxu1 %v6316_v30  ;;  %v3789_v63 = vpack.c.bf16 %v968_v27, %v961_v23  ;;  %v213_v23 = vld [vmem:[%s4409_s12 + $0x88] sm:$0xff]  ;;  %v6324_v27 = vand.u32 4294901760, %v4550_v7  ;;  %v4744_v7 = vand.u32 4294901760, %v302_v18 }
  0x40   : > { %1809 = vmatmul.mubr.f32.vlgmr.msra.gmra.mrb[0].mxu0 %v6319_v12  ;;  %3785 = vmatprep.subr.bf16.mxu0 %v6316_v30  ;;  %v526_v12 = vsub.f32 %v4680_v49, %v6325_v21  ;;  %v305_v52 = vsel %vm279_vm0, %v213_v23, 0  ;;  %v4762_v23 = vand.u32 4294901760, %v210_v34  ;;  %v518_v21 = vand.u32 4294901760, %v4724_v57 }
  0x41   : > { %3706 = vmatpush1.bf16.msra.mxu1 %v3705_v4  ;;  %3787 = vmatpush1.bf16.msra.mxu0 %v3786_v37  ;;  %v977_v4 = vand.u32 4294901760, %v976_v20  ;;  %v984_v37 = vand.u32 4294901760, %v983_v2  ;;  %v6328_v20 = vand.u32 4294901760, %v4600_v15  ;;  %v6333_v15 = vand.u32 4294901760, %v4568_v50 }
  0x42   : > { %483 = vmatprep.mubr.f32.mxu1 %v482_v13  ;;  %1816 = vmatprep.mubr.f32.mxu0 %v6324_v27  ;;  %v4742_v13 = vsub.f32 %v299_v17, %v4711_v59  ;;  %v6329_v17 = vand.u32 4294901760, %v4692_v8  ;;  %6331 = vst [vmem:[#allocation36_spill] sm:$0xff] %v4762_v23 }
  0x43   : > { %489 = vmatmul.mubr.f32.gmra.mrb[2].mxu1 %v488_v10  ;;  %3707 = vmatprep.subr.bf16.mxu1 %v6316_v30  ;;  %v990_v10 = vsub.f32 %v4577_v0, %v989_v29  ;;  %v3711_v2 = vpack.c.bf16 %v984_v37, %v977_v4  ;;  %v6336_v4 = vand.u32 4294901760, %v4606_v53 }
  0x44   : > { %6326 = vst [vmem:[#allocation34_spill] sm:$0xff] %v4742_v13  ;;  %1820 = vmatmul.mubr.f32.gmra.mrb[2].mxu0 %v6327_v3  ;;  %498 = vmatprep.mubr.f32.mxu1 %v497_v39  ;;  %v532_v27 = vsub.f32 %v4692_v8, %v6329_v17  ;;  %v4760_v39 = vsub.f32 %v208_v25, %v4730_v36  ;;  %v215_v3 = vld [vmem:[%s4409_s12 + $0x98] sm:$0xff] }
  0x45   : > { %1827 = vmatprep.mubr.f32.mxu0 %v6328_v20  ;;  %3788 = vmatprep.subr.bf16.mxu0 %v6316_v30  ;;  %v6332_v20 = vand.u32 4294901760, %v4563_v58  ;;  %v991_v59 = vand.u32 4294901760, %v990_v10  ;;  %v997_v17 = vsub.f32 %v4582_v6, %v996_v45  ;;  %v4774_v36 = vsub.f32 %v302_v18, %v4744_v7 }
  0x46   : > { %6330 = vst [vmem:[#allocation35_spill] sm:$0xff] %v4760_v39  ;;  %3709 = vmatpush1.bf16.msra.mxu1 %v3708_v14  ;;  %3790 = vmatpush1.bf16.msra.mxu0 %v3789_v63  ;;  %v4776_v63 = vand.u32 4294901760, %v305_v52  ;;  %v212_v14 = vld [vmem:[%s4409_s12 + $0x80] sm:$0xff]  ;;  %v308_v37 = vsel %vm279_vm0, %v215_v3, 0  ;;  %v6338_v18 = vand.u32 4294901760, %v4644_v24  ;;  %v214_v3 = vld [vmem:[%s4409_s12 + $0x90] sm:$0xff] }
  0x47   : > { %v3792_v47 = vpack.c.bf16 %v6333_v15, %v6332_v20  ;;  %504 = vmatmul.mubr.f32.gmra.mrb[4].mxu1 %v503_v19  ;;  %3710 = vmatprep.subr.bf16.mxu1 %v6316_v30  ;;  %6334 = vst [vmem:[#allocation37_spill] sm:$0xff] %v4774_v36  ;;  %v527_v15 = vand.u32 4294901760, %v526_v12  ;;  %v6337_v19 = vand.u32 4294901760, %v4718_v38  ;;  %v998_v10 = vand.u32 4294901760, %v997_v17  ;;  %v217_v17 = vld [vmem:[%s4409_s12 + $0xa8] sm:$0xff] }
  0x48   : > { %6335 = vst [vmem:[#allocation38_spill] sm:$0xff] %v4776_v63  ;;  %1831 = vmatmul.mubr.f32.gmra.mrb[4].mxu0 %v6336_v4  ;;  %513 = vmatprep.mubr.f32.mxu1 %v512_v16  ;;  %v533_v20 = vand.u32 4294901760, %v532_v27  ;;  %v4790_v4 = vsub.f32 %v210_v34, %v4762_v23  ;;  %v6340_v12 = vand.u32 4294901760, %v4728_v40  ;;  %v6342_v27 = vand.u32 4294901760, %v4742_v13  ;;  %v218_v23 = vld [vmem:[%s4409_s12 + $0xb0] sm:$0xff] }
  0x49   : > { %v541_v57 = vsub.f32 %v4718_v38, %v6337_v19  ;;  %1838 = vmatprep.mubr.f32.mxu0 %v6338_v18  ;;  %3791 = vmatprep.subr.bf16.mxu0 %v6316_v30  ;;  %v4795_v19 = vand.u32 4294901760, %v212_v14  ;;  %v3714_v24 = vpack.c.bf16 %v998_v10, %v991_v59  ;;  %v3795_v18 = vpack.c.bf16 %v996_v45, %v989_v29 }
  0x4a   : > { %6339 = vst [vmem:[#allocation39_spill] sm:$0xff] %v4790_v4  ;;  %v547_v16 = vsub.f32 %v4728_v40, %v6340_v12  ;;  %3712 = vmatpush1.bf16.msra.mxu1 %v3711_v2  ;;  %3793 = vmatpush1.bf16.msra.mxu0 %v3792_v47  ;;  %v556_v25 = vsub.f32 %v4742_v13, %v6342_v27  ;;  %v4806_v12 = vand.u32 4294901760, %v308_v37  ;;  %v6345_v47 = vand.u32 4294901760, %v4660_v46  ;;  %v216_v46 = vld [vmem:[%s4409_s12 + $0xa0] sm:$0xff] }
  0x4b   : > { %6341 = vst [vmem:[#allocation40_spill] sm:$0xff] %v4795_v19  ;;  %519 = vmatmul.mubr.f32.gmra.mrb[6].mxu1 %v518_v21  ;;  %v4804_v53 = vsub.f32 %v305_v52, %v4776_v63  ;;  %3713 = vmatprep.subr.bf16.mxu1 %v6316_v30  ;;  %v542_v29 = vand.u32 4294901760, %v541_v57  ;;  %v1003_v59 = vand.u32 4294901760, %v4612_v5  ;;  %v1010_v2 = vand.u32 4294901760, %v4617_v61 }
  0x4c   : > { %6344 = vst [vmem:[#allocation42_spill] sm:$0xff] %v4806_v12  ;;  %1842 = vmatmul.mubr.f32.gmra.mrb[6].mxu0 %v6345_v47  ;;  %528 = vmatprep.mubr.f32.mxu1 %v527_v15  ;;  %v6346_v45 = vand.u32 4294901760, %v4680_v49  ;;  %v6347_v52 = vand.u32 4294901760, %v4760_v39  ;;  %v4819_v27 = vand.u32 4294901760, %v214_v3  ;;  %v311_v34 = vsel %vm279_vm0, %v217_v17, 0  ;;  %v219_v15 = vld [vmem:[%s4409_s12 + $0xb8] sm:$0xff] }
  0x4d   : > { %6343 = vst [vmem:[#allocation41_spill] sm:$0xff] %v4804_v53  ;;  %3794 = vmatprep.subr.bf16.mxu0 %v6316_v30  ;;  %v548_v57 = vand.u32 4294901760, %v547_v16  ;;  %v4825_v47 = vsub.f32 %v212_v14, %v4795_v19  ;;  %v557_v10 = vand.u32 4294901760, %v556_v25  ;;  %v6350_v49 = vand.u32 4294901760, %v4774_v36 }
  0x4e   : > { %1849 = vmatprep.mubr.f32.mxu0 %v6346_v45  ;;  %v562_v21 = vsub.f32 %v4760_v39, %v6347_v52  ;;  %6348 = vst [vmem:[#allocation43_spill] sm:$0xff] %v4819_v27  ;;  %3715 = vmatpush1.bf16.msra.mxu1 %v3714_v24  ;;  %v1004_v45 = vsub.f32 %v4612_v5, %v1003_v59  ;;  %v6352_v24 = vand.u32 4294901760, %v4692_v8  ;;  %v4840_v14 = vand.u32 4294901760, %v311_v34 }
  0x4f   : > { %6349 = vst [vmem:[#allocation44_spill] sm:$0xff] %v4825_v47  ;;  %3796 = vmatpush1.bf16.msra.mxu0 %v3795_v18  ;;  %v1011_v52 = vsub.f32 %v4617_v61, %v1010_v2  ;;  %534 = vmatmul.mubr.f32.gmra.mrb[8].mxu1 %v533_v20  ;;  %v571_v17 = vsub.f32 %v4774_v36, %v6350_v49  ;;  %v314_v25 = vsel %vm279_vm0, %v219_v15, 0  ;;  %v6354_v19 = vand.u32 4294901760, %v4438_v32  ;;  %v221_v15 = vld [vmem:[%s4409_s12 + $0xc8] sm:$0xff] }
  0x50   : > { %v4835_v16 = vsub.f32 %v308_v37, %v4806_v12  ;;  %3716 = vmatprep.subr.bf16.mxu1 %v6316_v30  ;;  %1853 = vmatmul.mubr.f32.gmra.mrb[8].mxu0 %v6352_v24  ;;  %6353 = vst [vmem:[#allocation46_spill] sm:$0xff] %v4840_v14  ;;  %v1005_v20 = vand.u32 4294901760, %v1004_v45  ;;  %v6355_v37 = vand.u32 4294901760, %v4718_v38  ;;  %v6356_v63 = vand.u32 4294901760, %v4790_v4 }
  0x51   : > { %543 = vmatprep.mubr.f32.mxu1 %v542_v29  ;;  %v1012_v18 = vand.u32 4294901760, %v1011_v52  ;;  %v4846_v49 = vsub.f32 %v4438_v32, %v6354_v19  ;;  %v4854_v29 = vsub.f32 %v214_v3, %v4819_v27  ;;  %v4856_v8 = vand.u32 4294901760, %v216_v46  ;;  %3797 = vmatprep.subr.bf16.mxu0 %v6316_v30 }
  0x52   : > { %6351 = vst [vmem:[#allocation45_spill] sm:$0xff] %v4835_v16  ;;  %1860 = vmatprep.mubr.f32.mxu0 %v6355_v37  ;;  %v577_v24 = vsub.f32 %v4790_v4, %v6356_v63  ;;  %v6359_v45 = vand.u32 4294901760, %v4443_v33  ;;  %v6150_v19 = vand.u32 4294901760, %v4825_v47  ;;  %v3798_v37 = vpack.c.bf16 %v1010_v2, %v1003_v59 }
  0x53   : > { %6357 = vst [vmem:[#allocation47_spill] sm:$0xff] %v4854_v29  ;;  %6358 = vst [vmem:[#allocation48_spill] sm:$0xff] %v4856_v8  ;;  %v3717_v52 = vpack.c.bf16 %v1012_v18, %v1005_v20  ;;  %549 = vmatmul.mubr.f32.gmra.mrb[10].mxu1 %v548_v57  ;;  %v563_v63 = vand.u32 4294901760, %v562_v21  ;;  %v6360_v3 = vand.u32 4294901760, %v4804_v53  ;;  %v6151_v27 = vand.u32 4294901760, %v4835_v16 }
  0x54   : > { %v4863_v32 = vsub.f32 %v4443_v33, %v6359_v45  ;;  %v4870_v12 = vand.u32 4294901760, %v314_v25  ;;  %v6362_v33 = vand.u32 4294901760, %v4728_v40  ;;  %558 = vmatprep.mubr.f32.mxu1 %v557_v10  ;;  %v572_v45 = vand.u32 4294901760, %v571_v17  ;;  %3799 = vmatpush1.bf16.msra.mxu0 %v3798_v37 }
  0x55   : > { %v586_v38 = vsub.f32 %v4804_v53, %v6360_v3  ;;  %v4876_v59 = vsub.f32 %v311_v34, %v4840_v14  ;;  %v317_v2 = vsel %vm279_vm0, %v221_v15, 0  ;;  %v6364_v21 = vand.u32 4294901760, %v4742_v13  ;;  %v223_v3 = vld [vmem:[%s4409_s12 + $0xd8] sm:$0xff]  ;;  %3718 = vmatpush1.bf16.msra.mxu1 %v3717_v52  ;;  %v220_v34 = vld [vmem:[%s4409_s12 + $0xc0] sm:$0xff]  ;;  %3800 = vmatprep.subr.bf16.mxu0 %v6316_v30 }
  0x56   : > { %6361 = vst [vmem:[#allocation49_spill] sm:$0xff] %v4870_v12  ;;  %1864 = vmatmul.mubr.f32.gmra.mrb[10].mxu0 %v6362_v33  ;;  %v578_v57 = vand.u32 4294901760, %v577_v24  ;;  %v4883_v18 = vsub.f32 %v216_v46, %v4856_v8  ;;  %v592_v10 = vsub.f32 %v4825_v47, %v6150_v19  ;;  %v4889_v17 = vand.u32 4294901760, %v218_v23  ;;  %3719 = vmatprep.subr.bf16.mxu1 %v6316_v30 }
  0x57   : > { %6363 = vst [vmem:[#allocation50_spill] sm:$0xff] %v4876_v59  ;;  %1871 = vmatprep.mubr.f32.mxu0 %v6364_v21  ;;  %v1017_v15 = vand.u32 4294901760, %v4846_v49  ;;  %v1024_v24 = vand.u32 4294901760, %v4863_v32  ;;  %564 = vmatmul.mubr.f32.gmra.mrb[12].mxu1 %v563_v63  ;;  %v587_v33 = vand.u32 4294901760, %v586_v38  ;;  %v601_v46 = vsub.f32 %v4835_v16, %v6151_v27 }
  0x58   : > { %6365 = vst [vmem:[#allocation51_spill] sm:$0xff] %v4883_v18  ;;  %6366 = vst [vmem:[#allocation52_spill] sm:$0xff] %v4889_v17  ;;  %v4899_v52 = vsub.f32 %v314_v25, %v4870_v12  ;;  %v4901_v21 = vand.u32 4294901760, %v317_v2  ;;  %v6369_v37 = vand.u32 4294901760, %v4760_v39  ;;  %573 = vmatprep.mubr.f32.mxu1 %v572_v45  ;;  %v320_v38 = vsel %vm279_vm0, %v223_v3, 0 }
  0x59   : > { %v1018_v19 = vsub.f32 %v4846_v49, %v1017_v15  ;;  %v1025_v27 = vsub.f32 %v4863_v32, %v1024_v24  ;;  %v6370_v25 = vand.u32 4294901760, %v4469_v42  ;;  %v6371_v13 = vand.u32 4294901760, %v4474_v43 }
  0x5a   : > { %6367 = vst [vmem:[#allocation53_spill] sm:$0xff] %v4899_v52  ;;  %6368 = vst [vmem:[#allocation54_spill] sm:$0xff] %v4901_v21  ;;  %1875 = vmatmul.mubr.f32.gmra.mrb[12].mxu0 %v6369_v37  ;;  %v6372_v45 = vand.u32 4294901760, %v4774_v36  ;;  %v4923_v3 = vand.u32 4294901760, %v220_v34  ;;  %v6374_v63 = vand.u32 4294901760, %v4854_v29  ;;  %v4929_v12 = vsub.f32 %v218_v23, %v4889_v17 }
  0x5b   : > { %v4913_v20 = vsub.f32 %v4469_v42, %v6370_v25  ;;  %v4918_v40 = vsub.f32 %v4474_v43, %v6371_v13  ;;  %v222_v42 = vld [vmem:[%s4409_s12 + $0xd0] sm:$0xff]  ;;  %v225_v25 = vld [vmem:[%s4409_s12 + $0xe8] sm:$0xff]  ;;  %v1019_v8 = vand.u32 4294901760, %v1018_v19  ;;  %v1026_v14 = vand.u32 4294901760, %v1025_v27  ;;  %579 = vmatmul.mubr.f32.gmra.mrb[14].mxu1 %v578_v57 }
  0x5c   : > { %1882 = vmatprep.mubr.f32.mxu0 %v6372_v45  ;;  %6373 = vst [vmem:[#allocation55_spill] sm:$0xff] %v4923_v3  ;;  %v607_v39 = vsub.f32 %v4854_v29, %v6374_v63  ;;  %6375 = vst [vmem:[#allocation56_spill] sm:$0xff] %v4929_v12  ;;  %v593_v43 = vand.u32 4294901760, %v592_v10  ;;  %v4935_v45 = vsub.f32 %v317_v2, %v4901_v21  ;;  %v4937_v37 = vand.u32 4294901760, %v320_v38 }
  0x5d   : > { %v6378_v36 = vand.u32 4294901760, %v4790_v4  ;;  %588 = vmatprep.mubr.f32.mxu1 %v587_v33  ;;  %v602_v23 = vand.u32 4294901760, %v601_v46  ;;  %v6379_v63 = vand.u32 4294901760, %v4876_v59  ;;  %v3720_v27 = vpack.c.bf16 %v1026_v14, %v1019_v8  ;;  %v227_v8 = vld [vmem:[%s4409_s12 + $0xf8] sm:$0xff] }
  0x5e   : > { %6376 = vst [vmem:[#allocation57_spill] sm:$0xff] %v4935_v45  ;;  %6377 = vst [vmem:[#allocation58_spill] sm:$0xff] %v4937_v37  ;;  %v3801_v57 = vpack.c.bf16 %v1024_v24, %v1017_v15  ;;  %v6380_v10 = vand.u32 4294901760, %v4804_v53  ;;  %v6381_v2 = vand.u32 4294901760, %v4883_v18  ;;  %v4950_v21 = vsub.f32 %v220_v34, %v4923_v3 }
  0x5f   : > { %1886 = vmatmul.mubr.f32.gmra.mrb[14].mxu0 %v6378_v36  ;;  %v616_v19 = vsub.f32 %v4876_v59, %v6379_v63  ;;  %v4952_v36 = vand.u32 4294901760, %v222_v42  ;;  %v323_v33 = vsel %vm279_vm0, %v225_v25, 0  ;;  %3721 = vmatpush1.bf16.msra.mxu1 %v3720_v27  ;;  %v608_v14 = vand.u32 4294901760, %v607_v39  ;;  %v229_v39 = vld [vmem:[%s4409_s12 + $0x108] sm:$0xff] }
  0x60   : > { %1893 = vmatprep.mubr.f32.mxu0 %v6380_v10  ;;  %v622_v13 = vsub.f32 %v4883_v18, %v6381_v2  ;;  %6382 = vst [vmem:[#allocation59_spill] sm:$0xff] %v4950_v21  ;;  %3802 = vmatpush1.bf16.msra.mxu0 %v3801_v57  ;;  %v6384_v15 = vand.u32 4294901760, %v4899_v52  ;;  %v4962_v34 = vsub.f32 %v320_v38, %v4937_v37  ;;  %v224_v10 = vld [vmem:[%s4409_s12 + $0xe0] sm:$0xff]  ;;  %v6386_v25 = vand.u32 4294901760, %v4825_v47 }
  0x61   : > { %6383 = vst [vmem:[#allocation60_spill] sm:$0xff] %v4952_v36  ;;  %594 = vmatmul.mubr.f32.gmra.mrb[16].mxu1 %v593_v43  ;;  %3722 = vmatprep.subr.bf16.mxu1 %v6316_v30  ;;  %v617_v27 = vand.u32 4294901760, %v616_v19  ;;  %v4968_v57 = vand.u32 4294901760, %v323_v33  ;;  %v1031_v43 = vand.u32 4294901760, %v4913_v20  ;;  %v1038_v2 = vand.u32 4294901760, %v4918_v40 }
  0x62   : > { %v631_v24 = vsub.f32 %v4899_v52, %v6384_v15  ;;  %6385 = vst [vmem:[#allocation61_spill] sm:$0xff] %v4962_v34  ;;  %603 = vmatprep.mubr.f32.mxu1 %v602_v23  ;;  %v6388_v15 = vand.u32 4294901760, %v4835_v16  ;;  %v623_v38 = vand.u32 4294901760, %v622_v13  ;;  %v4977_v46 = vsub.f32 %v222_v42, %v4952_v36  ;;  %3803 = vmatprep.subr.bf16.mxu0 %v6316_v30  ;;  %v226_v16 = vld [vmem:[%s4409_s12 + $0xf0] sm:$0xff] }
  0x63   : > { %1897 = vmatmul.mubr.f32.gmra.mrb[16].mxu0 %v6386_v25  ;;  %6387 = vst [vmem:[#allocation62_spill] sm:$0xff] %v4968_v57  ;;  %v326_v23 = vsel %vm279_vm0, %v227_v8, 0  ;;  %v6390_v19 = vand.u32 4294901760, %v4929_v12  ;;  %v4984_v47 = vand.u32 4294901760, %v224_v10  ;;  %v1032_v53 = vsub.f32 %v4913_v20, %v1031_v43 }
  0x64   : > { %1904 = vmatprep.mubr.f32.mxu0 %v6388_v15  ;;  %6389 = vst [vmem:[#allocation63_spill] sm:$0xff] %v4977_v46  ;;  %v1039_v15 = vsub.f32 %v4918_v40, %v1038_v2  ;;  %v632_v13 = vand.u32 4294901760, %v631_v24  ;;  %v6392_v63 = vand.u32 4294901760, %v4935_v45  ;;  %v329_v4 = vsel %vm279_vm0, %v229_v39, 0 }
  0x65   : > { %v637_v25 = vsub.f32 %v4929_v12, %v6390_v19  ;;  %6391 = vst [vmem:[#allocation64_spill] sm:$0xff] %v4984_v47  ;;  %609 = vmatmul.mubr.f32.gmra.mrb[18].mxu1 %v608_v14  ;;  %v6393_v19 = vand.u32 4294901760, %v4854_v29  ;;  %v4997_v36 = vsub.f32 %v323_v33, %v4968_v57  ;;  %v4999_v14 = vand.u32 4294901760, %v326_v23  ;;  %v228_v29 = vld [vmem:[%s4409_s12 + $0x100] sm:$0xff] }
  0x66   : > { %v646_v42 = vsub.f32 %v4935_v45, %v6392_v63  ;;  %618 = vmatprep.mubr.f32.mxu1 %v617_v27  ;;  %v1033_v24 = vand.u32 4294901760, %v1032_v53  ;;  %v1040_v37 = vand.u32 4294901760, %v1039_v15  ;;  %v6395_v3 = vand.u32 4294901760, %v4500_v54  ;;  %v231_v53 = vld [vmem:[%s4409_s12 + $0x118] sm:$0xff] }
  0x67   : > { %1908 = vmatmul.mubr.f32.gmra.mrb[18].mxu0 %v6393_v19  ;;  %6394 = vst [vmem:[#allocation65_spill] sm:$0xff] %v4997_v36  ;;  %v6396_v8 = vand.u32 4294901760, %v4876_v59  ;;  %v6397_v39 = vand.u32 4294901760, %v4950_v21  ;;  %v5012_v27 = vsub.f32 %v224_v10, %v4984_v47  ;;  %v5014_v33 = vand.u32 4294901760, %v226_v16 }
  0x68   : > { %v5004_v63 = vsub.f32 %v4500_v54, %v6395_v3  ;;  %v3723_v15 = vpack.c.bf16 %v1040_v37, %v1033_v24  ;;  %v3804_v57 = vpack.c.bf16 %v1038_v2, %v1031_v43  ;;  %v638_v54 = vand.u32 4294901760, %v637_v25  ;;  %v233_v25 = vld [vmem:[%s4409_s12 + $0x128] sm:$0xff] }
  0x69   : > { %1915 = vmatprep.mubr.f32.mxu0 %v6396_v8  ;;  %v652_v19 = vsub.f32 %v4950_v21, %v6397_v39  ;;  %6398 = vst [vmem:[#allocation66_spill] sm:$0xff] %v5012_v27  ;;  %6399 = vst [vmem:[#allocation67_spill] sm:$0xff] %v5014_v33  ;;  %624 = vmatmul.mubr.f32.gmra.mrb[20].mxu1 %v623_v38  ;;  %v6400_v3 = vand.u32 4294901760, %v4962_v34  ;;  %v6182_v59 = vand.u32 4294901760, %v4977_v46  ;;  %v5022_v17 = vand.u32 4294901760, %v329_v4 }
  0x6a   : > { %v6402_v10 = vand.u32 4294901760, %v4883_v18  ;;  %633 = vmatprep.mubr.f32.mxu1 %v632_v13  ;;  %v647_v39 = vand.u32 4294901760, %v646_v42  ;;  %v6183_v47 = vand.u32 4294901760, %v4997_v36  ;;  %v5028_v37 = vsub.f32 %v326_v23, %v4999_v14  ;;  %3724 = vmatpush1.bf16.msra.mxu1 %v3723_v15  ;;  %v230_v15 = vld [vmem:[%s4409_s12 + $0x110] sm:$0xff] }
  0x6b   : > { %v661_v8 = vsub.f32 %v4962_v34, %v6400_v3  ;;  %6401 = vst [vmem:[#allocation68_spill] sm:$0xff] %v5022_v17  ;;  %v6404_v43 = vand.u32 4294901760, %v4899_v52  ;;  %v5032_v2 = vand.u32 4294901760, %v228_v29  ;;  %v332_v38 = vsel %vm279_vm0, %v231_v53, 0  ;;  %3805 = vmatpush1.bf16.msra.mxu0 %v3804_v57  ;;  %3725 = vmatprep.subr.bf16.mxu1 %v6316_v30 }
  0x6c   : > { %1919 = vmatmul.mubr.f32.gmra.mrb[20].mxu0 %v6402_v10  ;;  %6403 = vst [vmem:[#allocation69_spill] sm:$0xff] %v5028_v37  ;;  %v653_v24 = vand.u32 4294901760, %v652_v19  ;;  %v5038_v13 = vsub.f32 %v226_v16, %v5014_v33  ;;  %v667_v42 = vsub.f32 %v4977_v46, %v6182_v59  ;;  %v5045_v53 = vsub.f32 %v329_v4, %v5022_v17  ;;  %v235_v10 = vld [vmem:[%s4409_s12 + $0x138] sm:$0xff] }
  0x6d   : > { %1926 = vmatprep.mubr.f32.mxu0 %v6404_v43  ;;  %6405 = vst [vmem:[#allocation70_spill] sm:$0xff] %v5032_v2  ;;  %639 = vmatmul.mubr.f32.gmra.mrb[22].mxu1 %v638_v54  ;;  %v662_v23 = vand.u32 4294901760, %v661_v8  ;;  %v1045_v16 = vand.u32 4294901760, %v5004_v63  ;;  %v6408_v19 = vand.u32 4294901760, %v4929_v12  ;;  %v676_v57 = vsub.f32 %v4997_v36, %v6183_v47 }
  0x6e   : > { %6406 = vst [vmem:[#allocation71_spill] sm:$0xff] %v5038_v13  ;;  %6407 = vst [vmem:[#allocation72_spill] sm:$0xff] %v5045_v53  ;;  %3806 = vmatprep.subr.bf16.mxu0 %v6316_v30  ;;  %648 = vmatprep.mubr.f32.mxu1 %v647_v39  ;;  %v5056_v8 = vand.u32 4294901760, %v332_v38  ;;  %v335_v4 = vsel %vm279_vm0, %v233_v25, 0  ;;  %v6410_v43 = vand.u32 4294901760, %v4505_v55  ;;  %v6411_v3 = vand.u32 4294901760, %v4935_v45 }
  0x6f   : > { %v5068_v39 = vsub.f32 %v228_v29, %v5032_v2  ;;  %v5074_v12 = vand.u32 4294901760, %v230_v15  ;;  %v232_v25 = vld [vmem:[%s4409_s12 + $0x120] sm:$0xff]  ;;  %v668_v52 = vand.u32 4294901760, %v667_v42  ;;  %v5077_v18 = vand.u32 4294901760, %v335_v4 }
  0x70   : > { %1930 = vmatmul.mubr.f32.gmra.mrb[22].mxu0 %v6408_v19  ;;  %6409 = vst [vmem:[#allocation73_spill] sm:$0xff] %v5056_v8  ;;  %v5063_v59 = vsub.f32 %v4505_v55, %v6410_v43  ;;  %v6413_v19 = vand.u32 4294901760, %v5012_v27  ;;  %v338_v55 = vsel %vm279_vm0, %v235_v10, 0  ;;  %v6416_v29 = vand.u32 4294901760, %v4950_v21 }
  0x71   : > { %1937 = vmatprep.mubr.f32.mxu0 %v6411_v3  ;;  %6412 = vst [vmem:[#allocation74_spill] sm:$0xff] %v5068_v39  ;;  %6414 = vst [vmem:[#allocation75_spill] sm:$0xff] %v5074_v12  ;;  %654 = vmatmul.mubr.f32.gmra.mrb[24].mxu1 %v653_v24  ;;  %v1046_v3 = vsub.f32 %v5004_v63, %v1045_v16  ;;  %v677_v43 = vand.u32 4294901760, %v676_v57  ;;  %v5088_v42 = vsub.f32 %v332_v38, %v5056_v8  ;;  %v234_v38 = vld [vmem:[%s4409_s12 + $0x130] sm:$0xff] }
  0x72   : > { %v682_v47 = vsub.f32 %v5012_v27, %v6413_v19  ;;  %6415 = vst [vmem:[#allocation76_spill] sm:$0xff] %v5077_v18  ;;  %663 = vmatprep.mubr.f32.mxu1 %v662_v23  ;;  %v6417_v19 = vand.u32 4294901760, %v5028_v37  ;;  %v6419_v10 = vand.u32 4294901760, %v4962_v34  ;;  %v5093_v2 = vand.u32 4294901760, %v232_v25  ;;  %v237_v34 = vld [vmem:[%s4409_s12 + $0x148] sm:$0xff] }
  0x73   : > { %6418 = vst [vmem:[#allocation77_spill] sm:$0xff] %v5088_v42  ;;  %v6421_v57 = vand.u32 4294901760, %v5038_v13  ;;  %v5102_v24 = vand.u32 4294901760, %v338_v55  ;;  %v1047_v45 = vand.u32 4294901760, %v1046_v3  ;;  %v6425_v17 = vand.u32 4294901760, %v4977_v46 }
  0x74   : > { %1941 = vmatmul.mubr.f32.gmra.mrb[24].mxu0 %v6416_v29  ;;  %v691_v54 = vsub.f32 %v5028_v37, %v6417_v19  ;;  %6420 = vst [vmem:[#allocation78_spill] sm:$0xff] %v5093_v2  ;;  %v1052_v29 = vand.u32 4294901760, %v5063_v59  ;;  %v683_v23 = vand.u32 4294901760, %v682_v47  ;;  %v5100_v19 = vsub.f32 %v230_v15, %v5074_v12 }
  0x75   : > { %1948 = vmatprep.mubr.f32.mxu0 %v6419_v10  ;;  %v697_v21 = vsub.f32 %v5038_v13, %v6421_v57  ;;  %6423 = vst [vmem:[#allocation80_spill] sm:$0xff] %v5102_v24  ;;  %669 = vmatmul.mubr.f32.gmra.mrb[26].mxu1 %v668_v52  ;;  %v5107_v10 = vsub.f32 %v335_v4, %v5077_v18  ;;  %v6426_v15 = vand.u32 4294901760, %v5045_v53  ;;  %v6427_v52 = vand.u32 4294901760, %v4997_v36 }
  0x76   : > { %6422 = vst [vmem:[#allocation79_spill] sm:$0xff] %v5100_v19  ;;  %v1053_v8 = vsub.f32 %v5063_v59, %v1052_v29  ;;  %v3807_v47 = vpack.c.bf16 %v1052_v29, %v1045_v16  ;;  %678 = vmatprep.mubr.f32.mxu1 %v677_v43  ;;  %v692_v57 = vand.u32 4294901760, %v691_v54  ;;  %v5119_v4 = vsub.f32 %v232_v25, %v5093_v2 }
  0x77   : > { %6424 = vst [vmem:[#allocation81_spill] sm:$0xff] %v5107_v10  ;;  %v706_v12 = vsub.f32 %v5045_v53, %v6426_v15  ;;  %v5121_v3 = vand.u32 4294901760, %v234_v38  ;;  %v341_v16 = vsel %vm279_vm0, %v237_v34, 0  ;;  %v6430_v54 = vand.u32 4294901760, %v5068_v39  ;;  %v236_v34 = vld [vmem:[%s4409_s12 + $0x140] sm:$0xff] }
  0x78   : > { %1952 = vmatmul.mubr.f32.gmra.mrb[26].mxu0 %v6425_v17  ;;  %6428 = vst [vmem:[#allocation82_spill] sm:$0xff] %v5119_v4  ;;  %v239_v17 = vld [vmem:[%s4409_s12 + $0x158] sm:$0xff]  ;;  %v1054_v43 = vand.u32 4294901760, %v1053_v8  ;;  %v5132_v33 = vsub.f32 %v338_v55, %v5102_v24  ;;  %v6432_v8 = vand.u32 4294901760, %v5012_v27  ;;  %v5140_v46 = vand.u32 4294901760, %v341_v16 }
  0x79   : > { %1959 = vmatprep.mubr.f32.mxu0 %v6427_v52  ;;  %6429 = vst [vmem:[#allocation83_spill] sm:$0xff] %v5121_v3  ;;  %3808 = vmatpush1.bf16.msra.mxu0 %v3807_v47  ;;  %v712_v29 = vsub.f32 %v5068_v39, %v6430_v54  ;;  %v698_v52 = vand.u32 4294901760, %v697_v21  ;;  %v707_v47 = vand.u32 4294901760, %v706_v12  ;;  %v6433_v54 = vand.u32 4294901760, %v5088_v42 }
  0x7a   : > { %3809 = vmatprep.subr.bf16.mxu0 %v6316_v30  ;;  %684 = vmatmul.mubr.f32.gmra.mrb[28].mxu1 %v683_v23  ;;  %6431 = vst [vmem:[#allocation84_spill] sm:$0xff] %v5132_v33  ;;  %v3726_v36 = vpack.c.bf16 %v1054_v43, %v1047_v45  ;;  %6434 = vst [vmem:[#allocation85_spill] sm:$0xff] %v5140_v46  ;;  %v344_v21 = vsel %vm279_vm0, %v239_v17, 0  ;;  %v6435_v23 = vand.u32 4294901760, %v5028_v37  ;;  %v241_v43 = vld [vmem:[%s4409_s12 + $0x168] sm:$0xff]  ;;  %v1059_v12 = vand.u32 4294901760, %v4417_v28 }
  0x7b   : > { %693 = vmatprep.mubr.f32.mxu1 %v692_v57  ;;  %v721_v15 = vsub.f32 %v5088_v42, %v6433_v54  ;;  %v5147_v45 = vsub.f32 %v234_v38, %v5121_v3  ;;  %v713_v57 = vand.u32 4294901760, %v712_v29  ;;  %v5154_v25 = vand.u32 4294901760, %v236_v34  ;;  %v238_v17 = vld [vmem:[%s4409_s12 + $0x150] sm:$0xff]  ;;  %v243_v3 = vld [vmem:[%s4409_s12 + $0x178] sm:$0xff] }
  0x7c   : > { %1963 = vmatmul.mubr.f32.gmra.mrb[28].mxu0 %v6432_v8  ;;  %3727 = vmatpush1.bf16.msra.mxu1 %v3726_v36  ;;  %v6437_v8 = vand.u32 4294901760, %v5100_v19  ;;  %v5162_v55 = vand.u32 4294901760, %v344_v21  ;;  %v1060_v29 = vsub.f32 %v4417_v28, %v1059_v12  ;;  %v6440_v37 = vand.u32 4294901760, %v5038_v13 }
  0x7d   : > { %1970 = vmatprep.mubr.f32.mxu0 %v6435_v23  ;;  %6436 = vst [vmem:[#allocation86_spill] sm:$0xff] %v5147_v45  ;;  %6438 = vst [vmem:[#allocation87_spill] sm:$0xff] %v5154_v25  ;;  %3728 = vmatprep.subr.bf16.mxu1 %v6316_v30  ;;  %v6439_v23 = vand.u32 4294901760, %v5107_v10  ;;  %v5168_v27 = vsub.f32 %v341_v16, %v5140_v46  ;;  %v5175_v36 = vsub.f32 %v4593_v9, %v4631_v22 }
  0x7e   : > { %v727_v54 = vsub.f32 %v5100_v19, %v6437_v8  ;;  %699 = vmatmul.mubr.f32.gmra.mrb[30].mxu1 %v698_v52  ;;  %v722_v8 = vand.u32 4294901760, %v721_v15  ;;  %v347_v52 = vsel %vm279_vm0, %v241_v43, 0  ;;  %v6442_v24 = vand.u32 4294901760, %v5045_v53  ;;  %v240_v43 = vld [vmem:[%s4409_s12 + $0x160] sm:$0xff] }
  0x7f   : > { %v736_v38 = vsub.f32 %v5107_v10, %v6439_v23  ;;  %708 = vmatprep.mubr.f32.mxu1 %v707_v47  ;;  %6441 = vst [vmem:[#allocation88_spill] sm:$0xff] %v5168_v27  ;;  %v1066_v23 = vand.u32 4294901760, %v4431_v31  ;;  %v6443_v13 = vand.u32 4294901760, %v5119_v4  ;;  %v5183_v16 = vand.u32 4294901760, %v238_v17 }
  0x80   : > { %1974 = vmatmul.mubr.f32.gmra.mrb[30].mxu0 %v6440_v37  ;;  %v5186_v47 = vsub.f32 %v236_v34, %v5154_v25  ;;  %v1061_v46 = vand.u32 4294901760, %v1060_v29  ;;  %v728_v53 = vand.u32 4294901760, %v727_v54  ;;  %v5193_v18 = vand.u32 4294901760, %v347_v52 }
  0x81   : > { %1981 = vmatprep.mubr.f32.mxu0 %v6442_v24  ;;  %v742_v37 = vsub.f32 %v5119_v4, %v6443_v13  ;;  %6444 = vst [vmem:[#allocation89_spill] sm:$0xff] %v5183_v16  ;;  %v1067_v2 = vsub.f32 %v4431_v31, %v1066_v23  ;;  %v3810_v9 = vpack.c.bf16 %v1066_v23, %v1059_v12  ;;  %v350_v13 = vsel %vm279_vm0, %v243_v3, 0 }
  0x82   : > { %6445 = vst [vmem:[#allocation90_spill] sm:$0xff] %v5186_v47  ;;  %714 = vmatmul.mubr.f32.gmra.mrb[32].mxu1 %v713_v57  ;;  %v5191_v24 = vsub.f32 %v344_v21, %v5162_v55  ;;  %v6447_v15 = vand.u32 4294901760, %v5068_v39  ;;  %v737_v34 = vand.u32 4294901760, %v736_v38  ;;  %v6448_v29 = vand.u32 4294901760, %v5132_v33  ;;  %v245_v38 = vld [vmem:[%s4409_s12 + $0x188] sm:$0xff] }
  0x83   : > { %723 = vmatprep.mubr.f32.mxu1 %v722_v8  ;;  %v1068_v57 = vand.u32 4294901760, %v1067_v2  ;;  %v6449_v54 = vand.u32 4294901760, %v5088_v42  ;;  %v6450_v21 = vand.u32 4294901760, %v5147_v45  ;;  %v5208_v3 = vsub.f32 %v238_v17, %v5183_v16  ;;  %3811 = vmatpush1.bf16.msra.mxu0 %v3810_v9 }
  0x84   : > { %6446 = vst [vmem:[#allocation91_spill] sm:$0xff] %v5191_v24  ;;  %1985 = vmatmul.mubr.f32.gmra.mrb[32].mxu0 %v6447_v15  ;;  %v751_v25 = vsub.f32 %v5132_v33, %v6448_v29  ;;  %v5210_v15 = vand.u32 4294901760, %v240_v43  ;;  %v5214_v29 = vand.u32 4294901760, %v350_v13  ;;  %v6454_v12 = vmov 0.0  }
  0x85   : > { %1992 = vmatprep.mubr.f32.mxu0 %v6449_v54  ;;  %v757_v23 = vsub.f32 %v5147_v45, %v6450_v21  ;;  %6451 = vst [vmem:[#allocation92_spill] sm:$0xff] %v5208_v3  ;;  %v3729_v2 = vpack.c.bf16 %v1068_v57, %v1061_v46  ;;  %2245 = vmatprep.subr.mxu0 %v6454_v12  ;;  %v1073_v54 = vand.u32 4294901760, %v5175_v36  ;;  %v743_v42 = vand.u32 4294901760, %v742_v37  ;;  %v242_v57 = vld [vmem:[%s4409_s12 + $0x170] sm:$0xff] }
  0x86   : > { %6452 = vst [vmem:[#allocation93_spill] sm:$0xff] %v5210_v15  ;;  %6453 = vst [vmem:[#allocation94_spill] sm:$0xff] %v5214_v29  ;;  %729 = vmatmul.mubr.f32.gmra.mrb[34].mxu1 %v728_v53  ;;  %v5220_v17 = vsub.f32 %v347_v52, %v5193_v18  ;;  %v6456_v39 = vand.u32 4294901760, %v5100_v19  ;;  %v752_v9 = vand.u32 4294901760, %v751_v25  ;;  %v6457_v8 = vand.u32 4294901760, %v5168_v27 }
  0x87   : > { %738 = vmatprep.mubr.f32.mxu1 %v737_v34  ;;  %v353_v16 = vsel %vm279_vm0, %v245_v38, 0  ;;  %v1074_v53 = vsub.f32 %v5175_v36, %v1073_v54  ;;  %v6458_v37 = vand.u32 4294901760, %v5107_v10  ;;  %v758_v52 = vand.u32 4294901760, %v757_v23  ;;  %3730 = vmatpush1.bf16.msra.mxu1 %v3729_v2  ;;  %v247_v38 = vld [vmem:[%s4409_s12 + $0x198] sm:$0xff]  ;;  %v244_v34 = vld [vmem:[%s4409_s12 + $0x180] sm:$0xff]  ;;  %v249_v2 = vld [vmem:[%s4409_s12 + $0x1a8] sm:$0xff] }
  0x88   : > { %6455 = vst [vmem:[#allocation95_spill] sm:$0xff] %v5220_v17  ;;  %1996 = vmatmul.mubr.f32.gmra.mrb[34].mxu0 %v6456_v39  ;;  %v766_v46 = vsub.f32 %v5168_v27, %v6457_v8  ;;  %v5233_v21 = vsub.f32 %v240_v43, %v5210_v15  ;;  %v6460_v39 = vand.u32 4294901760, %v5186_v47  ;;  %v5240_v8 = vsub.f32 %v350_v13, %v5214_v29 }
  0x89   : > { %2003 = vmatprep.mubr.f32.mxu0 %v6458_v37  ;;  %1070 = vmatprep.subr.mxu1 %v6454_v12  ;;  %v1075_v37 = vand.u32 4294901760, %v1074_v53  ;;  %v6462_v43 = vand.u32 4294901760, %v5191_v24  ;;  %v5248_v10 = vand.u32 4294901760, %v242_v57  ;;  %v6465_v13 = vand.u32 4294901760, %v5119_v4  ;;  %2920 = vst.msk [vmem:[#allocation2] sm:$0xff] %vm2919_vm2, %v6454_v12  ;;  %2921 = vst.msk [vmem:[#allocation2 + $0x8] sm:$0xff] %vm2919_vm2, %v6454_v12 }
  0x8a   : > { %6459 = vst [vmem:[#allocation96_spill] sm:$0xff] %v5233_v21  ;;  %v772_v25 = vsub.f32 %v5186_v47, %v6460_v39  ;;  %6461 = vst [vmem:[#allocation97_spill] sm:$0xff] %v5240_v8  ;;  %2249 = vmatpush1.msra.mxu0 %v1073_v54  ;;  %744 = vmatmul.mubr.f32.gmra.mrb[36].mxu1 %v743_v42  ;;  %v5250_v39 = vand.u32 4294901760, %v353_v16  ;;  %v767_v53 = vand.u32 4294901760, %v766_v46  ;;  %v6466_v42 = vand.u32 4294901760, %v5132_v33  ;;  %v248_v54 = vld [vmem:[%s4409_s12 + $0x1a0] sm:$0xff] }
  0x8b   : > { %v781_v23 = vsub.f32 %v5191_v24, %v6462_v43  ;;  %6463 = vst [vmem:[#allocation98_spill] sm:$0xff] %v5248_v10  ;;  %3812 = vmatprep.subr.bf16.mxu0 %v6316_v30  ;;  %753 = vmatprep.mubr.f32.mxu1 %v752_v9  ;;  %v356_v43 = vsel %vm279_vm0, %v247_v38, 0  ;;  %v6467_v29 = vand.u32 4294901760, %v5208_v3  ;;  %v5265_v9 = vand.u32 4294901760, %v244_v34  ;;  %2924 = vst.msk [vmem:[#allocation2 + $0x18] sm:$0xff] %vm2919_vm2, %v6454_v12 }
  0x8c   : > { %6464 = vst [vmem:[#allocation99_spill] sm:$0xff] %v5250_v39  ;;  %2007 = vmatmul.mubr.f32.gmra.mrb[36].mxu0 %v6465_v13  ;;  %1076 = vmatpush1.msra.mxu1 %v1075_v37  ;;  %v773_v19 = vand.u32 4294901760, %v772_v25  ;;  %v6469_v13 = vand.u32 4294901760, %v5220_v17  ;;  %v5272_v37 = vsub.f32 %v242_v57, %v5248_v10  ;;  %v5275_v25 = vsub.f32 %v353_v16, %v5250_v39  ;;  %v251_v16 = vld [vmem:[%s4409_s12 + $0x1b8] sm:$0xff] }
  0x8d   : > { %2014 = vmatprep.mubr.f32.mxu0 %v6466_v42  ;;  %v787_v15 = vsub.f32 %v5208_v3, %v6467_v29  ;;  %6468 = vst [vmem:[#allocation100_spill] sm:$0xff] %v5265_v9  ;;  %3731 = vmatprep.subr.bf16.mxu1 %v6316_v30  ;;  %v782_v46 = vand.u32 4294901760, %v781_v23  ;;  %v246_v29 = vld [vmem:[%s4409_s12 + $0x190] sm:$0xff]  ;;  %v6472_v42 = vand.u32 4294901760, %v5147_v45  ;;  %v5280_v4 = vand.u32 4294901760, %v356_v43  ;;  %2925 = vst.msk [vmem:[#allocation2 + $0x20] sm:$0xff] %vm2919_vm2, %v6454_v12 }
  0x8e   : > { %759 = vmatmul.mubr.f32.gmra.mrb[38].mxu1 %v758_v52  ;;  %v796_v38 = vsub.f32 %v5220_v17, %v6469_v13  ;;  %6470 = vst [vmem:[#allocation101_spill] sm:$0xff] %v5272_v37  ;;  %6471 = vst [vmem:[#allocation102_spill] sm:$0xff] %v5275_v25  ;;  %v359_v52 = vsel %vm279_vm0, %v249_v2, 0  ;;  %v6474_v13 = vand.u32 4294901760, %v5168_v27  ;;  %v5296_v45 = vsub.f32 %v244_v34, %v5265_v9 }
  0x8f   : > { %768 = vmatprep.mubr.f32.mxu1 %v767_v53  ;;  %6473 = vst [vmem:[#allocation103_spill] sm:$0xff] %v5280_v4  ;;  %v6475_v53 = vand.u32 4294901760, %v5233_v21  ;;  %v5298_v2 = vand.u32 4294901760, %v246_v29  ;;  %v788_v23 = vand.u32 4294901760, %v787_v15  ;;  %v6478_v57 = vand.u32 4294901760, %v5240_v8  ;;  %2927 = vst.msk [vmem:[#allocation2 + $0x30] sm:$0xff] %vm2919_vm2, %v6454_v12 }
  0x90   : > { %2018 = vmatmul.mubr.f32.gmra.mrb[38].mxu0 %v6472_v42  ;;  %6476 = vst [vmem:[#allocation104_spill] sm:$0xff] %v5296_v45  ;;  %v816_v27 = vand.u32 4294901760, %v5272_v37  ;;  %v5304_v33 = vand.u32 4294901760, %v359_v52  ;;  %v6480_v39 = vand.u32 4294901760, %v5186_v47  ;;  %v797_v34 = vand.u32 4294901760, %v796_v38  ;;  %2928 = vst.msk [vmem:[#allocation2 + $0x38] sm:$0xff] %vm2919_vm2, %v6454_v12 }
  0x91   : > { %2025 = vmatprep.mubr.f32.mxu0 %v6474_v13  ;;  %v802_v42 = vsub.f32 %v5233_v21, %v6475_v53  ;;  %6477 = vst [vmem:[#allocation105_spill] sm:$0xff] %v5298_v2  ;;  %v811_v13 = vsub.f32 %v5240_v8, %v6478_v57  ;;  %v825_v53 = vand.u32 4294901760, %v5275_v25  ;;  %v362_v15 = vsel %vm279_vm0, %v251_v16, 0  ;;  %2930 = vst.msk [vmem:[#allocation2 + $0x48] sm:$0xff] %vm2919_vm2, %v6454_v12 }
  0x92   : > { %774 = vmatmul.mubr.f32.gmra.mrb[40].mxu1 %v773_v19  ;;  %6479 = vst [vmem:[#allocation106_spill] sm:$0xff] %v5304_v33  ;;  %v5311_v19 = vsub.f32 %v356_v43, %v5280_v4  ;;  %v6482_v9 = vand.u32 4294901760, %v5191_v24  ;;  %v831_v57 = vand.u32 4294901760, %v5296_v45  ;;  %v5318_v10 = vsub.f32 %v246_v29, %v5298_v2  ;;  %2931 = vst.msk [vmem:[#allocation2 + $0x50] sm:$0xff] %vm2919_vm2, %v6454_v12 }
  0x93   : > { %783 = vmatprep.mubr.f32.mxu1 %v782_v46  ;;  %v5320_v47 = vand.u32 4294901760, %v248_v54  ;;  %v803_v46 = vand.u32 4294901760, %v802_v42  ;;  %v817_v43 = vsub.f32 %v5272_v37, %v816_v27  ;;  %v5325_v38 = vsub.f32 %v359_v52, %v5304_v33  ;;  %2933 = vst.msk [vmem:[#allocation2 + $0x60] sm:$0xff] %vm2919_vm2, %v6454_v12  ;;  %2934 = vst.msk [vmem:[#allocation2 + $0x68] sm:$0xff] %vm2919_vm2, %v6454_v12 }
  0x94   : > { %2029 = vmatmul.mubr.f32.gmra.mrb[40].mxu0 %v6480_v39  ;;  %6481 = vst [vmem:[#allocation107_spill] sm:$0xff] %v5311_v19  ;;  %6483 = vst [vmem:[#allocation108_spill] sm:$0xff] %v5318_v10  ;;  %v253_v39 = vld [vmem:[%s4409_s12 + $0x1c8] sm:$0xff]  ;;  %v5327_v16 = vand.u32 4294901760, %v362_v15  ;;  %v812_v29 = vand.u32 4294901760, %v811_v13  ;;  %v826_v24 = vsub.f32 %v5275_v25, %v825_v53  ;;  %v840_v2 = vand.u32 4294901760, %v5311_v19 }
  0x95   : > { %2036 = vmatprep.mubr.f32.mxu0 %v6482_v9  ;;  %6484 = vst [vmem:[#allocation109_spill] sm:$0xff] %v5320_v47  ;;  %6485 = vst [vmem:[#allocation110_spill] sm:$0xff] %v5325_v38  ;;  %v6487_v9 = vand.u32 4294901760, %v5208_v3  ;;  %v6488_v42 = vand.u32 4294901760, %v5220_v17  ;;  %v365_v37 = vsel %vm279_vm0, %v253_v39, 0  ;;  %v832_v52 = vsub.f32 %v5296_v45, %v831_v57 }
  0x96   : > { %789 = vmatmul.mubr.f32.gmra.mrb[42].mxu1 %v788_v23  ;;  %6486 = vst [vmem:[#allocation111_spill] sm:$0xff] %v5327_v16  ;;  %v250_v23 = vld [vmem:[%s4409_s12 + $0x1b0] sm:$0xff]  ;;  %v846_v33 = vand.u32 4294901760, %v5318_v10  ;;  %v5340_v3 = vsub.f32 %v248_v54, %v5320_v47  ;;  %v818_v13 = vand.u32 4294901760, %v817_v43  ;;  %v5345_v25 = vsub.f32 %v362_v15, %v5327_v16  ;;  %2936 = vst.msk [vmem:[#allocation2 + $0x78] sm:$0xff] %vm2919_vm2, %v6454_v12 }
  0x97   : > { %798 = vmatprep.mubr.f32.mxu1 %v797_v34  ;;  %v255_v34 = vld [vmem:[%s4409_s12 + $0x1d8] sm:$0xff]  ;;  %v5347_v17 = vand.u32 4294901760, %v250_v23  ;;  %v6492_v39 = vand.u32 4294901760, %v5233_v21  ;;  %v827_v45 = vand.u32 4294901760, %v826_v24  ;;  %v841_v54 = vsub.f32 %v5311_v19, %v840_v2  ;;  %v257_v21 = vld [vmem:[%s4409_s12 + $0x1e8] sm:$0xff]  ;;  %2937 = vst.msk [vmem:[#allocation2 + $0x80] sm:$0xff] %vm2919_vm2, %v6454_v12 }
  0x98   : > { %2040 = vmatmul.mubr.f32.gmra.mrb[42].mxu0 %v6487_v9  ;;  %6489 = vst [vmem:[#allocation112_spill] sm:$0xff] %v5340_v3  ;;  %v855_v9 = vand.u32 4294901760, %v5325_v38  ;;  %6490 = vst [vmem:[#allocation113_spill] sm:$0xff] %v5345_v25  ;;  %v5353_v47 = vand.u32 4294901760, %v365_v37  ;;  %v6493_v43 = vand.u32 4294901760, %v5240_v8  ;;  %v368_v15 = vsel %vm279_vm0, %v255_v34, 0 }
  0x99   : > { %2047 = vmatprep.mubr.f32.mxu0 %v6488_v42  ;;  %6491 = vst [vmem:[#allocation114_spill] sm:$0xff] %v5347_v17  ;;  %v252_v42 = vld [vmem:[%s4409_s12 + $0x1c0] sm:$0xff]  ;;  %v833_v16 = vand.u32 4294901760, %v832_v52  ;;  %v847_v24 = vsub.f32 %v5318_v10, %v846_v33  ;;  %v5367_v19 = vsub.f32 %v250_v23, %v5347_v17  ;;  %v371_v10 = vsel %vm279_vm0, %v257_v21, 0  ;;  %v259_v17 = vld [vmem:[%s4409_s12 + $0x1f8] sm:$0xff]  ;;  %2939 = vst.msk [vmem:[#allocation2 + $0x90] sm:$0xff] %vm2919_vm2, %v6454_v12 }
  0x9a   : > { %804 = vmatmul.mubr.f32.gmra.mrb[44].mxu1 %v803_v46  ;;  %v5360_v4 = vand.u32 4294901760, %v252_v42  ;;  %v254_v46 = vld [vmem:[%s4409_s12 + $0x1d0] sm:$0xff]  ;;  %v856_v52 = vsub.f32 %v5325_v38, %v855_v9  ;;  %v5372_v34 = vsub.f32 %v365_v37, %v5353_v47  ;;  %2940 = vst.msk [vmem:[#allocation2 + $0x98] sm:$0xff] %vm2919_vm2, %v6454_v12  ;;  %2942 = vst.msk [vmem:[#allocation2 + $0xa8] sm:$0xff] %vm2919_vm2, %v6454_v12 }
  0x9b   : > { %813 = vmatprep.mubr.f32.mxu1 %v812_v29  ;;  %v861_v29 = vand.u32 4294901760, %v5340_v3  ;;  %6495 = vst [vmem:[#allocation116_spill] sm:$0xff] %v5367_v19  ;;  %v5380_v23 = vand.u32 4294901760, %v254_v46  ;;  %v876_v37 = vand.u32 4294901760, %v5367_v19  ;;  %2943 = vst.msk [vmem:[#allocation2 + $0xb0] sm:$0xff] %vm2919_vm2, %v6454_v12 }
  0x9c   : > { %2051 = vmatmul.mubr.f32.gmra.mrb[44].mxu0 %v6492_v39  ;;  %6494 = vst [vmem:[#allocation115_spill] sm:$0xff] %v5360_v4  ;;  %v870_v39 = vand.u32 4294901760, %v5345_v25  ;;  %6496 = vst [vmem:[#allocation117_spill] sm:$0xff] %v5372_v34  ;;  %v5378_v8 = vsub.f32 %v252_v42, %v5360_v4  ;;  %v885_v38 = vand.u32 4294901760, %v5372_v34  ;;  %v5390_v42 = vand.u32 4294901760, %v371_v10  ;;  %v256_v4 = vld [vmem:[%s4409_s12 + $0x1e0] sm:$0xff] }
  0x9d   : > { %2058 = vmatprep.mubr.f32.mxu0 %v6493_v43  ;;  %v842_v43 = vand.u32 4294901760, %v841_v54  ;;  %6499 = vst [vmem:[#allocation120_spill] sm:$0xff] %v5380_v23  ;;  %2945 = vst.msk [vmem:[#allocation2 + $0xc0] sm:$0xff] %vm2919_vm2, %v6454_v12 }
  0x9e   : > { %819 = vmatmul.mubr.f32.gmra.mrb[46].mxu1 %v818_v13  ;;  %v5374_v13 = vand.u32 4294901760, %v368_v15  ;;  %6498 = vst [vmem:[#allocation119_spill] sm:$0xff] %v5378_v8  ;;  %v871_v54 = vsub.f32 %v5345_v25, %v870_v39  ;;  %6501 = vst [vmem:[#allocation122_spill] sm:$0xff] %v5390_v42  ;;  %v5396_v25 = vsub.f32 %v254_v46, %v5380_v23  ;;  %v258_v46 = vld [vmem:[%s4409_s12 + $0x1f0] sm:$0xff]  ;;  %s4178_s12 = scalar_lea.vmem %s4177_s11, 8192 }
  0x9f   : > { %828 = vmatprep.mubr.f32.mxu1 %v827_v45  ;;  %v862_v45 = vsub.f32 %v5340_v3, %v861_v29  ;;  %v5399_v3 = vand.u32 4294901760, %v256_v4  ;;  %2946 = vst.msk [vmem:[#allocation2 + $0xc8] sm:$0xff] %vm2919_vm2, %v6454_v12  ;;  %2948 = vst.msk [vmem:[#allocation2 + $0xd8] sm:$0xff] %vm2919_vm2, %v6454_v12  ;;  %p4180_p1 = scmp.lt.s32.totalorder %s4178_s12, %s4172_s9 }
  0xa0   : > { %2062 = vmatmul.mubr.f32.gmra.mrb[46].mxu0 %v816_v27  ;;  %6497 = vst [vmem:[#allocation118_spill] sm:$0xff] %v5374_v13  ;;  %v848_v27 = vand.u32 4294901760, %v847_v24  ;;  %v5388_v21 = vsub.f32 %v368_v15, %v5374_v13  ;;  %v891_v24 = vand.u32 4294901760, %v5378_v8  ;;  %6502 = vst [vmem:[#allocation123_spill] sm:$0xff] %v5396_v25  ;;  %v886_v15 = vsub.f32 %v5372_v34, %v885_v38 }
  0xa1   : > { %2069 = vmatprep.mubr.f32.mxu0 %v825_v53  ;;  %v857_v53 = vand.u32 4294901760, %v856_v52  ;;  %v877_v52 = vsub.f32 %v5367_v19, %v876_v37  ;;  %6503 = vst [vmem:[#allocation124_spill] sm:$0xff] %v5399_v3  ;;  %v3756_v34 = vpack.c.bf16 %v4431_v31, %v4417_v28  ;;  %v6536_v28 = vld [vmem:[#allocation48_spill] sm:$0xff]  ;;  %v6537_v31 = vld [vmem:[#allocation49_spill] sm:$0xff]  ;;  %2949 = vst.msk [vmem:[#allocation2 + $0xe0] sm:$0xff] %vm2919_vm2, %v6454_v12  ;;  %p4181_p2 = por %p4180_p1, %p4179_p0 }
  0xa2   : > { %834 = vmatmul.mubr.f32.gmra.mrb[48].mxu1 %v833_v16  ;;  %6500 = vst [vmem:[#allocation121_spill] sm:$0xff] %v5388_v21  ;;  %v374_v16 = vsel %vm279_vm0, %v259_v17, 0  ;;  %v5404_v17 = vsub.f32 %v371_v10, %v5390_v42  ;;  %v887_v10 = vand.u32 4294901760, %v886_v15  ;;  %2951 = vst.msk [vmem:[#allocation2 + $0xf0] sm:$0xff] %vm2919_vm2, %v6454_v12 }
  0xa3   : > { %843 = vmatprep.mubr.f32.mxu1 %v842_v43  ;;  %v872_v43 = vand.u32 4294901760, %v871_v54  ;;  %v5406_v13 = vand.u32 4294901760, %v374_v16  ;;  %v878_v54 = vand.u32 4294901760, %v877_v52  ;;  %2952 = vst.msk [vmem:[#allocation2 + $0xf8] sm:$0xff] %vm2919_vm2, %v6454_v12  ;;  %2954 = vst.msk [vmem:[#allocation2 + $0x108] sm:$0xff] %vm2919_vm2, %v6454_v12  ;;  %p4182_p3 = pnand %p4181_p2, %p4175_p13 }
  0xa4   : > { %2073 = vmatmul.mubr.f32.gmra.mrb[48].mxu0 %v831_v57  ;;  %v863_v57 = vand.u32 4294901760, %v862_v45  ;;  %6504 = vst [vmem:[#allocation125_spill] sm:$0xff] %v5404_v17  ;;  %v906_v45 = vand.u32 4294901760, %v5396_v25  ;;  %2955 = vst.msk [vmem:[#allocation2 + $0x110] sm:$0xff] %vm2919_vm2, %v6454_v12 }
  0xa5   : > { %2080 = vmatprep.mubr.f32.mxu0 %v840_v2  ;;  %v900_v2 = vand.u32 4294901760, %v5388_v21  ;;  %6505 = vst [vmem:[#allocation126_spill] sm:$0xff] %v5406_v13  ;;  %2957 = vst.msk [vmem:[#allocation2 + $0x120] sm:$0xff] %vm2919_vm2, %v6454_v12 }
  0xa6   : > { %849 = vmatmul.mubr.f32.gmra.mrb[50].mxu1 %v848_v27  ;;  %v892_v27 = vsub.f32 %v5378_v8, %v891_v24  ;;  %v5421_v8 = vsub.f32 %v374_v16, %v5406_v13  ;;  %2958 = vst.msk [vmem:[#allocation2 + $0x128] sm:$0xff] %vm2919_vm2, %v6454_v12  ;;  %2960 = vst.msk [vmem:[#allocation2 + $0x138] sm:$0xff] %vm2919_vm2, %v6454_v12 }
  0xa7   : > { %858 = vmatprep.mubr.f32.mxu1 %v857_v53  ;;  %v5414_v53 = vand.u32 4294901760, %v258_v46  ;;  %v901_v19 = vsub.f32 %v5388_v21, %v900_v2  ;;  %v6569_v21 = vld [vmem:[#allocation118_spill] sm:$0xff]  ;;  %2961 = vst.msk [vmem:[#allocation2 + $0x140] sm:$0xff] %vm2919_vm2, %v6454_v12  ;;  %2963 = vst.msk [vmem:[#allocation2 + $0x150] sm:$0xff] %vm2919_vm2, %v6454_v12 }
  0xa8   : > { %2084 = vmatmul.mubr.f32.gmra.mrb[50].mxu0 %v846_v33  ;;  %v5412_v33 = vsub.f32 %v256_v4, %v5399_v3  ;;  %6508 = vst [vmem:[#allocation129_spill] sm:$0xff] %v5421_v8  ;;  %v907_v4 = vsub.f32 %v5396_v25, %v906_v45  ;;  %v930_v15 = vand.u32 4294901760, %v5421_v8  ;;  %v6568_v25 = vld [vmem:[#allocation115_spill] sm:$0xff]  ;;  %2964 = vst.msk [vmem:[#allocation2 + $0x158] sm:$0xff] %vm2919_vm2, %v6454_v12 }
  0xa9   : > { %2091 = vmatprep.mubr.f32.mxu0 %v855_v9  ;;  %6507 = vst [vmem:[#allocation128_spill] sm:$0xff] %v5414_v53  ;;  %v915_v9 = vand.u32 4294901760, %v5404_v17  ;;  %v5426_v3 = vsub.f32 %v258_v46, %v5414_v53  ;;  %2966 = vst.msk [vmem:[#allocation2 + $0x168] sm:$0xff] %vm2919_vm2, %v6454_v12 }
  0xaa   : > { %864 = vmatmul.mubr.f32.gmra.mrb[52].mxu1 %v863_v57  ;;  %6506 = vst [vmem:[#allocation127_spill] sm:$0xff] %v5412_v33  ;;  %v893_v57 = vand.u32 4294901760, %v892_v27  ;;  %v921_v52 = vand.u32 4294901760, %v5412_v33  ;;  %v908_v16 = vand.u32 4294901760, %v907_v4  ;;  %v931_v46 = vsub.f32 %v5421_v8, %v930_v15  ;;  %v6520_v4 = vld [vmem:[#allocation9_spill] sm:$0xff]  ;;  %2967 = vst.msk [vmem:[#allocation2 + $0x170] sm:$0xff] %vm2919_vm2, %v6454_v12 }
  0xab   : > { %873 = vmatprep.mubr.f32.mxu1 %v872_v43  ;;  %6509 = vst [vmem:[#allocation130_spill] sm:$0xff] %v5426_v3  ;;  %v916_v43 = vsub.f32 %v5404_v17, %v915_v9  ;;  %v936_v27 = vand.u32 4294901760, %v5426_v3  ;;  %v6565_v8 = vld [vmem:[#allocation109_spill] sm:$0xff]  ;;  %v6567_v17 = vld [vmem:[#allocation114_spill] sm:$0xff]  ;;  %2969 = vst.msk [vmem:[#allocation2 + $0x180] sm:$0xff] %vm2919_vm2, %v6454_v12 }
  0xac   : > { %2095 = vmatmul.mubr.f32.gmra.mrb[52].mxu0 %v861_v29  ;;  %v902_v29 = vand.u32 4294901760, %v901_v19  ;;  %2970 = vst.msk [vmem:[#allocation2 + $0x188] sm:$0xff] %vm2919_vm2, %v6454_v12  ;;  %2972 = vst.msk [vmem:[#allocation2 + $0x198] sm:$0xff] %vm2919_vm2, %v6454_v12 }
  0xad   : > { %2102 = vmatprep.mubr.f32.mxu0 %v870_v39  ;;  %v922_v39 = vsub.f32 %v5412_v33, %v921_v52  ;;  %v937_v19 = vsub.f32 %v5426_v3, %v936_v27  ;;  %v6564_v3 = vld [vmem:[#allocation106_spill] sm:$0xff]  ;;  %v6566_v33 = vld [vmem:[#allocation111_spill] sm:$0xff]  ;;  %2973 = vst.msk [vmem:[#allocation2 + $0x1a0] sm:$0xff] %vm2919_vm2, %v6454_v12 }
  0xae   : > { %879 = vmatmul.mubr.f32.gmra.mrb[54].mxu1 %v878_v54  ;;  %v917_v54 = vand.u32 4294901760, %v916_v43  ;;  %v6525_v43 = vpack.c.bf16 %v4918_v40, %v4913_v20  ;;  %v6530_v40 = vld [vmem:[#allocation17_spill] sm:$0xff]  ;;  %v6531_v20 = vld [vmem:[#allocation40_spill] sm:$0xff]  ;;  %2923 = vst.msk [vmem:[#allocation2 + $0x10] sm:$0x3] %vm2922_vm3, %v6454_v12 }
  0xaf   : > { %888 = vmatprep.mubr.f32.mxu1 %v887_v10  ;;  %v932_v10 = vand.u32 4294901760, %v931_v46  ;;  %v6543_v46 = vld [vmem:[#allocation62_spill] sm:$0xff]  ;;  %2926 = vst.msk [vmem:[#allocation2 + $0x28] sm:$0x3] %vm2922_vm3, %v6454_v12  ;;  %2929 = vst.msk [vmem:[#allocation2 + $0x40] sm:$0x3] %vm2922_vm3, %v6454_v12 }
  0xb0   : > { %2106 = vmatmul.mubr.f32.gmra.mrb[54].mxu0 %v876_v37  ;;  %v923_v37 = vand.u32 4294901760, %v922_v39  ;;  %v6532_v39 = vld [vmem:[#allocation42_spill] sm:$0xff]  ;;  %2932 = vst.msk [vmem:[#allocation2 + $0x58] sm:$0x3] %vm2922_vm3, %v6454_v12  ;;  %2935 = vst.msk [vmem:[#allocation2 + $0x70] sm:$0x3] %vm2922_vm3, %v6454_v12 }
  0xb1   : > { %2113 = vmatprep.mubr.f32.mxu0 %v885_v38  ;;  %v938_v38 = vand.u32 4294901760, %v937_v19  ;;  %v6545_v19 = vld [vmem:[#allocation67_spill] sm:$0xff]  ;;  %2938 = vst.msk [vmem:[#allocation2 + $0x88] sm:$0x3] %vm2922_vm3, %v6454_v12  ;;  %2941 = vst.msk [vmem:[#allocation2 + $0xa0] sm:$0x3] %vm2922_vm3, %v6454_v12 }
  0xb2   : > { %894 = vmatmul.mubr.f32.gmra.mrb[56].mxu1 %v893_v57  ;;  %v6519_v57 = vpack.c.bf16 %v4617_v61, %v4612_v5  ;;  %v6523_v5 = vld [vmem:[#allocation11_spill] sm:$0xff]  ;;  %v6524_v61 = vld [vmem:[#allocation33_spill] sm:$0xff]  ;;  %2944 = vst.msk [vmem:[#allocation2 + $0xb8] sm:$0x3] %vm2922_vm3, %v6454_v12  ;;  %2947 = vst.msk [vmem:[#allocation2 + $0xd0] sm:$0x3] %vm2922_vm3, %v6454_v12 }
  0xb3   : > { %903 = vmatprep.mubr.f32.mxu1 %v902_v29  ;;  %v6522_v29 = vpack.c.bf16 %v4863_v32, %v4846_v49  ;;  %v6526_v49 = vld [vmem:[#allocation12_spill] sm:$0xff]  ;;  %2950 = vst.msk [vmem:[#allocation2 + $0xe8] sm:$0x3] %vm2922_vm3, %v6454_v12  ;;  %2953 = vst.msk [vmem:[#allocation2 + $0x100] sm:$0x3] %vm2922_vm3, %v6454_v12 }
  0xb4   : > { %2117 = vmatmul.mubr.f32.gmra.mrb[56].mxu0 %v891_v24  ;;  %v3732_v24 = vpack.c.bf16 %v4477_v44, %v4462_v41  ;;  %v6510_v41 = vld [vmem:[#allocation6_spill] sm:$0xff]  ;;  %v6511_v44 = vld [vmem:[#allocation15_spill] sm:$0xff]  ;;  %v6527_v32 = vld [vmem:[#allocation36_spill] sm:$0xff]  ;;  %2956 = vst.msk [vmem:[#allocation2 + $0x118] sm:$0x3] %vm2922_vm3, %v6454_v12 }
  0xb5   : > { %2124 = vmatprep.mubr.f32.mxu0 %v900_v2  ;;  %v3735_v2 = vpack.c.bf16 %v4558_v51, %v4531_v26  ;;  %v6512_v51 = vld [vmem:[#allocation19_spill] sm:$0xff]  ;;  %v3741_v26 = vpack.c.bf16 %v4582_v6, %v4577_v0  ;;  %v6517_v0 = vld [vmem:[#allocation26_spill] sm:$0xff]  ;;  %v6518_v6 = vld [vmem:[#allocation28_spill] sm:$0xff]  ;;  %2959 = vst.msk [vmem:[#allocation2 + $0x130] sm:$0x3] %vm2922_vm3, %v6454_v12 }
  0xb6   : > { %909 = vmatmul.mubr.f32.gmra.mrb[58].mxu1 %v908_v16  ;;  %v6529_v16 = vpack.c.bf16 %v5063_v59, %v5004_v63  ;;  %v6533_v59 = vld [vmem:[#allocation22_spill] sm:$0xff]  ;;  %v6534_v63 = vld [vmem:[#allocation43_spill] sm:$0xff]  ;;  %2962 = vst.msk [vmem:[#allocation2 + $0x148] sm:$0x3] %vm2922_vm3, %v6454_v12  ;;  %2965 = vst.msk [vmem:[#allocation2 + $0x160] sm:$0x3] %vm2922_vm3, %v6454_v12 }
  0xb7   : > { %918 = vmatprep.mubr.f32.mxu1 %v917_v54  ;;  %v6540_v54 = vld [vmem:[#allocation55_spill] sm:$0xff]  ;;  %2968 = vst.msk [vmem:[#allocation2 + $0x178] sm:$0x3] %vm2922_vm3, %v6454_v12  ;;  %2971 = vst.msk [vmem:[#allocation2 + $0x190] sm:$0x3] %vm2922_vm3, %v6454_v12 }
  0xb8   : > { %2128 = vmatmul.mubr.f32.gmra.mrb[58].mxu0 %v906_v45  ;;  %v6513_v45 = vld [vmem:[#allocation7_spill] sm:$0xff]  ;;  %2974 = vst.msk [vmem:[#allocation2 + $0x1a8] sm:$0x3] %vm2922_vm3, %v6454_v12 }
  0xb9   : > { %2135 = vmatprep.mubr.f32.mxu0 %v915_v9  ;;  %v6516_v9 = vld [vmem:[#allocation8_spill] sm:$0xff] }
  0xba   : > { %924 = vmatmul.mubr.f32.gmra.mrb[60].mxu1 %v923_v37  ;;  %v6544_v37 = vld [vmem:[#allocation64_spill] sm:$0xff] }
  0xbb   : > { %933 = vmatprep.mubr.f32.mxu1 %v932_v10  ;;  %v6546_v10 = vld [vmem:[#allocation68_spill] sm:$0xff] }
  0xbc   : > { %2139 = vmatmul.mubr.f32.gmra.mrb[60].mxu0 %v921_v52  ;;  %v6521_v52 = vld [vmem:[#allocation30_spill] sm:$0xff] }
  0xbd   : > { %2146 = vmatprep.mubr.f32.mxu0 %v930_v15  ;;  %v6528_v15 = vld [vmem:[#allocation38_spill] sm:$0xff] }
  0xbe   : > { %939 = vmatmul.mubr.f32.gmra.mrb[62].mxu1 %v938_v38  ;;  %v6547_v38 = vld [vmem:[#allocation70_spill] sm:$0xff] }
  0xbf   : > { %1104 = vmatprep.mubr.f32.mxu1 %v4446_v35 }
  0xc0   : > { %2150 = vmatmul.mubr.f32.gmra.mrb[62].mxu0 %v936_v27  ;;  %v6539_v27 = vld [vmem:[#allocation54_spill] sm:$0xff] }
  0xc1   : > { %2277 = vmatprep.mubr.f32.mxu0 %v4446_v35 }
  0xc2   : > { %1106 = vmatmul.mubr.f32.vlgmr.msra.gmra.mrb[0].mxu1 %v4507_v56 }
  0xc3   : > { %3733 = vmatpush1.bf16.msra.mxu1 %v3732_v24  ;;  %1111 = vmatprep.mubr.f32.mxu1 %v4511_v60  ;;  %v6548_v24 = vld [vmem:[#allocation73_spill] sm:$0xff] }
  0xc4   : > { %2279 = vmatmul.mubr.f32.vlgmr.msra.gmra.mrb[0].mxu0 %v4507_v56  ;;  %3734 = vmatprep.subr.bf16.mxu1 %v6316_v30 }
  0xc5   : > { %3814 = vmatpush1.bf16.msra.mxu0 %v4347_v11  ;;  %2284 = vmatprep.mubr.f32.mxu0 %v4511_v60  ;;  %v3738_v11 = vpack.c.bf16 %v4568_v50, %v4563_v58  ;;  %v6514_v50 = vld [vmem:[#allocation21_spill] sm:$0xff]  ;;  %v6515_v58 = vld [vmem:[#allocation24_spill] sm:$0xff] }
  0xc6   : > { %1113 = vmatmul.mubr.f32.gmra.mrb[2].mxu1 %v4514_v62  ;;  %3815 = vmatprep.subr.bf16.mxu0 %v6316_v30 }
  0xc7   : > { %1118 = vmatprep.mubr.f32.mxu1 %v4544_v48  ;;  %3736 = vmatpush1.bf16.msra.mxu1 %v3735_v2  ;;  %v6549_v2 = vld [vmem:[#allocation75_spill] sm:$0xff] }
  0xc8   : > { %2286 = vmatmul.mubr.f32.gmra.mrb[2].mxu0 %v4514_v62  ;;  %3737 = vmatprep.subr.bf16.mxu1 %v6316_v30 }
  0xc9   : > { %2291 = vmatprep.mubr.f32.mxu0 %v4544_v48  ;;  %3817 = vmatpush1.bf16.msra.mxu0 %v6510_v41  ;;  %v6551_v41 = vld [vmem:[#allocation78_spill] sm:$0xff] }
  0xca   : > { %1120 = vmatmul.mubr.f32.gmra.mrb[4].mxu1 %v6511_v44  ;;  %3818 = vmatprep.subr.bf16.mxu0 %v6316_v30 }
  0xcb   : > { %1125 = vmatprep.mubr.f32.mxu1 %v6512_v51  ;;  %3739 = vmatpush1.bf16.msra.mxu1 %v3738_v11  ;;  %v6550_v11 = vld [vmem:[#allocation76_spill] sm:$0xff] }
  0xcc   : > { %2293 = vmatmul.mubr.f32.gmra.mrb[4].mxu0 %v6511_v44  ;;  %3740 = vmatprep.subr.bf16.mxu1 %v6316_v30 }
  0xcd   : > { %2298 = vmatprep.mubr.f32.mxu0 %v6512_v51  ;;  %3820 = vmatpush1.bf16.msra.mxu0 %v6513_v45  ;;  %v6553_v45 = vld [vmem:[#allocation83_spill] sm:$0xff] }
  0xce   : > { %1127 = vmatmul.mubr.f32.gmra.mrb[6].mxu1 %v6514_v50  ;;  %3821 = vmatprep.subr.bf16.mxu0 %v6316_v30 }
  0xcf   : > { %1132 = vmatprep.mubr.f32.mxu1 %v6515_v58  ;;  %3742 = vmatpush1.bf16.msra.mxu1 %v3741_v26  ;;  %v6552_v26 = vld [vmem:[#allocation80_spill] sm:$0xff] }
  0xd0   : > { %2300 = vmatmul.mubr.f32.gmra.mrb[6].mxu0 %v6514_v50  ;;  %3743 = vmatprep.subr.bf16.mxu1 %v6316_v30 }
  0xd1   : > { %2305 = vmatprep.mubr.f32.mxu0 %v6515_v58  ;;  %3823 = vmatpush1.bf16.msra.mxu0 %v6516_v9  ;;  %v6554_v9 = vld [vmem:[#allocation85_spill] sm:$0xff] }
  0xd2   : > { %1134 = vmatmul.mubr.f32.gmra.mrb[8].mxu1 %v6517_v0  ;;  %3824 = vmatprep.subr.bf16.mxu0 %v6316_v30 }
  0xd3   : > { %1139 = vmatprep.mubr.f32.mxu1 %v6518_v6  ;;  %3745 = vmatpush1.bf16.msra.mxu1 %v6519_v57  ;;  %v6555_v57 = vld [vmem:[#allocation87_spill] sm:$0xff] }
  0xd4   : > { %2307 = vmatmul.mubr.f32.gmra.mrb[8].mxu0 %v6517_v0  ;;  %3746 = vmatprep.subr.bf16.mxu1 %v6316_v30 }
  0xd5   : > { %2312 = vmatprep.mubr.f32.mxu0 %v6518_v6  ;;  %3826 = vmatpush1.bf16.msra.mxu0 %v6520_v4  ;;  %v6556_v4 = vld [vmem:[#allocation89_spill] sm:$0xff] }
  0xd6   : > { %1141 = vmatmul.mubr.f32.gmra.mrb[10].mxu1 %v4694_v1  ;;  %3827 = vmatprep.subr.bf16.mxu0 %v6316_v30 }
  0xd7   : > { %1146 = vmatprep.mubr.f32.mxu1 %v6521_v52  ;;  %3748 = vmatpush1.bf16.msra.mxu1 %v6522_v29  ;;  %v6557_v29 = vld [vmem:[#allocation93_spill] sm:$0xff] }
  0xd8   : > { %2314 = vmatmul.mubr.f32.gmra.mrb[10].mxu0 %v4694_v1  ;;  %3749 = vmatprep.subr.bf16.mxu1 %v6316_v30 }
  0xd9   : > { %2319 = vmatprep.mubr.f32.mxu0 %v6521_v52  ;;  %3829 = vmatpush1.bf16.msra.mxu0 %v6523_v5  ;;  %v6558_v5 = vld [vmem:[#allocation94_spill] sm:$0xff] }
  0xda   : > { %1148 = vmatmul.mubr.f32.gmra.mrb[12].mxu1 %v6524_v61  ;;  %3830 = vmatprep.subr.bf16.mxu0 %v6316_v30 }
  0xdb   : > { %1153 = vmatprep.mubr.f32.mxu1 %v4744_v7  ;;  %3751 = vmatpush1.bf16.msra.mxu1 %v6525_v43  ;;  %v6559_v43 = vld [vmem:[#allocation98_spill] sm:$0xff] }
  0xdc   : > { %2321 = vmatmul.mubr.f32.gmra.mrb[12].mxu0 %v6524_v61  ;;  %3752 = vmatprep.subr.bf16.mxu1 %v6316_v30 }
  0xdd   : > { %2326 = vmatprep.mubr.f32.mxu0 %v4744_v7  ;;  %3832 = vmatpush1.bf16.msra.mxu0 %v6526_v49  ;;  %v6560_v49 = vld [vmem:[#allocation99_spill] sm:$0xff] }
  0xde   : > { %1155 = vmatmul.mubr.f32.gmra.mrb[14].mxu1 %v6527_v32  ;;  %3833 = vmatprep.subr.bf16.mxu0 %v6316_v30 }
  0xdf   : > { %1160 = vmatprep.mubr.f32.mxu1 %v6528_v15  ;;  %3754 = vmatpush1.bf16.msra.mxu1 %v6529_v16  ;;  %v6561_v16 = vld [vmem:[#allocation100_spill] sm:$0xff] }
  0xe0   : > { %2328 = vmatmul.mubr.f32.gmra.mrb[14].mxu0 %v6527_v32  ;;  %3755 = vmatprep.subr.bf16.mxu1 %v6316_v30 }
  0xe1   : > { %2333 = vmatprep.mubr.f32.mxu0 %v6528_v15  ;;  %3835 = vmatpush1.bf16.msra.mxu0 %v6530_v40  ;;  %v6562_v40 = vld [vmem:[#allocation103_spill] sm:$0xff] }
  0xe2   : > { %1162 = vmatmul.mubr.f32.gmra.mrb[16].mxu1 %v6531_v20  ;;  %3836 = vmatprep.subr.bf16.mxu0 %v6316_v30  ;;  %v6535_v30 = vld [vmem:[#allocation46_spill] sm:$0xff] }
  0xe3   : > { %1167 = vmatprep.mubr.f32.mxu1 %v6532_v39  ;;  %3757 = vmatpush1.bf16.msra.mxu1 %v3756_v34  ;;  %v6538_v34 = vld [vmem:[#allocation52_spill] sm:$0xff] }
  0xe4   : > { %2335 = vmatmul.mubr.f32.gmra.mrb[16].mxu0 %v6531_v20  ;;  %1400 = vmatprep.subr.mxu1 %v6454_v12 }
  0xe5   : > { %2340 = vmatprep.mubr.f32.mxu0 %v6532_v39  ;;  %3838 = vmatpush1.bf16.msra.mxu0 %v6533_v59  ;;  %v6563_v59 = vld [vmem:[#allocation105_spill] sm:$0xff] }
  0xe6   : > { %1169 = vmatmul.mubr.f32.gmra.mrb[18].mxu1 %v6534_v63  ;;  %2555 = vmatprep.subr.mxu0 %v6454_v12  ;;  %v6625_v12 = vld [vmem:[#allocation113_spill] sm:$0xff] }
  0xe7   : > { %1174 = vmatprep.mubr.f32.mxu1 %v6535_v30  ;;  %1403 = vmatpush1.msra.mxu1 %v5175_v36  ;;  %v6542_v36 = vld [vmem:[#allocation60_spill] sm:$0xff] }
  0xe8   : > { %2342 = vmatmul.mubr.f32.gmra.mrb[18].mxu0 %v6534_v63 }
  0xe9   : > { %2347 = vmatprep.mubr.f32.mxu0 %v6535_v30  ;;  %2557 = vmatpush1.msra.mxu0 %v4631_v22  ;;  %v6541_v22 = vld [vmem:[#allocation58_spill] sm:$0xff] }
  0xea   : > { %1176 = vmatmul.mubr.f32.gmra.mrb[20].mxu1 %v6536_v28 }
  0xeb   : > { %1181 = vmatprep.mubr.f32.mxu1 %v6537_v31 }
  0xec   : > { %2349 = vmatmul.mubr.f32.gmra.mrb[20].mxu0 %v6536_v28 }
  0xed   : > { %2354 = vmatprep.mubr.f32.mxu0 %v6537_v31 }
  0xee   : > { %1183 = vmatmul.mubr.f32.gmra.mrb[22].mxu1 %v6538_v34 }
  0xef   : > { %1188 = vmatprep.mubr.f32.mxu1 %v6539_v27 }
  0xf0   : > { %2356 = vmatmul.mubr.f32.gmra.mrb[22].mxu0 %v6538_v34 }
  0xf1   : > { %2361 = vmatprep.mubr.f32.mxu0 %v6539_v27 }
  0xf2   : > { %1190 = vmatmul.mubr.f32.gmra.mrb[24].mxu1 %v6540_v54 }
  0xf3   : > { %1195 = vmatprep.mubr.f32.mxu1 %v6541_v22 }
  0xf4   : > { %2363 = vmatmul.mubr.f32.gmra.mrb[24].mxu0 %v6540_v54 }
  0xf5   : > { %2368 = vmatprep.mubr.f32.mxu0 %v6541_v22 }
  0xf6   : > { %1197 = vmatmul.mubr.f32.gmra.mrb[26].mxu1 %v6542_v36 }
  0xf7   : > { %1202 = vmatprep.mubr.f32.mxu1 %v6543_v46 }
  0xf8   : > { %2370 = vmatmul.mubr.f32.gmra.mrb[26].mxu0 %v6542_v36 }
  0xf9   : > { %2375 = vmatprep.mubr.f32.mxu0 %v6543_v46 }
  0xfa   : > { %1204 = vmatmul.mubr.f32.gmra.mrb[28].mxu1 %v6544_v37 }
  0xfb   : > { %1209 = vmatprep.mubr.f32.mxu1 %v4999_v14 }
  0xfc   : > { %2377 = vmatmul.mubr.f32.gmra.mrb[28].mxu0 %v6544_v37 }
  0xfd   : > { %2382 = vmatprep.mubr.f32.mxu0 %v4999_v14 }
  0xfe   : > { %1211 = vmatmul.mubr.f32.gmra.mrb[30].mxu1 %v6545_v19 }
  0xff   : > { %1216 = vmatprep.mubr.f32.mxu1 %v6546_v10 }
 0x100   : > { %2384 = vmatmul.mubr.f32.gmra.mrb[30].mxu0 %v6545_v19 }
 0x101   : > { %2389 = vmatprep.mubr.f32.mxu0 %v6546_v10 }
 0x102   : > { %1218 = vmatmul.mubr.f32.gmra.mrb[32].mxu1 %v6547_v38 }
 0x103   : > { %1223 = vmatprep.mubr.f32.mxu1 %v6548_v24 }
 0x104   : > { %2391 = vmatmul.mubr.f32.gmra.mrb[32].mxu0 %v6547_v38 }
 0x105   : > { %2396 = vmatprep.mubr.f32.mxu0 %v6548_v24 }
 0x106   : > { %1225 = vmatmul.mubr.f32.gmra.mrb[34].mxu1 %v6549_v2 }
 0x107   : > { %1230 = vmatprep.mubr.f32.mxu1 %v6550_v11 }
 0x108   : > { %2398 = vmatmul.mubr.f32.gmra.mrb[34].mxu0 %v6549_v2 }
 0x109   : > { %2403 = vmatprep.mubr.f32.mxu0 %v6550_v11 }
 0x10a   : > { %1232 = vmatmul.mubr.f32.gmra.mrb[36].mxu1 %v6551_v41 }
 0x10b   : > { %1237 = vmatprep.mubr.f32.mxu1 %v6552_v26 }
 0x10c   : > { %2405 = vmatmul.mubr.f32.gmra.mrb[36].mxu0 %v6551_v41 }
 0x10d   : > { %2410 = vmatprep.mubr.f32.mxu0 %v6552_v26 }
 0x10e   : > { %1239 = vmatmul.mubr.f32.gmra.mrb[38].mxu1 %v6553_v45 }
 0x10f   : > { %1244 = vmatprep.mubr.f32.mxu1 %v6554_v9 }
 0x110   : > { %2412 = vmatmul.mubr.f32.gmra.mrb[38].mxu0 %v6553_v45 }
 0x111   : > { %2417 = vmatprep.mubr.f32.mxu0 %v6554_v9 }
 0x112   : > { %1246 = vmatmul.mubr.f32.gmra.mrb[40].mxu1 %v6555_v57 }
 0x113   : > { %1251 = vmatprep.mubr.f32.mxu1 %v5162_v55 }
 0x114   : > { %2419 = vmatmul.mubr.f32.gmra.mrb[40].mxu0 %v6555_v57 }
 0x115   : > { %2424 = vmatprep.mubr.f32.mxu0 %v5162_v55 }
 0x116   : > { %1253 = vmatmul.mubr.f32.gmra.mrb[42].mxu1 %v6556_v4 }
 0x117   : > { %1258 = vmatprep.mubr.f32.mxu1 %v5193_v18 }
 0x118   : > { %2426 = vmatmul.mubr.f32.gmra.mrb[42].mxu0 %v6556_v4 }
 0x119   : > { %2431 = vmatprep.mubr.f32.mxu0 %v5193_v18 }
 0x11a   : > { %1260 = vmatmul.mubr.f32.gmra.mrb[44].mxu1 %v6557_v29 }
 0x11b   : > { %1265 = vmatprep.mubr.f32.mxu1 %v6558_v5 }
 0x11c   : > { %2433 = vmatmul.mubr.f32.gmra.mrb[44].mxu0 %v6557_v29 }
 0x11d   : > { %2438 = vmatprep.mubr.f32.mxu0 %v6558_v5 }
 0x11e   : > { %1267 = vmatmul.mubr.f32.gmra.mrb[46].mxu1 %v6559_v43 }
 0x11f   : > { %1272 = vmatprep.mubr.f32.mxu1 %v6560_v49 }
 0x120   : > { %2440 = vmatmul.mubr.f32.gmra.mrb[46].mxu0 %v6559_v43 }
 0x121   : > { %2445 = vmatprep.mubr.f32.mxu0 %v6560_v49 }
 0x122   : > { %1274 = vmatmul.mubr.f32.gmra.mrb[48].mxu1 %v6561_v16 }
 0x123   : > { %1279 = vmatprep.mubr.f32.mxu1 %v6562_v40 }
 0x124   : > { %2447 = vmatmul.mubr.f32.gmra.mrb[48].mxu0 %v6561_v16 }
 0x125   : > { %2452 = vmatprep.mubr.f32.mxu0 %v6562_v40 }
 0x126   : > { %1281 = vmatmul.mubr.f32.gmra.mrb[50].mxu1 %v6563_v59 }
 0x127   : > { %1286 = vmatprep.mubr.f32.mxu1 %v6564_v3 }
 0x128   : > { %2454 = vmatmul.mubr.f32.gmra.mrb[50].mxu0 %v6563_v59 }
 0x129   : > { %2459 = vmatprep.mubr.f32.mxu0 %v6564_v3 }
 0x12a   : > { %1288 = vmatmul.mubr.f32.gmra.mrb[52].mxu1 %v6565_v8 }
 0x12b   : > { %1293 = vmatprep.mubr.f32.mxu1 %v6566_v33 }
 0x12c   : > { %2461 = vmatmul.mubr.f32.gmra.mrb[52].mxu0 %v6565_v8 }
 0x12d   : > { %2466 = vmatprep.mubr.f32.mxu0 %v6566_v33 }
 0x12e   : > { %1295 = vmatmul.mubr.f32.gmra.mrb[54].mxu1 %v6567_v17 }
 0x12f   : > { %1300 = vmatprep.mubr.f32.mxu1 %v5353_v47 }
 0x130   : > { %2468 = vmatmul.mubr.f32.gmra.mrb[54].mxu0 %v6567_v17  ;;  %v6570_v17 = vld [vmem:[#allocation124_spill] sm:$0xff] }
 0x131   : > { %2473 = vmatprep.mubr.f32.mxu0 %v5353_v47 }
 0x132   : > { %1302 = vmatmul.mubr.f32.gmra.mrb[56].mxu1 %v6568_v25 }
 0x133   : > { %1307 = vmatprep.mubr.f32.mxu1 %v6569_v21 }
 0x134   : > { %2475 = vmatmul.mubr.f32.gmra.mrb[56].mxu0 %v6568_v25 }
 0x135   : > { %2480 = vmatprep.mubr.f32.mxu0 %v6569_v21  ;;  %v6571_v21 = vld [vmem:[#allocation10_spill] sm:$0xff] }
 0x136   : > { %1309 = vmatmul.mubr.f32.gmra.mrb[58].mxu1 %v5380_v23 }
 0x137   : > { %1314 = vmatprep.mubr.f32.mxu1 %v5390_v42 }
 0x138   : > { %2482 = vmatmul.mubr.f32.gmra.mrb[58].mxu0 %v5380_v23  ;;  %v6572_v23 = vld [vmem:[#allocation13_spill] sm:$0xff] }
 0x139   : > { %2487 = vmatprep.mubr.f32.mxu0 %v5390_v42  ;;  %v6573_v42 = vld [vmem:[#allocation14_spill] sm:$0xff] }
 0x13a   : > { %1316 = vmatmul.mubr.f32.gmra.mrb[60].mxu1 %v6570_v17 }
 0x13b   : > { %1321 = vmatprep.mubr.f32.mxu1 %v5406_v13 }
 0x13c   : > { %2489 = vmatmul.mubr.f32.gmra.mrb[60].mxu0 %v6570_v17  ;;  %v6574_v17 = vld [vmem:[#allocation16_spill] sm:$0xff] }
 0x13d   : > { %2494 = vmatprep.mubr.f32.mxu0 %v5406_v13  ;;  %v6575_v13 = vld [vmem:[#allocation18_spill] sm:$0xff] }
 0x13e   : > { %1323 = vmatmul.mubr.f32.gmra.mrb[62].mxu1 %v5414_v53 }
 0x13f   : > { %1432 = vmatprep.mubr.f32.mxu1 %v6571_v21  ;;  %v6584_v21 = vld [vmem:[#allocation35_spill] sm:$0xff] }
 0x140   : > { %2496 = vmatmul.mubr.f32.gmra.mrb[62].mxu0 %v5414_v53  ;;  %v6576_v53 = vld [vmem:[#allocation20_spill] sm:$0xff] }
 0x141   : > { %2585 = vmatprep.mubr.f32.mxu0 %v4446_v35  ;;  %v6577_v35 = vld [vmem:[#allocation23_spill] sm:$0xff] }
 0x142   : > { %1435 = vmatmul.mubr.f32.vlgmr.msra.gmra.mrb[0].mxu1 %v6572_v23  ;;  %v6583_v23 = vld [vmem:[#allocation34_spill] sm:$0xff] }
 0x143   : > { %1441 = vmatprep.mubr.f32.mxu1 %v6573_v42  ;;  %v6585_v42 = vld [vmem:[#allocation37_spill] sm:$0xff] }
 0x144   : > { %2587 = vmatmul.mubr.f32.vlgmr.msra.gmra.mrb[0].mxu0 %v4507_v56  ;;  %v6578_v56 = vld [vmem:[#allocation25_spill] sm:$0xff] }
 0x145   : > { %2592 = vmatprep.mubr.f32.mxu0 %v4511_v60  ;;  %v6579_v60 = vld [vmem:[#allocation27_spill] sm:$0xff] }
 0x146   : > { %1444 = vmatmul.mubr.f32.gmra.mrb[2].mxu1 %v6574_v17  ;;  %v6586_v17 = vld [vmem:[#allocation39_spill] sm:$0xff] }
 0x147   : > { %1450 = vmatprep.mubr.f32.mxu1 %v6575_v13  ;;  %v6582_v13 = vld [vmem:[#allocation32_spill] sm:$0xff] }
 0x148   : > { %2594 = vmatmul.mubr.f32.gmra.mrb[2].mxu0 %v4514_v62  ;;  %v6580_v62 = vld [vmem:[#allocation29_spill] sm:$0xff] }
 0x149   : > { %2599 = vmatprep.mubr.f32.mxu0 %v4544_v48  ;;  %v6581_v48 = vld [vmem:[#allocation31_spill] sm:$0xff] }
 0x14a   : > { %1453 = vmatmul.mubr.f32.gmra.mrb[4].mxu1 %v6576_v53  ;;  %v6587_v53 = vld [vmem:[#allocation41_spill] sm:$0xff] }
 0x14b   : > { %1459 = vmatprep.mubr.f32.mxu1 %v6577_v35  ;;  %v6641_v35 = vld [vmem:[#allocation128_spill] sm:$0xff] }
 0x14c   : > { %2601 = vmatmul.mubr.f32.gmra.mrb[4].mxu0 %v6511_v44  ;;  %v6589_v44 = vld [vmem:[#allocation45_spill] sm:$0xff] }
 0x14d   : > { %2606 = vmatprep.mubr.f32.mxu0 %v6512_v51  ;;  %v6590_v51 = vld [vmem:[#allocation47_spill] sm:$0xff] }
 0x14e   : > { %1462 = vmatmul.mubr.f32.gmra.mrb[6].mxu1 %v6578_v56 }
 0x14f   : > { %1468 = vmatprep.mubr.f32.mxu1 %v6579_v60 }
 0x150   : > { %2608 = vmatmul.mubr.f32.gmra.mrb[6].mxu0 %v6514_v50  ;;  %v6592_v50 = vld [vmem:[#allocation51_spill] sm:$0xff] }
 0x151   : > { %2613 = vmatprep.mubr.f32.mxu0 %v6515_v58  ;;  %v6593_v58 = vld [vmem:[#allocation53_spill] sm:$0xff] }
 0x152   : > { %1471 = vmatmul.mubr.f32.gmra.mrb[8].mxu1 %v6580_v62  ;;  %v5853_v62 = vld [vmem:[%s6089_s2] ss:$0 sm:$0xff] }
 0x153   : > { %1477 = vmatprep.mubr.f32.mxu1 %v6581_v48 }
 0x154   : > { %2615 = vmatmul.mubr.f32.gmra.mrb[8].mxu0 %v6517_v0  ;;  %v6594_v0 = vld [vmem:[#allocation56_spill] sm:$0xff] }
 0x155   : > { %2620 = vmatprep.mubr.f32.mxu0 %v6518_v6  ;;  %v6595_v6 = vld [vmem:[#allocation57_spill] sm:$0xff] }
 0x156   : > { %1480 = vmatmul.mubr.f32.gmra.mrb[10].mxu1 %v6582_v13 }
 0x157   : > { %1486 = vmatprep.mubr.f32.mxu1 %v6583_v23 }
 0x158   : > { %2622 = vmatmul.mubr.f32.gmra.mrb[10].mxu0 %v4694_v1  ;;  %v6588_v1 = vld [vmem:[#allocation44_spill] sm:$0xff] }
 0x159   : > { %2627 = vmatprep.mubr.f32.mxu0 %v6521_v52  ;;  %v6596_v52 = vld [vmem:[#allocation59_spill] sm:$0xff] }
 0x15a   : > { %1489 = vmatmul.mubr.f32.gmra.mrb[12].mxu1 %v6584_v21  ;;  %v5858_v21 = vld [vmem:[%s6090_s3] ss:$0 sm:$0xff] }
 0x15b   : > { %1495 = vmatprep.mubr.f32.mxu1 %v6585_v42 }
 0x15c   : > { %2629 = vmatmul.mubr.f32.gmra.mrb[12].mxu0 %v6524_v61  ;;  %v6597_v61 = vld [vmem:[#allocation61_spill] sm:$0xff] }
 0x15d   : > { %2634 = vmatprep.mubr.f32.mxu0 %v4744_v7  ;;  %v6591_v7 = vld [vmem:[#allocation50_spill] sm:$0xff] }
 0x15e   : > { %1498 = vmatmul.mubr.f32.gmra.mrb[14].mxu1 %v6586_v17 }
 0x15f   : > { %1504 = vmatprep.mubr.f32.mxu1 %v6587_v53 }
 0x160   : > { %2636 = vmatmul.mubr.f32.gmra.mrb[14].mxu0 %v6527_v32  ;;  %v6598_v32 = vld [vmem:[#allocation63_spill] sm:$0xff] }
 0x161   : > { %2641 = vmatprep.mubr.f32.mxu0 %v6528_v15  ;;  %v6599_v15 = vld [vmem:[#allocation65_spill] sm:$0xff] }
 0x162   : > { %1507 = vmatmul.mubr.f32.gmra.mrb[16].mxu1 %v6588_v1 }
 0x163   : > { %1513 = vmatprep.mubr.f32.mxu1 %v6589_v44 }
 0x164   : > { %2643 = vmatmul.mubr.f32.gmra.mrb[16].mxu0 %v6531_v20  ;;  %v6600_v20 = vld [vmem:[#allocation66_spill] sm:$0xff] }
 0x165   : > { %2648 = vmatprep.mubr.f32.mxu0 %v6532_v39  ;;  %v6601_v39 = vld [vmem:[#allocation69_spill] sm:$0xff] }
 0x166   : > { %1516 = vmatmul.mubr.f32.gmra.mrb[18].mxu1 %v6590_v51 }
 0x167   : > { %1522 = vmatprep.mubr.f32.mxu1 %v6591_v7 }
 0x168   : > { %2650 = vmatmul.mubr.f32.gmra.mrb[18].mxu0 %v6534_v63  ;;  %v6602_v63 = vld [vmem:[#allocation71_spill] sm:$0xff] }
 0x169   : > { %2655 = vmatprep.mubr.f32.mxu0 %v6535_v30  ;;  %v6603_v30 = vld [vmem:[#allocation72_spill] sm:$0xff] }
 0x16a   : > { %1525 = vmatmul.mubr.f32.gmra.mrb[20].mxu1 %v6592_v50  ;;  %v3008_v50 = vld [vmem:[#allocation2] sm:$0xff] }
 0x16b   : > { %1531 = vmatprep.mubr.f32.mxu1 %v6593_v58  ;;  %v3040_v58 = vld [vmem:[#allocation2 + $0x1] sm:$0xff] }
 0x16c   : > { %2657 = vmatmul.mubr.f32.gmra.mrb[20].mxu0 %v6536_v28  ;;  %v6604_v28 = vld [vmem:[#allocation74_spill] sm:$0xff] }
 0x16d   : > { %2662 = vmatprep.mubr.f32.mxu0 %v6537_v31  ;;  %v6605_v31 = vld [vmem:[#allocation77_spill] sm:$0xff] }
 0x16e   : > { %1534 = vmatmul.mubr.f32.gmra.mrb[22].mxu1 %v6594_v0 }
 0x16f   : > { %1540 = vmatprep.mubr.f32.mxu1 %v6595_v6 }
 0x170   : > { %2664 = vmatmul.mubr.f32.gmra.mrb[22].mxu0 %v6538_v34  ;;  %v6606_v34 = vld [vmem:[#allocation79_spill] sm:$0xff] }
 0x171   : > { %2669 = vmatprep.mubr.f32.mxu0 %v6539_v27  ;;  %v6608_v27 = vld [vmem:[#allocation82_spill] sm:$0xff] }
 0x172   : > { %1543 = vmatmul.mubr.f32.gmra.mrb[24].mxu1 %v6596_v52 }
 0x173   : > { %1549 = vmatprep.mubr.f32.mxu1 %v6597_v61 }
 0x174   : > { %2671 = vmatmul.mubr.f32.gmra.mrb[24].mxu0 %v6540_v54  ;;  %v6609_v54 = vld [vmem:[#allocation84_spill] sm:$0xff] }
 0x175   : > { %2676 = vmatprep.mubr.f32.mxu0 %v6541_v22  ;;  %v6610_v22 = vld [vmem:[#allocation86_spill] sm:$0xff] }
 0x176   : > { %1552 = vmatmul.mubr.f32.gmra.mrb[26].mxu1 %v6598_v32 }
 0x177   : > { %1558 = vmatprep.mubr.f32.mxu1 %v6599_v15  ;;  %v3072_v15 = vmax.f32 %v3008_v50, %v3040_v58 }
 0x178   : > { %2678 = vmatmul.mubr.f32.gmra.mrb[26].mxu0 %v6542_v36  ;;  %v6611_v36 = vld [vmem:[#allocation88_spill] sm:$0xff] }
 0x179   : > { %2683 = vmatprep.mubr.f32.mxu0 %v6543_v46  ;;  %v6612_v46 = vld [vmem:[#allocation90_spill] sm:$0xff] }
 0x17a   : > { %1561 = vmatmul.mubr.f32.gmra.mrb[28].mxu1 %v6600_v20 }
 0x17b   : > { %1567 = vmatprep.mubr.f32.mxu1 %v6601_v39 }
 0x17c   : > { %2685 = vmatmul.mubr.f32.gmra.mrb[28].mxu0 %v6544_v37  ;;  %v6613_v37 = vld [vmem:[#allocation91_spill] sm:$0xff] }
 0x17d   : > { %2690 = vmatprep.mubr.f32.mxu0 %v4999_v14  ;;  %v6607_v14 = vld [vmem:[#allocation81_spill] sm:$0xff] }
 0x17e   : > { %1570 = vmatmul.mubr.f32.gmra.mrb[30].mxu1 %v6602_v63 }
 0x17f   : > { %1576 = vmatprep.mubr.f32.mxu1 %v6603_v30  ;;  %v3104_v30 = vld [vmem:[#allocation2 + $0x2] sm:$0xff] }
 0x180   : > { %2692 = vmatmul.mubr.f32.gmra.mrb[30].mxu0 %v6545_v19  ;;  %v6614_v19 = vld [vmem:[#allocation92_spill] sm:$0xff] }
 0x181   : > { %2697 = vmatprep.mubr.f32.mxu0 %v6546_v10  ;;  %v6615_v10 = vld [vmem:[#allocation95_spill] sm:$0xff] }
 0x182   : > { %1579 = vmatmul.mubr.f32.gmra.mrb[32].mxu1 %v6604_v28  ;;  %v3009_v28 = vld [vmem:[#allocation2 + $0x8] sm:$0xff] }
 0x183   : > { %1585 = vmatprep.mubr.f32.mxu1 %v6605_v31  ;;  %v3041_v31 = vld [vmem:[#allocation2 + $0x9] sm:$0xff] }
 0x184   : > { %2699 = vmatmul.mubr.f32.gmra.mrb[32].mxu0 %v6547_v38  ;;  %v6616_v38 = vld [vmem:[#allocation96_spill] sm:$0xff] }
 0x185   : > { %2704 = vmatprep.mubr.f32.mxu0 %v6548_v24  ;;  %v6617_v24 = vld [vmem:[#allocation97_spill] sm:$0xff] }
 0x186   : > { %1588 = vmatmul.mubr.f32.gmra.mrb[34].mxu1 %v6606_v34 }
 0x187   : > { %1594 = vmatprep.mubr.f32.mxu1 %v6607_v14 }
 0x188   : > { %2706 = vmatmul.mubr.f32.gmra.mrb[34].mxu0 %v6549_v2  ;;  %v6620_v2 = vld [vmem:[#allocation104_spill] sm:$0xff] }
 0x189   : > { %2711 = vmatprep.mubr.f32.mxu0 %v6550_v11  ;;  %v6621_v11 = vld [vmem:[#allocation107_spill] sm:$0xff] }
 0x18a   : > { %1597 = vmatmul.mubr.f32.gmra.mrb[36].mxu1 %v6608_v27 }
 0x18b   : > { %1603 = vmatprep.mubr.f32.mxu1 %v6609_v54 }
 0x18c   : > { %2713 = vmatmul.mubr.f32.gmra.mrb[36].mxu0 %v6551_v41  ;;  %v6622_v41 = vld [vmem:[#allocation108_spill] sm:$0xff] }
 0x18d   : > { %2718 = vmatprep.mubr.f32.mxu0 %v6552_v26  ;;  %v6623_v26 = vld [vmem:[#allocation110_spill] sm:$0xff] }
 0x18e   : > { %1606 = vmatmul.mubr.f32.gmra.mrb[38].mxu1 %v6610_v22 }
 0x18f   : > { %1612 = vmatprep.mubr.f32.mxu1 %v6611_v36  ;;  %v3136_v36 = vmax.f32 %v3072_v15, %v3104_v30 }
 0x190   : > { %2720 = vmatmul.mubr.f32.gmra.mrb[38].mxu0 %v6553_v45  ;;  %v6624_v45 = vld [vmem:[#allocation112_spill] sm:$0xff] }
 0x191   : > { %2725 = vmatprep.mubr.f32.mxu0 %v6554_v9  ;;  %v6626_v9 = vld [vmem:[#allocation116_spill] sm:$0xff] }
 0x192   : > { %1615 = vmatmul.mubr.f32.gmra.mrb[40].mxu1 %v6612_v46  ;;  %v3073_v46 = vmax.f32 %v3009_v28, %v3041_v31 }
 0x193   : > { %1621 = vmatprep.mubr.f32.mxu1 %v6613_v37 }
 0x194   : > { %2727 = vmatmul.mubr.f32.gmra.mrb[40].mxu0 %v6555_v57  ;;  %v6627_v57 = vld [vmem:[#allocation114_spill] sm:$0xff] }
 0x195   : > { %2732 = vmatprep.mubr.f32.mxu0 %v5162_v55  ;;  %v6619_v55 = vld [vmem:[#allocation102_spill] sm:$0xff] }
 0x196   : > { %1624 = vmatmul.mubr.f32.gmra.mrb[42].mxu1 %v6614_v19 }
 0x197   : > { %1630 = vmatprep.mubr.f32.mxu1 %v6615_v10 }
 0x198   : > { %2734 = vmatmul.mubr.f32.gmra.mrb[42].mxu0 %v6556_v4  ;;  %v6628_v4 = vld [vmem:[#allocation117_spill] sm:$0xff] }
 0x199   : > { %2739 = vmatprep.mubr.f32.mxu0 %v5193_v18  ;;  %v6618_v18 = vld [vmem:[#allocation101_spill] sm:$0xff] }
 0x19a   : > { %1633 = vmatmul.mubr.f32.gmra.mrb[44].mxu1 %v6616_v38  ;;  %v3105_v38 = vld [vmem:[#allocation2 + $0xa] sm:$0xff] }
 0x19b   : > { %1639 = vmatprep.mubr.f32.mxu1 %v6617_v24 }
 0x19c   : > { %2741 = vmatmul.mubr.f32.gmra.mrb[44].mxu0 %v6557_v29  ;;  %v6629_v29 = vld [vmem:[#allocation119_spill] sm:$0xff] }
 0x19d   : > { %2746 = vmatprep.mubr.f32.mxu0 %v6558_v5  ;;  %v6631_v5 = vld [vmem:[#allocation118_spill] sm:$0xff] }
 0x19e   : > { %1642 = vmatmul.mubr.f32.gmra.mrb[46].mxu1 %v6618_v18 }
 0x19f   : > { %1648 = vmatprep.mubr.f32.mxu1 %v6619_v55 }
 0x1a0   : > { %2748 = vmatmul.mubr.f32.gmra.mrb[46].mxu0 %v6559_v43  ;;  %v6633_v43 = vld [vmem:[#allocation120_spill] sm:$0xff] }
 0x1a1   : > { %2753 = vmatprep.mubr.f32.mxu0 %v6560_v49  ;;  %v6635_v49 = vld [vmem:[#allocation122_spill] sm:$0xff] }
 0x1a2   : > { %1651 = vmatmul.mubr.f32.gmra.mrb[48].mxu1 %v6620_v2 }
 0x1a3   : > { %1657 = vmatprep.mubr.f32.mxu1 %v6621_v11 }
 0x1a4   : > { %2755 = vmatmul.mubr.f32.gmra.mrb[48].mxu0 %v6561_v16  ;;  %v6636_v16 = vld [vmem:[#allocation127_spill] sm:$0xff] }
 0x1a5   : > { %2760 = vmatprep.mubr.f32.mxu0 %v6562_v40  ;;  %v6637_v40 = vld [vmem:[#allocation124_spill] sm:$0xff] }
 0x1a6   : > { %1660 = vmatmul.mubr.f32.gmra.mrb[50].mxu1 %v6622_v41 }
 0x1a7   : > { %1666 = vmatprep.mubr.f32.mxu1 %v6623_v26 }
 0x1a8   : > { %2762 = vmatmul.mubr.f32.gmra.mrb[50].mxu0 %v6563_v59  ;;  %v6639_v59 = vld [vmem:[#allocation126_spill] sm:$0xff] }
 0x1a9   : > { %2767 = vmatprep.mubr.f32.mxu0 %v6564_v3  ;;  %v6630_v3 = vld [vmem:[#allocation121_spill] sm:$0xff] }
 0x1aa   : > { %1669 = vmatmul.mubr.f32.gmra.mrb[52].mxu1 %v6624_v45  ;;  %v3137_v45 = vmax.f32 %v3073_v46, %v3105_v38 }
 0x1ab   : > { %1675 = vmatprep.mubr.f32.mxu1 %v6625_v12 }
 0x1ac   : > { %2769 = vmatmul.mubr.f32.gmra.mrb[52].mxu0 %v6565_v8  ;;  %v6632_v8 = vld [vmem:[#allocation123_spill] sm:$0xff] }
 0x1ad   : > { %2774 = vmatprep.mubr.f32.mxu0 %v6566_v33  ;;  %v6634_v33 = vld [vmem:[#allocation125_spill] sm:$0xff] }
 0x1ae   : > { %1678 = vmatmul.mubr.f32.gmra.mrb[54].mxu1 %v6626_v9 }
 0x1af   : > { %1684 = vmatprep.mubr.f32.mxu1 %v6628_v4 }
 0x1b0   : > { %2776 = vmatmul.mubr.f32.gmra.mrb[54].mxu0 %v6627_v57 }
 0x1b1   : > { %2781 = vmatprep.mubr.f32.mxu0 %v5353_v47  ;;  %v6638_v47 = vld [vmem:[#allocation129_spill] sm:$0xff] }
 0x1b2   : > { %1687 = vmatmul.mubr.f32.gmra.mrb[56].mxu1 %v6629_v29 }
 0x1b3   : > { %1693 = vmatprep.mubr.f32.mxu1 %v6630_v3 }
 0x1b4   : > { %2783 = vmatmul.mubr.f32.gmra.mrb[56].mxu0 %v6568_v25  ;;  %v6640_v25 = vld [vmem:[#allocation130_spill] sm:$0xff] }
 0x1b5   : > { %2788 = vmatprep.mubr.f32.mxu0 %v6631_v5 }
 0x1b6   : > { %1696 = vmatmul.mubr.f32.gmra.mrb[58].mxu1 %v6632_v8 }
 0x1b7   : > { %1702 = vmatprep.mubr.f32.mxu1 %v6634_v33 }
 0x1b8   : > { %2790 = vmatmul.mubr.f32.gmra.mrb[58].mxu0 %v6633_v43 }
 0x1b9   : > { %2795 = vmatprep.mubr.f32.mxu0 %v6635_v49 }
 0x1ba   : > { %1705 = vmatmul.mubr.f32.gmra.mrb[60].mxu1 %v6636_v16 }
 0x1bb   : > { %1711 = vmatprep.mubr.f32.mxu1 %v6638_v47 }
 0x1bc   : > { %2797 = vmatmul.mubr.f32.gmra.mrb[60].mxu0 %v6637_v40 }
 0x1bd   : > { %2802 = vmatprep.mubr.f32.mxu0 %v6639_v59 }
 0x1be   : > { %1714 = vmatmul.mubr.f32.gmra.mrb[62].mxu1 %v6640_v25 }
 0x1c0   : > { %2804 = vmatmul.mubr.f32.gmra.mrb[62].mxu0 %v6641_v35 }
 0x215   : > { %v1436_v56 = vpop.f32.mrb[0].mxu1 }
 0x216   : > { %v1438_v48 = vpop.f32.mrb[1].mxu1 }
 0x217   : > { %v2588_v60 = vpop.f32.mrb[0].mxu0 }
 0x218   : > { %v3839_v13 = vadd.f32 %v2588_v60, %v1436_v56  ;;  %v2590_v23 = vpop.f32.mrb[1].mxu0 }
 0x219   : > { %v1445_v17 = vpop.f32.mrb[2].mxu1 }
 0x21a   : > { %v2816_v42 = vmul.f32 %v3839_v13, %v5853_v62  ;;  %v1447_v1 = vpop.f32.mrb[3].mxu1 }
 0x21b   : > { %v2595_v53 = vpop.f32.mrb[2].mxu0 }
 0x21c   : > { %v2855_v44 = vadd.f32 %v5858_v21, %v2816_v42  ;;  %v3840_v51 = vadd.f32 %v2595_v53, %v1445_v17  ;;  %v2597_v7 = vpop.f32.mrb[3].mxu0 }
 0x21d   : > { %v1454_v52 = vpop.f32.mrb[4].mxu1 }
 0x21e   : > { %v2887_v0 = vmax.f32 %v2855_v44, 0.0  ;;  %v2817_v6 = vmul.f32 %v3840_v51, %v5853_v62  ;;  %v1456_v32 = vpop.f32.mrb[5].mxu1 }
 0x21f   : > { %v2602_v61 = vpop.f32.mrb[4].mxu0 }
 0x220   : > { %2976 = vst.msk [vmem:[#allocation2 + $0x19] sm:$0xff] %vm2919_vm2, %v2887_v0  ;;  %v2856_v20 = vadd.f32 %v5858_v21, %v2817_v6  ;;  %v3841_v39 = vadd.f32 %v2602_v61, %v1454_v52  ;;  %v2604_v63 = vpop.f32.mrb[5].mxu0 }
 0x221   : > { %v1463_v27 = vpop.f32.mrb[6].mxu1 }
 0x222   : > { %v2888_v34 = vmax.f32 %v2856_v20, 0.0  ;;  %v2818_v14 = vmul.f32 %v3841_v39, %v5853_v62  ;;  %v1465_v22 = vpop.f32.mrb[7].mxu1 }
 0x223   : > { %v2609_v54 = vpop.f32.mrb[6].mxu0 }
 0x224   : > { %2977 = vst.msk [vmem:[#allocation2 + $0x21] sm:$0xff] %vm2919_vm2, %v2888_v34  ;;  %v2857_v37 = vadd.f32 %v5858_v21, %v2818_v14  ;;  %v3842_v19 = vadd.f32 %v2609_v54, %v1463_v27  ;;  %v2611_v10 = vpop.f32.mrb[7].mxu0 }
 0x225   : > { %v1472_v55 = vpop.f32.mrb[8].mxu1 }
 0x226   : > { %v2889_v24 = vmax.f32 %v2857_v37, 0.0  ;;  %v2819_v18 = vmul.f32 %v3842_v19, %v5853_v62  ;;  %v1474_v41 = vpop.f32.mrb[9].mxu1 }
 0x227   : > { %v3010_v2 = vld [vmem:[#allocation2 + $0x18] sm:$0xff]  ;;  %v2616_v11 = vpop.f32.mrb[8].mxu0 }
 0x228   : > { %v3200_v26 = vmax.f32 %v3136_v36, %v3010_v2  ;;  %2978 = vst.msk [vmem:[#allocation2 + $0x31] sm:$0xff] %vm2919_vm2, %v2889_v24  ;;  %v2858_v12 = vadd.f32 %v5858_v21, %v2819_v18  ;;  %v3843_v9 = vadd.f32 %v2616_v11, %v1472_v55  ;;  %v2618_v57 = vpop.f32.mrb[9].mxu0  ;;  %v3042_v4 = vld [vmem:[#allocation2 + $0x19] sm:$0xff] }
 0x229   : > { %v1481_v8 = vpop.f32.mrb[10].mxu1  ;;  %v3074_v47 = vmax.f32 %v3010_v2, %v3042_v4 }
 0x22a   : > { %v3264_v29 = vmax.f32 %v3200_v26, %v3042_v4  ;;  %v2890_v3 = vmax.f32 %v2858_v12, 0.0  ;;  %v2820_v5 = vmul.f32 %v3843_v9, %v5853_v62  ;;  %v1483_v40 = vpop.f32.mrb[11].mxu1 }
 0x22b   : > { %v3011_v43 = vld [vmem:[#allocation2 + $0x20] sm:$0xff]  ;;  %v2623_v16 = vpop.f32.mrb[10].mxu0 }
 0x22c   : > { %v3043_v33 = vld [vmem:[#allocation2 + $0x21] sm:$0xff]  ;;  %v3201_v59 = vmax.f32 %v3137_v45, %v3011_v43  ;;  %2979 = vst.msk [vmem:[#allocation2 + $0x39] sm:$0xff] %vm2919_vm2, %v2890_v3  ;;  %v2625_v25 = vpop.f32.mrb[11].mxu0  ;;  %v2859_v35 = vadd.f32 %v5858_v21, %v2820_v5  ;;  %v3844_v56 = vadd.f32 %v2623_v16, %v1481_v8 }
 0x22d   : > { %v3106_v49 = vld [vmem:[#allocation2 + $0x1a] sm:$0xff]  ;;  %v3075_v60 = vmax.f32 %v3011_v43, %v3043_v33  ;;  %v1490_v23 = vpop.f32.mrb[12].mxu1  ;;  %v3107_v0 = vld [vmem:[#allocation2 + $0x22] sm:$0xff] }
 0x22e   : > { %v3138_v48 = vmax.f32 %v3074_v47, %v3106_v49  ;;  %v3328_v13 = vmax.f32 %v3264_v29, %v3106_v49  ;;  %v3265_v42 = vmax.f32 %v3201_v59, %v3043_v33  ;;  %v2891_v53 = vmax.f32 %v2859_v35, 0.0  ;;  %v1492_v51 = vpop.f32.mrb[13].mxu1 }
 0x22f   : > { %v3012_v17 = vld [vmem:[#allocation2 + $0x30] sm:$0xff]  ;;  %v2821_v1 = vmul.f32 %v3844_v56, %v5853_v62  ;;  %v2630_v44 = vpop.f32.mrb[12].mxu0  ;;  %v3139_v32 = vmax.f32 %v3075_v60, %v3107_v0 }
 0x230   : > { %v3202_v7 = vmax.f32 %v3138_v48, %v3012_v17  ;;  %v3393_v50 = vmax.f32 %v3328_v13, %v3012_v17  ;;  %v2632_v58 = vpop.f32.mrb[13].mxu0  ;;  %v3044_v6 = vld [vmem:[#allocation2 + $0x31] sm:$0xff]  ;;  %2980 = vst.msk [vmem:[#allocation2 + $0x49] sm:$0xff] %vm2919_vm2, %v2891_v53  ;;  %v3845_v61 = vadd.f32 %v2630_v44, %v1490_v23  ;;  %v3329_v39 = vmax.f32 %v3265_v42, %v3107_v0 }
 0x231   : > { %v2860_v52 = vadd.f32 %v5858_v21, %v2821_v1  ;;  %v1499_v20 = vpop.f32.mrb[14].mxu1  ;;  %v3076_v22 = vmax.f32 %v3012_v17, %v3044_v6 }
 0x232   : > { %v3457_v15 = vmax.f32 %v3393_v50, %v3044_v6  ;;  %v3266_v63 = vmax.f32 %v3202_v7, %v3044_v6  ;;  %v2822_v14 = vmul.f32 %v3845_v61, %v5853_v62  ;;  %v1501_v54 = vpop.f32.mrb[15].mxu1 }
 0x233   : > { %v3013_v30 = vld [vmem:[#allocation2 + $0x38] sm:$0xff]  ;;  %v2892_v34 = vmax.f32 %v2860_v52, 0.0  ;;  %v2637_v27 = vpop.f32.mrb[14].mxu0 }
 0x234   : > { %v3045_v28 = vld [vmem:[#allocation2 + $0x39] sm:$0xff]  ;;  %v3203_v36 = vmax.f32 %v3139_v32, %v3013_v30  ;;  %v2639_v46 = vpop.f32.mrb[15].mxu0  ;;  %v3394_v37 = vmax.f32 %v3329_v39, %v3013_v30  ;;  %v2861_v10 = vadd.f32 %v5858_v21, %v2822_v14  ;;  %v3846_v38 = vadd.f32 %v2637_v27, %v1499_v20 }
 0x235   : > { %v3108_v31 = vld [vmem:[#allocation2 + $0x32] sm:$0xff]  ;;  %2981 = vst.msk [vmem:[#allocation2 + $0x51] sm:$0xff] %vm2919_vm2, %v2892_v34  ;;  %v3077_v24 = vmax.f32 %v3013_v30, %v3045_v28  ;;  %v1508_v55 = vpop.f32.mrb[16].mxu1  ;;  %v3109_v9 = vld [vmem:[#allocation2 + $0x3a] sm:$0xff] }
 0x236   : > { %v3521_v19 = vmax.f32 %v3457_v15, %v3108_v31  ;;  %v3140_v18 = vmax.f32 %v3076_v22, %v3108_v31  ;;  %v3330_v2 = vmax.f32 %v3266_v63, %v3108_v31  ;;  %v3458_v11 = vmax.f32 %v3394_v37, %v3045_v28  ;;  %v1510_v12 = vpop.f32.mrb[17].mxu1 }
 0x237   : > { %v2893_v41 = vmax.f32 %v2861_v10, 0.0  ;;  %v2823_v26 = vmul.f32 %v3846_v38, %v5853_v62  ;;  %v2644_v45 = vpop.f32.mrb[16].mxu0  ;;  %v3267_v57 = vmax.f32 %v3203_v36, %v3045_v28  ;;  %v3014_v4 = vld [vmem:[#allocation2 + $0x48] sm:$0xff]  ;;  %v3141_v47 = vmax.f32 %v3077_v24, %v3109_v9 }
 0x238   : > { %3553 = vst.msk [vmem:[%s5883_s22] sm:$0xff] %vm2919_vm2, %v3521_v19  ;;  %v3847_v29 = vadd.f32 %v2644_v45, %v1508_v55  ;;  %v2646_v3 = vpop.f32.mrb[17].mxu0  ;;  %v3522_v5 = vmax.f32 %v3458_v11, %v3109_v9  ;;  %v3204_v8 = vmax.f32 %v3140_v18, %v3014_v4  ;;  %v3395_v43 = vmax.f32 %v3330_v2, %v3014_v4  ;;  %v3046_v33 = vld [vmem:[#allocation2 + $0x49] sm:$0xff] }
 0x239   : > { %2982 = vst.msk [vmem:[#allocation2 + $0x61] sm:$0xff] %vm2919_vm2, %v2893_v41  ;;  %v2862_v49 = vadd.f32 %v5858_v21, %v2823_v26  ;;  %v1517_v40 = vpop.f32.mrb[18].mxu1  ;;  %v3331_v60 = vmax.f32 %v3267_v57, %v3109_v9  ;;  %v3078_v1 = vmax.f32 %v3014_v4, %v3046_v33 }
 0x23a   : > { %v2824_v16 = vmul.f32 %v3847_v29, %v5853_v62  ;;  %3554 = vst.msk [vmem:[%s5883_s22 + $0x8] sm:$0xff] %vm2919_vm2, %v3522_v5  ;;  %v3268_v59 = vmax.f32 %v3204_v8, %v3046_v33  ;;  %v3459_v25 = vmax.f32 %v3395_v43, %v3046_v33  ;;  %v1519_v56 = vpop.f32.mrb[19].mxu1 }
 0x23b   : > { %v2651_v35 = vpop.f32.mrb[18].mxu0  ;;  %v2894_v23 = vmax.f32 %v2862_v49, 0.0 }
 0x23c   : > { %v3015_v48 = vld [vmem:[#allocation2 + $0x50] sm:$0xff]  ;;  %v2863_v42 = vadd.f32 %v5858_v21, %v2824_v16  ;;  %v3848_v17 = vadd.f32 %v2651_v35, %v1517_v40  ;;  %v2653_v53 = vpop.f32.mrb[19].mxu0 }
 0x23d   : > { %v3110_v13 = vld [vmem:[#allocation2 + $0x4a] sm:$0xff]  ;;  %v3205_v51 = vmax.f32 %v3141_v47, %v3015_v48  ;;  %v3396_v7 = vmax.f32 %v3331_v60, %v3015_v48  ;;  %2983 = vst.msk [vmem:[#allocation2 + $0x69] sm:$0xff] %vm2919_vm2, %v2894_v23  ;;  %v1526_v6 = vpop.f32.mrb[20].mxu1  ;;  %v3111_v34 = vld [vmem:[#allocation2 + $0x52] sm:$0xff] }
 0x23e   : > { %v3047_v44 = vld [vmem:[#allocation2 + $0x51] sm:$0xff]  ;;  %v3523_v50 = vmax.f32 %v3459_v25, %v3110_v13  ;;  %v2895_v58 = vmax.f32 %v2863_v42, 0.0  ;;  %v2825_v0 = vmul.f32 %v3848_v17, %v5853_v62  ;;  %v3142_v52 = vmax.f32 %v3078_v1, %v3110_v13  ;;  %v1528_v15 = vpop.f32.mrb[21].mxu1 }
 0x23f   : > { %v3332_v61 = vmax.f32 %v3268_v59, %v3110_v13  ;;  %v2658_v32 = vpop.f32.mrb[20].mxu0  ;;  %v3079_v20 = vmax.f32 %v3015_v48, %v3047_v44  ;;  %v3460_v39 = vmax.f32 %v3396_v7, %v3047_v44  ;;  %v3269_v14 = vmax.f32 %v3205_v51, %v3047_v44 }
 0x240   : > { %3555 = vst.msk [vmem:[%s5883_s22 + $0x10] sm:$0xff] %vm2919_vm2, %v3523_v50  ;;  %v3016_v63 = vld [vmem:[#allocation2 + $0x60] sm:$0xff]  ;;  %2984 = vst.msk [vmem:[#allocation2 + $0x79] sm:$0xff] %vm2919_vm2, %v2895_v58  ;;  %v2864_v30 = vadd.f32 %v5858_v21, %v2825_v0  ;;  %v3849_v28 = vadd.f32 %v2658_v32, %v1526_v6  ;;  %v2660_v31 = vpop.f32.mrb[21].mxu0 }
 0x241   : > { %v3048_v27 = vld [vmem:[#allocation2 + $0x61] sm:$0xff]  ;;  %v3206_v54 = vmax.f32 %v3142_v52, %v3016_v63  ;;  %v3397_v22 = vmax.f32 %v3332_v61, %v3016_v63  ;;  %v3524_v36 = vmax.f32 %v3460_v39, %v3111_v34  ;;  %v1535_v19 = vpop.f32.mrb[22].mxu1  ;;  %v3143_v55 = vmax.f32 %v3079_v20, %v3111_v34 }
 0x242   : > { %v2896_v46 = vmax.f32 %v2864_v30, 0.0  ;;  %v2826_v37 = vmul.f32 %v3849_v28, %v5853_v62  ;;  %v1537_v18 = vpop.f32.mrb[23].mxu1  ;;  %v3080_v2 = vmax.f32 %v3016_v63, %v3048_v27  ;;  %v3333_v45 = vmax.f32 %v3269_v14, %v3111_v34 }
 0x243   : > { %v3270_v10 = vmax.f32 %v3206_v54, %v3048_v27  ;;  %v3461_v38 = vmax.f32 %v3397_v22, %v3048_v27  ;;  %v2665_v24 = vpop.f32.mrb[22].mxu0  ;;  %3556 = vst.msk [vmem:[%s5883_s22 + $0x18] sm:$0xff] %vm2919_vm2, %v3524_v36 }
 0x244   : > { %2985 = vst.msk [vmem:[#allocation2 + $0x81] sm:$0xff] %vm2919_vm2, %v2896_v46  ;;  %v2865_v11 = vadd.f32 %v5858_v21, %v2826_v37  ;;  %v3850_v41 = vadd.f32 %v2665_v24, %v1535_v19  ;;  %v2667_v26 = vpop.f32.mrb[23].mxu0  ;;  %v3017_v12 = vld [vmem:[#allocation2 + $0x68] sm:$0xff] }
 0x245   : > { %v3049_v9 = vld [vmem:[#allocation2 + $0x69] sm:$0xff]  ;;  %v3207_v3 = vmax.f32 %v3143_v55, %v3017_v12  ;;  %v1544_v8 = vpop.f32.mrb[24].mxu1  ;;  %v3398_v43 = vmax.f32 %v3333_v45, %v3017_v12 }
 0x246   : > { %v3112_v57 = vld [vmem:[#allocation2 + $0x62] sm:$0xff]  ;;  %v3081_v4 = vmax.f32 %v3017_v12, %v3049_v9  ;;  %v2897_v16 = vmax.f32 %v2865_v11, 0.0  ;;  %v2827_v40 = vmul.f32 %v3850_v41, %v5853_v62  ;;  %v1546_v59 = vpop.f32.mrb[25].mxu1  ;;  %v3113_v60 = vld [vmem:[#allocation2 + $0x6a] sm:$0xff] }
 0x247   : > { %v3144_v29 = vmax.f32 %v3080_v2, %v3112_v57  ;;  %v3334_v5 = vmax.f32 %v3270_v10, %v3112_v57  ;;  %v3525_v33 = vmax.f32 %v3461_v38, %v3112_v57  ;;  %v3018_v49 = vld [vmem:[#allocation2 + $0x78] sm:$0xff]  ;;  %v2672_v47 = vpop.f32.mrb[24].mxu0  ;;  %v3271_v25 = vmax.f32 %v3207_v3, %v3049_v9 }
 0x248   : > { %v2674_v56 = vpop.f32.mrb[25].mxu0  ;;  %v3462_v48 = vmax.f32 %v3398_v43, %v3049_v9  ;;  %v3050_v13 = vld [vmem:[#allocation2 + $0x79] sm:$0xff]  ;;  %2986 = vst.msk [vmem:[#allocation2 + $0x91] sm:$0xff] %vm2919_vm2, %v2897_v16  ;;  %v2866_v42 = vadd.f32 %v5858_v21, %v2827_v40  ;;  %v3851_v17 = vadd.f32 %v2672_v47, %v1544_v8  ;;  %v3145_v53 = vmax.f32 %v3081_v4, %v3113_v60 }
 0x249   : > { %v3208_v35 = vmax.f32 %v3144_v29, %v3018_v49  ;;  %3557 = vst.msk [vmem:[%s5883_s22 + $0x20] sm:$0xff] %vm2919_vm2, %v3525_v33  ;;  %v3399_v23 = vmax.f32 %v3334_v5, %v3018_v49  ;;  %v3335_v1 = vmax.f32 %v3271_v25, %v3113_v60  ;;  %v1553_v51 = vpop.f32.mrb[26].mxu1  ;;  %v3082_v20 = vmax.f32 %v3018_v49, %v3050_v13 }
 0x24a   : > { %v3526_v7 = vmax.f32 %v3462_v48, %v3113_v60  ;;  %v2898_v52 = vmax.f32 %v2866_v42, 0.0  ;;  %v2828_v61 = vmul.f32 %v3851_v17, %v5853_v62  ;;  %v1555_v15 = vpop.f32.mrb[27].mxu1 }
 0x24b   : > { %v3272_v44 = vmax.f32 %v3208_v35, %v3050_v13  ;;  %v3463_v50 = vmax.f32 %v3399_v23, %v3050_v13  ;;  %v3019_v58 = vld [vmem:[#allocation2 + $0x80] sm:$0xff]  ;;  %v2679_v32 = vpop.f32.mrb[26].mxu0 }
 0x24c   : > { %v3051_v0 = vld [vmem:[#allocation2 + $0x81] sm:$0xff]  ;;  %v3209_v39 = vmax.f32 %v3145_v53, %v3019_v58  ;;  %v2681_v63 = vpop.f32.mrb[27].mxu0  ;;  %3558 = vst.msk [vmem:[%s5883_s22 + $0x28] sm:$0xff] %vm2919_vm2, %v3526_v7  ;;  %v3400_v30 = vmax.f32 %v3335_v1, %v3019_v58  ;;  %2987 = vst.msk [vmem:[#allocation2 + $0x99] sm:$0xff] %vm2919_vm2, %v2898_v52  ;;  %v2867_v31 = vadd.f32 %v5858_v21, %v2828_v61 }
 0x24d   : > { %v3114_v6 = vld [vmem:[#allocation2 + $0x7a] sm:$0xff]  ;;  %v3852_v34 = vadd.f32 %v2679_v32, %v1553_v51  ;;  %v3083_v14 = vmax.f32 %v3019_v58, %v3051_v0  ;;  %v1562_v54 = vpop.f32.mrb[28].mxu1  ;;  %v3115_v38 = vld [vmem:[#allocation2 + $0x82] sm:$0xff] }
 0x24e   : > { %v3527_v28 = vmax.f32 %v3463_v50, %v3114_v6  ;;  %v3146_v27 = vmax.f32 %v3082_v20, %v3114_v6  ;;  %v3336_v22 = vmax.f32 %v3272_v44, %v3114_v6  ;;  %v3464_v36 = vmax.f32 %v3400_v30, %v3051_v0  ;;  %v1564_v10 = vpop.f32.mrb[29].mxu1 }
 0x24f   : > { %v2899_v46 = vmax.f32 %v2867_v31, 0.0  ;;  %v2829_v37 = vmul.f32 %v3852_v34, %v5853_v62  ;;  %v2686_v19 = vpop.f32.mrb[28].mxu0  ;;  %v3273_v24 = vmax.f32 %v3209_v39, %v3051_v0  ;;  %v3020_v18 = vld [vmem:[#allocation2 + $0x90] sm:$0xff]  ;;  %v3147_v4 = vmax.f32 %v3083_v14, %v3115_v38 }
 0x250   : > { %3559 = vst.msk [vmem:[%s5883_s22 + $0x30] sm:$0xff] %vm2919_vm2, %v3527_v28  ;;  %v3853_v55 = vadd.f32 %v2686_v19, %v1562_v54  ;;  %v2688_v2 = vpop.f32.mrb[29].mxu0  ;;  %v3528_v11 = vmax.f32 %v3464_v36, %v3115_v38  ;;  %v3210_v41 = vmax.f32 %v3146_v27, %v3020_v18  ;;  %v3401_v26 = vmax.f32 %v3336_v22, %v3020_v18  ;;  %v3052_v45 = vld [vmem:[#allocation2 + $0x91] sm:$0xff] }
 0x251   : > { %2988 = vst.msk [vmem:[#allocation2 + $0xa9] sm:$0xff] %vm2919_vm2, %v2899_v46  ;;  %v2868_v12 = vadd.f32 %v5858_v21, %v2829_v37  ;;  %v1571_v57 = vpop.f32.mrb[30].mxu1  ;;  %v3337_v43 = vmax.f32 %v3273_v24, %v3115_v38  ;;  %v3084_v25 = vmax.f32 %v3020_v18, %v3052_v45 }
 0x252   : > { %v2830_v9 = vmul.f32 %v3853_v55, %v5853_v62  ;;  %3560 = vst.msk [vmem:[%s5883_s22 + $0x38] sm:$0xff] %vm2919_vm2, %v3528_v11  ;;  %v3274_v29 = vmax.f32 %v3210_v41, %v3052_v45  ;;  %v3465_v3 = vmax.f32 %v3401_v26, %v3052_v45  ;;  %v1573_v8 = vpop.f32.mrb[31].mxu1 }
 0x253   : > { %v2693_v5 = vpop.f32.mrb[30].mxu0  ;;  %v3021_v33 = vld [vmem:[#allocation2 + $0x98] sm:$0xff]  ;;  %v2900_v16 = vmax.f32 %v2868_v12, 0.0 }
 0x254   : > { %v3116_v49 = vld [vmem:[#allocation2 + $0x92] sm:$0xff]  ;;  %v2869_v40 = vadd.f32 %v5858_v21, %v2830_v9  ;;  %v3854_v47 = vadd.f32 %v2693_v5, %v1571_v57  ;;  %v2695_v59 = vpop.f32.mrb[31].mxu0  ;;  %v3211_v56 = vmax.f32 %v3147_v4, %v3021_v33  ;;  %v3402_v60 = vmax.f32 %v3337_v43, %v3021_v33  ;;  %v3117_v52 = vld [vmem:[#allocation2 + $0x9a] sm:$0xff] }
 0x255   : > { %v3053_v35 = vld [vmem:[#allocation2 + $0x99] sm:$0xff]  ;;  %v3529_v48 = vmax.f32 %v3465_v3, %v3116_v49  ;;  %2989 = vst.msk [vmem:[#allocation2 + $0xb1] sm:$0xff] %vm2919_vm2, %v2900_v16  ;;  %v1580_v42 = vpop.f32.mrb[32].mxu1  ;;  %v3148_v17 = vmax.f32 %v3084_v25, %v3116_v49  ;;  %v3338_v53 = vmax.f32 %v3274_v29, %v3116_v49 }
 0x256   : > { %v2901_v13 = vmax.f32 %v2869_v40, 0.0  ;;  %v2831_v23 = vmul.f32 %v3854_v47, %v5853_v62  ;;  %v1582_v44 = vpop.f32.mrb[33].mxu1  ;;  %v3085_v51 = vmax.f32 %v3021_v33, %v3053_v35  ;;  %v3466_v7 = vmax.f32 %v3402_v60, %v3053_v35 }
 0x257   : > { %v2700_v1 = vpop.f32.mrb[32].mxu0  ;;  %3561 = vst.msk [vmem:[%s5883_s22 + $0x40] sm:$0xff] %vm2919_vm2, %v3529_v48  ;;  %v3275_v61 = vmax.f32 %v3211_v56, %v3053_v35 }
 0x258   : > { %v3022_v50 = vld [vmem:[#allocation2 + $0xa8] sm:$0xff]  ;;  %2990 = vst.msk [vmem:[#allocation2 + $0xc1] sm:$0xff] %vm2919_vm2, %v2901_v13  ;;  %v2870_v58 = vadd.f32 %v5858_v21, %v2831_v23  ;;  %v3855_v0 = vadd.f32 %v2700_v1, %v1580_v42  ;;  %v2702_v6 = vpop.f32.mrb[33].mxu0  ;;  %v3530_v39 = vmax.f32 %v3466_v7, %v3117_v52  ;;  %v3149_v54 = vmax.f32 %v3085_v51, %v3117_v52 }
 0x259   : > { %v3054_v32 = vld [vmem:[#allocation2 + $0xa9] sm:$0xff]  ;;  %v3212_v15 = vmax.f32 %v3148_v17, %v3022_v50  ;;  %v3403_v20 = vmax.f32 %v3338_v53, %v3022_v50  ;;  %v1589_v28 = vpop.f32.mrb[34].mxu1  ;;  %v3339_v19 = vmax.f32 %v3275_v61, %v3117_v52 }
 0x25a   : > { %v2902_v63 = vmax.f32 %v2870_v58, 0.0  ;;  %v2832_v30 = vmul.f32 %v3855_v0, %v5853_v62  ;;  %v1591_v27 = vpop.f32.mrb[35].mxu1  ;;  %3562 = vst.msk [vmem:[%s5883_s22 + $0x48] sm:$0xff] %vm2919_vm2, %v3530_v39  ;;  %v3086_v22 = vmax.f32 %v3022_v50, %v3054_v32 }
 0x25b   : > { %v3276_v31 = vmax.f32 %v3212_v15, %v3054_v32  ;;  %v3467_v34 = vmax.f32 %v3403_v20, %v3054_v32  ;;  %v2707_v14 = vpop.f32.mrb[34].mxu0 }
 0x25c   : > { %2991 = vst.msk [vmem:[#allocation2 + $0xc9] sm:$0xff] %vm2919_vm2, %v2902_v63  ;;  %v2871_v36 = vadd.f32 %v5858_v21, %v2832_v30  ;;  %v3856_v46 = vadd.f32 %v2707_v14, %v1589_v28  ;;  %v2709_v37 = vpop.f32.mrb[35].mxu0  ;;  %v3023_v10 = vld [vmem:[#allocation2 + $0xb0] sm:$0xff] }
 0x25d   : > { %v3055_v38 = vld [vmem:[#allocation2 + $0xb1] sm:$0xff]  ;;  %v3213_v2 = vmax.f32 %v3149_v54, %v3023_v10  ;;  %v1598_v41 = vpop.f32.mrb[36].mxu1  ;;  %v3404_v26 = vmax.f32 %v3339_v19, %v3023_v10 }
 0x25e   : > { %v3118_v24 = vld [vmem:[#allocation2 + $0xaa] sm:$0xff]  ;;  %v3087_v18 = vmax.f32 %v3023_v10, %v3055_v38  ;;  %v2903_v9 = vmax.f32 %v2871_v36, 0.0  ;;  %v2833_v57 = vmul.f32 %v3856_v46, %v5853_v62  ;;  %v1600_v29 = vpop.f32.mrb[37].mxu1  ;;  %v3119_v43 = vld [vmem:[#allocation2 + $0xb2] sm:$0xff] }
 0x25f   : > { %v3150_v55 = vmax.f32 %v3086_v22, %v3118_v24  ;;  %v3340_v11 = vmax.f32 %v3276_v31, %v3118_v24  ;;  %v3531_v45 = vmax.f32 %v3467_v34, %v3118_v24  ;;  %v3024_v12 = vld [vmem:[#allocation2 + $0xc0] sm:$0xff]  ;;  %v2714_v4 = vpop.f32.mrb[36].mxu0  ;;  %v3277_v3 = vmax.f32 %v3213_v2, %v3055_v38 }
 0x260   : > { %v2716_v8 = vpop.f32.mrb[37].mxu0  ;;  %v3468_v33 = vmax.f32 %v3404_v26, %v3055_v38  ;;  %v3056_v49 = vld [vmem:[#allocation2 + $0xc1] sm:$0xff]  ;;  %2992 = vst.msk [vmem:[#allocation2 + $0xd9] sm:$0xff] %vm2919_vm2, %v2903_v9  ;;  %v2872_v40 = vadd.f32 %v5858_v21, %v2833_v57  ;;  %v3857_v47 = vadd.f32 %v2714_v4, %v1598_v41  ;;  %v3151_v59 = vmax.f32 %v3087_v18, %v3119_v43 }
 0x261   : > { %v3214_v5 = vmax.f32 %v3150_v55, %v3024_v12  ;;  %3563 = vst.msk [vmem:[%s5883_s22 + $0x50] sm:$0xff] %vm2919_vm2, %v3531_v45  ;;  %v3405_v16 = vmax.f32 %v3340_v11, %v3024_v12  ;;  %v3341_v25 = vmax.f32 %v3277_v3, %v3119_v43  ;;  %v1607_v56 = vpop.f32.mrb[38].mxu1  ;;  %v3088_v51 = vmax.f32 %v3024_v12, %v3056_v49 }
 0x262   : > { %v3532_v60 = vmax.f32 %v3468_v33, %v3119_v43  ;;  %v2904_v17 = vmax.f32 %v2872_v40, 0.0  ;;  %v2834_v53 = vmul.f32 %v3857_v47, %v5853_v62  ;;  %v1609_v44 = vpop.f32.mrb[39].mxu1 }
 0x263   : > { %v3278_v35 = vmax.f32 %v3214_v5, %v3056_v49  ;;  %v3469_v48 = vmax.f32 %v3405_v16, %v3056_v49  ;;  %v3025_v13 = vld [vmem:[#allocation2 + $0xc8] sm:$0xff]  ;;  %v2721_v1 = vpop.f32.mrb[38].mxu0 }
 0x264   : > { %v3057_v23 = vld [vmem:[#allocation2 + $0xc9] sm:$0xff]  ;;  %v3215_v7 = vmax.f32 %v3151_v59, %v3025_v13  ;;  %v2723_v50 = vpop.f32.mrb[39].mxu0  ;;  %3564 = vst.msk [vmem:[%s5883_s22 + $0x58] sm:$0xff] %vm2919_vm2, %v3532_v60  ;;  %v3406_v58 = vmax.f32 %v3341_v25, %v3025_v13  ;;  %2993 = vst.msk [vmem:[#allocation2 + $0xe1] sm:$0xff] %vm2919_vm2, %v2904_v17  ;;  %v2873_v6 = vadd.f32 %v5858_v21, %v2834_v53 }
 0x265   : > { %v3120_v42 = vld [vmem:[#allocation2 + $0xc2] sm:$0xff]  ;;  %v3858_v52 = vadd.f32 %v2721_v1, %v1607_v56  ;;  %v3089_v61 = vmax.f32 %v3025_v13, %v3057_v23  ;;  %v1616_v15 = vpop.f32.mrb[40].mxu1  ;;  %v3121_v34 = vld [vmem:[#allocation2 + $0xca] sm:$0xff] }
 0x266   : > { %v3533_v0 = vmax.f32 %v3469_v48, %v3120_v42  ;;  %v3152_v32 = vmax.f32 %v3088_v51, %v3120_v42  ;;  %v3342_v20 = vmax.f32 %v3278_v35, %v3120_v42  ;;  %v3470_v39 = vmax.f32 %v3406_v58, %v3057_v23  ;;  %v1618_v31 = vpop.f32.mrb[41].mxu1 }
 0x267   : > { %v2905_v63 = vmax.f32 %v2873_v6, 0.0  ;;  %v2835_v30 = vmul.f32 %v3858_v52, %v5853_v62  ;;  %v2728_v28 = vpop.f32.mrb[40].mxu0  ;;  %v3279_v14 = vmax.f32 %v3215_v7, %v3057_v23  ;;  %v3026_v27 = vld [vmem:[#allocation2 + $0xd8] sm:$0xff]  ;;  %v3153_v18 = vmax.f32 %v3089_v61, %v3121_v34 }
 0x268   : > { %3565 = vst.msk [vmem:[%s5883_s22 + $0x60] sm:$0xff] %vm2919_vm2, %v3533_v0  ;;  %v3859_v54 = vadd.f32 %v2728_v28, %v1616_v15  ;;  %v2730_v22 = vpop.f32.mrb[41].mxu0  ;;  %v3534_v36 = vmax.f32 %v3470_v39, %v3121_v34  ;;  %v3216_v46 = vmax.f32 %v3152_v32, %v3026_v27  ;;  %v3407_v37 = vmax.f32 %v3342_v20, %v3026_v27  ;;  %v3058_v19 = vld [vmem:[#allocation2 + $0xd9] sm:$0xff] }
 0x269   : > { %2994 = vst.msk [vmem:[#allocation2 + $0xf1] sm:$0xff] %vm2919_vm2, %v2905_v63  ;;  %v2874_v10 = vadd.f32 %v5858_v21, %v2835_v30  ;;  %v1625_v24 = vpop.f32.mrb[42].mxu1  ;;  %v3343_v26 = vmax.f32 %v3279_v14, %v3121_v34  ;;  %v3090_v3 = vmax.f32 %v3026_v27, %v3058_v19 }
 0x26a   : > { %v2836_v38 = vmul.f32 %v3859_v54, %v5853_v62  ;;  %3566 = vst.msk [vmem:[%s5883_s22 + $0x68] sm:$0xff] %vm2919_vm2, %v3534_v36  ;;  %v3280_v55 = vmax.f32 %v3216_v46, %v3058_v19  ;;  %v3471_v2 = vmax.f32 %v3407_v37, %v3058_v19  ;;  %v1627_v41 = vpop.f32.mrb[43].mxu1 }
 0x26b   : > { %v2735_v11 = vpop.f32.mrb[42].mxu0  ;;  %v3027_v45 = vld [vmem:[#allocation2 + $0xe0] sm:$0xff]  ;;  %v2906_v9 = vmax.f32 %v2874_v10, 0.0 }
 0x26c   : > { %v3122_v12 = vld [vmem:[#allocation2 + $0xda] sm:$0xff]  ;;  %v2875_v57 = vadd.f32 %v5858_v21, %v2836_v38  ;;  %v3860_v4 = vadd.f32 %v2735_v11, %v1625_v24  ;;  %v2737_v29 = vpop.f32.mrb[43].mxu0  ;;  %v3217_v8 = vmax.f32 %v3153_v18, %v3027_v45  ;;  %v3408_v43 = vmax.f32 %v3343_v26, %v3027_v45  ;;  %v3123_v17 = vld [vmem:[#allocation2 + $0xe2] sm:$0xff] }
 0x26d   : > { %v3059_v5 = vld [vmem:[#allocation2 + $0xe1] sm:$0xff]  ;;  %v3535_v33 = vmax.f32 %v3471_v2, %v3122_v12  ;;  %2995 = vst.msk [vmem:[#allocation2 + $0xf9] sm:$0xff] %vm2919_vm2, %v2906_v9  ;;  %v1634_v40 = vpop.f32.mrb[44].mxu1  ;;  %v3154_v47 = vmax.f32 %v3090_v3, %v3122_v12  ;;  %v3344_v59 = vmax.f32 %v3280_v55, %v3122_v12 }
 0x26e   : > { %v2907_v49 = vmax.f32 %v2875_v57, 0.0  ;;  %v2837_v16 = vmul.f32 %v3860_v4, %v5853_v62  ;;  %v1636_v35 = vpop.f32.mrb[45].mxu1  ;;  %v3091_v56 = vmax.f32 %v3027_v45, %v3059_v5  ;;  %v3472_v60 = vmax.f32 %v3408_v43, %v3059_v5 }
 0x26f   : > { %v2742_v25 = vpop.f32.mrb[44].mxu0  ;;  %3567 = vst.msk [vmem:[%s5883_s22 + $0x70] sm:$0xff] %vm2919_vm2, %v3535_v33  ;;  %v3281_v53 = vmax.f32 %v3217_v8, %v3059_v5 }
 0x270   : > { %v3028_v48 = vld [vmem:[#allocation2 + $0xf0] sm:$0xff]  ;;  %2996 = vst.msk [vmem:[#allocation2 + $0x109] sm:$0xff] %vm2919_vm2, %v2907_v49  ;;  %v2876_v13 = vadd.f32 %v5858_v21, %v2837_v16  ;;  %v3861_v23 = vadd.f32 %v2742_v25, %v1634_v40  ;;  %v2744_v42 = vpop.f32.mrb[45].mxu0  ;;  %v3536_v7 = vmax.f32 %v3472_v60, %v3123_v17  ;;  %v3155_v15 = vmax.f32 %v3091_v56, %v3123_v17 }
 0x271   : > { %v3060_v1 = vld [vmem:[#allocation2 + $0xf1] sm:$0xff]  ;;  %v3218_v44 = vmax.f32 %v3154_v47, %v3028_v48  ;;  %v3409_v51 = vmax.f32 %v3344_v59, %v3028_v48  ;;  %v1643_v0 = vpop.f32.mrb[46].mxu1  ;;  %v3345_v28 = vmax.f32 %v3281_v53, %v3123_v17 }
 0x272   : > { %v2908_v50 = vmax.f32 %v2876_v13, 0.0  ;;  %v2838_v58 = vmul.f32 %v3861_v23, %v5853_v62  ;;  %v1645_v32 = vpop.f32.mrb[47].mxu1  ;;  %3568 = vst.msk [vmem:[%s5883_s22 + $0x78] sm:$0xff] %vm2919_vm2, %v3536_v7  ;;  %v3092_v20 = vmax.f32 %v3028_v48, %v3060_v1 }
 0x273   : > { %v3282_v6 = vmax.f32 %v3218_v44, %v3060_v1  ;;  %v3473_v52 = vmax.f32 %v3409_v51, %v3060_v1  ;;  %v2749_v61 = vpop.f32.mrb[46].mxu0 }
 0x274   : > { %2997 = vst.msk [vmem:[#allocation2 + $0x111] sm:$0xff] %vm2919_vm2, %v2908_v50  ;;  %v2877_v39 = vadd.f32 %v5858_v21, %v2838_v58  ;;  %v3862_v63 = vadd.f32 %v2749_v61, %v1643_v0  ;;  %v2751_v30 = vpop.f32.mrb[47].mxu0  ;;  %v3029_v31 = vld [vmem:[#allocation2 + $0xf8] sm:$0xff] }
 0x275   : > { %v3061_v34 = vld [vmem:[#allocation2 + $0xf9] sm:$0xff]  ;;  %v3219_v22 = vmax.f32 %v3155_v15, %v3029_v31  ;;  %v1652_v46 = vpop.f32.mrb[48].mxu1  ;;  %v3410_v37 = vmax.f32 %v3345_v28, %v3029_v31 }
 0x276   : > { %v3124_v14 = vld [vmem:[#allocation2 + $0xf2] sm:$0xff]  ;;  %v3093_v27 = vmax.f32 %v3029_v31, %v3061_v34  ;;  %v2909_v38 = vmax.f32 %v2877_v39, 0.0  ;;  %v2839_v24 = vmul.f32 %v3862_v63, %v5853_v62  ;;  %v1654_v55 = vpop.f32.mrb[49].mxu1  ;;  %v3125_v26 = vld [vmem:[#allocation2 + $0xfa] sm:$0xff] }
 0x277   : > { %v3156_v54 = vmax.f32 %v3092_v20, %v3124_v14  ;;  %v3346_v36 = vmax.f32 %v3282_v6, %v3124_v14  ;;  %v3537_v19 = vmax.f32 %v3473_v52, %v3124_v14  ;;  %v3030_v10 = vld [vmem:[#allocation2 + $0x108] sm:$0xff]  ;;  %v2756_v18 = vpop.f32.mrb[48].mxu0  ;;  %v3283_v2 = vmax.f32 %v3219_v22, %v3061_v34 }
 0x278   : > { %v2758_v41 = vpop.f32.mrb[49].mxu0  ;;  %v3474_v45 = vmax.f32 %v3410_v37, %v3061_v34  ;;  %v3062_v12 = vld [vmem:[#allocation2 + $0x109] sm:$0xff]  ;;  %2998 = vst.msk [vmem:[#allocation2 + $0x121] sm:$0xff] %vm2919_vm2, %v2909_v38  ;;  %v2878_v57 = vadd.f32 %v5858_v21, %v2839_v24  ;;  %v3863_v4 = vadd.f32 %v2756_v18, %v1652_v46  ;;  %v3157_v29 = vmax.f32 %v3093_v27, %v3125_v26  ;;  %v5986_v24 = vld [vmem:[%s6090_s3] ss:$0 sm:$0xff] }
 0x279   : > { %v3220_v11 = vmax.f32 %v3156_v54, %v3030_v10  ;;  %3569 = vst.msk [vmem:[%s5883_s22 + $0x80] sm:$0xff] %vm2919_vm2, %v3537_v19  ;;  %v3411_v9 = vmax.f32 %v3346_v36, %v3030_v10  ;;  %v3347_v3 = vmax.f32 %v3283_v2, %v3125_v26  ;;  %v1661_v8 = vpop.f32.mrb[50].mxu1  ;;  %v3094_v56 = vmax.f32 %v3030_v10, %v3062_v12 }
 0x27a   : > { %v3538_v43 = vmax.f32 %v3474_v45, %v3125_v26  ;;  %v2910_v47 = vmax.f32 %v2878_v57, 0.0  ;;  %v2840_v59 = vmul.f32 %v3863_v4, %v5853_v62  ;;  %v1663_v35 = vpop.f32.mrb[51].mxu1 }
 0x27b   : > { %v3284_v5 = vmax.f32 %v3220_v11, %v3062_v12  ;;  %v3475_v33 = vmax.f32 %v3411_v9, %v3062_v12  ;;  %v3031_v49 = vld [vmem:[#allocation2 + $0x110] sm:$0xff]  ;;  %v2763_v25 = vpop.f32.mrb[50].mxu0  ;;  %v5993_v12 = vld [vmem:[%s6089_s2] ss:$0 sm:$0xff] }
 0x27c   : > { %v3063_v16 = vld [vmem:[#allocation2 + $0x111] sm:$0xff]  ;;  %v3221_v60 = vmax.f32 %v3157_v29, %v3031_v49  ;;  %v2765_v48 = vpop.f32.mrb[51].mxu0  ;;  %3570 = vst.msk [vmem:[%s5883_s22 + $0x88] sm:$0xff] %vm2919_vm2, %v3538_v43  ;;  %v3412_v13 = vmax.f32 %v3347_v3, %v3031_v49  ;;  %2999 = vst.msk [vmem:[#allocation2 + $0x129] sm:$0xff] %vm2919_vm2, %v2910_v47  ;;  %v2879_v42 = vadd.f32 %v5858_v21, %v2840_v59 }
 0x27d   : > { %v3126_v40 = vld [vmem:[#allocation2 + $0x10a] sm:$0xff]  ;;  %v3864_v17 = vadd.f32 %v2763_v25, %v1661_v8  ;;  %v3095_v53 = vmax.f32 %v3031_v49, %v3063_v16  ;;  %v1670_v44 = vpop.f32.mrb[52].mxu1  ;;  %v3127_v52 = vld [vmem:[#allocation2 + $0x112] sm:$0xff] }
 0x27e   : > { %v3539_v23 = vmax.f32 %v3475_v33, %v3126_v40  ;;  %v3158_v1 = vmax.f32 %v3094_v56, %v3126_v40  ;;  %v3348_v51 = vmax.f32 %v3284_v5, %v3126_v40  ;;  %v3476_v7 = vmax.f32 %v3412_v13, %v3063_v16  ;;  %v1672_v6 = vpop.f32.mrb[53].mxu1 }
 0x27f   : > { %v2911_v50 = vmax.f32 %v2879_v42, 0.0  ;;  %v2841_v58 = vmul.f32 %v3864_v17, %v5853_v62  ;;  %v2770_v0 = vpop.f32.mrb[52].mxu0  ;;  %v3285_v61 = vmax.f32 %v3221_v60, %v3063_v16  ;;  %v3032_v32 = vld [vmem:[#allocation2 + $0x120] sm:$0xff]  ;;  %v3159_v27 = vmax.f32 %v3095_v53, %v3127_v52 }
 0x280   : > { %3571 = vst.msk [vmem:[%s5883_s22 + $0x90] sm:$0xff] %vm2919_vm2, %v3539_v23  ;;  %v3865_v15 = vadd.f32 %v2770_v0, %v1670_v44  ;;  %v2772_v20 = vpop.f32.mrb[53].mxu0  ;;  %v3540_v39 = vmax.f32 %v3476_v7, %v3127_v52  ;;  %v3222_v63 = vmax.f32 %v3158_v1, %v3032_v32  ;;  %v3413_v30 = vmax.f32 %v3348_v51, %v3032_v32  ;;  %v3064_v28 = vld [vmem:[#allocation2 + $0x121] sm:$0xff] }
 0x281   : > { %3000 = vst.msk [vmem:[#allocation2 + $0x139] sm:$0xff] %vm2919_vm2, %v2911_v50  ;;  %v2880_v31 = vadd.f32 %v5858_v21, %v2841_v58  ;;  %v1679_v14 = vpop.f32.mrb[54].mxu1  ;;  %v3349_v37 = vmax.f32 %v3285_v61, %v3127_v52  ;;  %v3096_v55 = vmax.f32 %v3032_v32, %v3064_v28 }
 0x282   : > { %v2842_v34 = vmul.f32 %v3865_v15, %v5853_v62  ;;  %3572 = vst.msk [vmem:[%s5883_s22 + $0x98] sm:$0xff] %vm2919_vm2, %v3540_v39  ;;  %v3286_v54 = vmax.f32 %v3222_v63, %v3064_v28  ;;  %v3477_v22 = vmax.f32 %v3413_v30, %v3064_v28  ;;  %v1681_v46 = vpop.f32.mrb[55].mxu1 }
 0x283   : > { %v2777_v36 = vpop.f32.mrb[54].mxu0  ;;  %v3033_v19 = vld [vmem:[#allocation2 + $0x128] sm:$0xff]  ;;  %v2912_v38 = vmax.f32 %v2880_v31, 0.0 }
 0x284   : > { %v3128_v10 = vld [vmem:[#allocation2 + $0x122] sm:$0xff]  ;;  %v2881_v21 = vadd.f32 %v5986_v24, %v2842_v34  ;;  %v3866_v62 = vadd.f32 %v2777_v36, %v1679_v14  ;;  %v2779_v18 = vpop.f32.mrb[55].mxu0  ;;  %v3223_v11 = vmax.f32 %v3159_v27, %v3033_v19  ;;  %v3414_v41 = vmax.f32 %v3349_v37, %v3033_v19  ;;  %v3129_v47 = vld [vmem:[#allocation2 + $0x12a] sm:$0xff] }
 0x285   : > { %v3065_v2 = vld [vmem:[#allocation2 + $0x129] sm:$0xff]  ;;  %v3541_v26 = vmax.f32 %v3477_v22, %v3128_v10  ;;  %3001 = vst.msk [vmem:[#allocation2 + $0x141] sm:$0xff] %vm2919_vm2, %v2912_v38  ;;  %v1688_v57 = vpop.f32.mrb[56].mxu1  ;;  %v3160_v4 = vmax.f32 %v3096_v55, %v3128_v10  ;;  %v3350_v29 = vmax.f32 %v3286_v54, %v3128_v10 }
 0x286   : > { %v2913_v45 = vmax.f32 %v2881_v21, 0.0  ;;  %v2843_v9 = vmul.f32 %v5993_v12, %v3866_v62  ;;  %v1690_v5 = vpop.f32.mrb[57].mxu1  ;;  %v3097_v8 = vmax.f32 %v3033_v19, %v3065_v2  ;;  %v3478_v43 = vmax.f32 %v3414_v41, %v3065_v2 }
 0x287   : > { %v2784_v3 = vpop.f32.mrb[56].mxu0  ;;  %3573 = vst.msk [vmem:[%s5883_s22 + $0xa0] sm:$0xff] %vm2919_vm2, %v3541_v26  ;;  %v3287_v59 = vmax.f32 %v3223_v11, %v3065_v2 }
 0x288   : > { %v3034_v33 = vld [vmem:[#allocation2 + $0x138] sm:$0xff]  ;;  %3002 = vst.msk [vmem:[#allocation2 + $0x151] sm:$0xff] %vm2919_vm2, %v2913_v45  ;;  %v2882_v49 = vadd.f32 %v5986_v24, %v2843_v9  ;;  %v3867_v16 = vadd.f32 %v2784_v3, %v1688_v57  ;;  %v2786_v40 = vpop.f32.mrb[57].mxu0  ;;  %v3542_v60 = vmax.f32 %v3478_v43, %v3129_v47  ;;  %v3161_v44 = vmax.f32 %v3097_v8, %v3129_v47 }
 0x289   : > { %v3066_v25 = vld [vmem:[#allocation2 + $0x139] sm:$0xff]  ;;  %v3224_v35 = vmax.f32 %v3160_v4, %v3034_v33  ;;  %v3415_v56 = vmax.f32 %v3350_v29, %v3034_v33  ;;  %v1697_v23 = vpop.f32.mrb[58].mxu1  ;;  %v3351_v0 = vmax.f32 %v3287_v59, %v3129_v47 }
 0x28a   : > { %v2914_v48 = vmax.f32 %v2882_v49, 0.0  ;;  %v2844_v13 = vmul.f32 %v5993_v12, %v3867_v16  ;;  %v1699_v1 = vpop.f32.mrb[59].mxu1  ;;  %3574 = vst.msk [vmem:[%s5883_s22 + $0xa8] sm:$0xff] %vm2919_vm2, %v3542_v60  ;;  %v3098_v51 = vmax.f32 %v3034_v33, %v3066_v25 }
 0x28b   : > { %v3288_v42 = vmax.f32 %v3224_v35, %v3066_v25  ;;  %v3479_v17 = vmax.f32 %v3415_v56, %v3066_v25  ;;  %v2791_v53 = vpop.f32.mrb[58].mxu0 }
 0x28c   : > { %3003 = vst.msk [vmem:[#allocation2 + $0x159] sm:$0xff] %vm2919_vm2, %v2914_v48  ;;  %v2883_v7 = vadd.f32 %v5986_v24, %v2844_v13  ;;  %v3868_v50 = vadd.f32 %v2791_v53, %v1697_v23  ;;  %v2793_v58 = vpop.f32.mrb[59].mxu0  ;;  %v3035_v6 = vld [vmem:[#allocation2 + $0x140] sm:$0xff] }
 0x28d   : > { %v3067_v52 = vld [vmem:[#allocation2 + $0x141] sm:$0xff]  ;;  %v3225_v20 = vmax.f32 %v3161_v44, %v3035_v6  ;;  %v1706_v63 = vpop.f32.mrb[60].mxu1  ;;  %v3416_v30 = vmax.f32 %v3351_v0, %v3035_v6 }
 0x28e   : > { %v3130_v61 = vld [vmem:[#allocation2 + $0x13a] sm:$0xff]  ;;  %v3099_v32 = vmax.f32 %v3035_v6, %v3067_v52  ;;  %v2915_v34 = vmax.f32 %v2883_v7, 0.0  ;;  %v2845_v14 = vmul.f32 %v5993_v12, %v3868_v50  ;;  %v1708_v54 = vpop.f32.mrb[61].mxu1  ;;  %v3131_v37 = vld [vmem:[#allocation2 + $0x142] sm:$0xff] }
 0x28f   : > { %v3162_v15 = vmax.f32 %v3098_v51, %v3130_v61  ;;  %v3352_v39 = vmax.f32 %v3288_v42, %v3130_v61  ;;  %v3543_v28 = vmax.f32 %v3479_v17, %v3130_v61  ;;  %v3036_v31 = vld [vmem:[#allocation2 + $0x150] sm:$0xff]  ;;  %v2798_v27 = vpop.f32.mrb[60].mxu0  ;;  %v3289_v22 = vmax.f32 %v3225_v20, %v3067_v52 }
 0x290   : > { %v2800_v46 = vpop.f32.mrb[61].mxu0  ;;  %v3480_v19 = vmax.f32 %v3416_v30, %v3067_v52  ;;  %v3068_v10 = vld [vmem:[#allocation2 + $0x151] sm:$0xff]  ;;  %3004 = vst.msk [vmem:[#allocation2 + $0x169] sm:$0xff] %vm2919_vm2, %v2915_v34  ;;  %v2884_v21 = vadd.f32 %v5986_v24, %v2845_v14  ;;  %v3869_v62 = vadd.f32 %v2798_v27, %v1706_v63  ;;  %v3163_v18 = vmax.f32 %v3099_v32, %v3131_v37 }
 0x291   : > { %v3226_v36 = vmax.f32 %v3162_v15, %v3036_v31  ;;  %3575 = vst.msk [vmem:[%s5883_s22 + $0xb0] sm:$0xff] %vm2919_vm2, %v3543_v28  ;;  %v3417_v38 = vmax.f32 %v3352_v39, %v3036_v31  ;;  %v3353_v55 = vmax.f32 %v3289_v22, %v3131_v37  ;;  %v1715_v11 = vpop.f32.mrb[62].mxu1  ;;  %v3100_v8 = vmax.f32 %v3036_v31, %v3068_v10 }
 0x292   : > { %v3544_v41 = vmax.f32 %v3480_v19, %v3131_v37  ;;  %v2916_v4 = vmax.f32 %v2884_v21, 0.0  ;;  %v2846_v29 = vmul.f32 %v5993_v12, %v3869_v62  ;;  %v1717_v5 = vpop.f32.mrb[63].mxu1  ;;  %v3391_v62 = vld [vmem:[#allocation2 + $0x198] sm:$0xff] }
 0x293   : > { %v3290_v2 = vmax.f32 %v3226_v36, %v3068_v10  ;;  %v3481_v26 = vmax.f32 %v3417_v38, %v3068_v10  ;;  %v3037_v45 = vld [vmem:[#allocation2 + $0x158] sm:$0xff]  ;;  %v2805_v3 = vpop.f32.mrb[62].mxu0 }
 0x294   : > { %v3069_v9 = vld [vmem:[#allocation2 + $0x159] sm:$0xff]  ;;  %v3227_v43 = vmax.f32 %v3163_v18, %v3037_v45  ;;  %v2807_v33 = vpop.f32.mrb[63].mxu0  ;;  %3576 = vst.msk [vmem:[%s5883_s22 + $0xb8] sm:$0xff] %vm2919_vm2, %v3544_v41  ;;  %v3418_v49 = vmax.f32 %v3353_v55, %v3037_v45  ;;  %3005 = vst.msk [vmem:[#allocation2 + $0x171] sm:$0xff] %vm2919_vm2, %v2916_v4  ;;  %v2885_v40 = vadd.f32 %v5986_v24, %v2846_v29 }
 0x295   : > { %v3132_v57 = vld [vmem:[#allocation2 + $0x152] sm:$0xff]  ;;  %v3870_v47 = vadd.f32 %v2805_v3, %v1715_v11  ;;  %v3101_v59 = vmax.f32 %v3037_v45, %v3069_v9  ;;  %v3133_v13 = vld [vmem:[#allocation2 + $0x15a] sm:$0xff] }
 0x296   : > { %v3545_v16 = vmax.f32 %v3481_v26, %v3132_v57  ;;  %v3164_v25 = vmax.f32 %v3100_v8, %v3132_v57  ;;  %v3354_v35 = vmax.f32 %v3290_v2, %v3132_v57  ;;  %v3482_v56 = vmax.f32 %v3418_v49, %v3069_v9  ;;  %v3455_v26 = vld [vmem:[#allocation2 + $0x199] sm:$0xff]  ;;  %v3456_v33 = vld [vmem:[#allocation2 + $0x1a1] sm:$0xff] }
 0x297   : > { %v2917_v60 = vmax.f32 %v2885_v40, 0.0  ;;  %v2847_v48 = vmul.f32 %v5993_v12, %v3870_v47  ;;  %v3291_v23 = vmax.f32 %v3227_v43, %v3069_v9  ;;  %v3038_v42 = vld [vmem:[#allocation2 + $0x168] sm:$0xff]  ;;  %v3165_v7 = vmax.f32 %v3101_v59, %v3133_v13  ;;  %v3392_v29 = vld [vmem:[#allocation2 + $0x1a0] sm:$0xff] }
 0x298   : > { %3577 = vst.msk [vmem:[%s5883_s22 + $0xc0] sm:$0xff] %vm2919_vm2, %v3545_v16  ;;  %v3546_v17 = vmax.f32 %v3482_v56, %v3133_v13  ;;  %v3228_v53 = vmax.f32 %v3164_v25, %v3038_v42  ;;  %v3419_v1 = vmax.f32 %v3354_v35, %v3038_v42  ;;  %v3070_v44 = vld [vmem:[#allocation2 + $0x169] sm:$0xff]  ;;  %v3519_v3 = vld [vmem:[#allocation2 + $0x19a] sm:$0xff] }
 0x299   : > { %3006 = vst.msk [vmem:[#allocation2 + $0x181] sm:$0xff] %vm2919_vm2, %v2917_v60  ;;  %v2886_v51 = vadd.f32 %v5986_v24, %v2847_v48  ;;  %v3355_v0 = vmax.f32 %v3291_v23, %v3133_v13  ;;  %v3102_v61 = vmax.f32 %v3038_v42, %v3070_v44  ;;  %v3520_v40 = vld [vmem:[#allocation2 + $0x1a2] sm:$0xff] }
 0x29a   : > { %3578 = vst.msk [vmem:[%s5883_s22 + $0xc8] sm:$0xff] %vm2919_vm2, %v3546_v17  ;;  %v3292_v50 = vmax.f32 %v3228_v53, %v3070_v44  ;;  %v3483_v58 = vmax.f32 %v3419_v1, %v3070_v44 }
 0x29b   : > { %v3039_v6 = vld [vmem:[#allocation2 + $0x170] sm:$0xff]  ;;  %v2918_v52 = vmax.f32 %v2886_v51, 0.0 }
 0x29c   : > { %v3134_v12 = vld [vmem:[#allocation2 + $0x16a] sm:$0xff]  ;;  %v3229_v15 = vmax.f32 %v3165_v7, %v3039_v6  ;;  %v3420_v20 = vmax.f32 %v3355_v0, %v3039_v6  ;;  %v3135_v14 = vld [vmem:[#allocation2 + $0x172] sm:$0xff] }
 0x29d   : > { %v3071_v32 = vld [vmem:[#allocation2 + $0x171] sm:$0xff]  ;;  %v3547_v39 = vmax.f32 %v3483_v58, %v3134_v12  ;;  %3007 = vst.msk [vmem:[#allocation2 + $0x189] sm:$0xff] %vm2919_vm2, %v2918_v52  ;;  %v3166_v63 = vmax.f32 %v3102_v61, %v3134_v12  ;;  %v3356_v24 = vmax.f32 %v3292_v50, %v3134_v12 }
 0x29e   : > { %v3103_v30 = vmax.f32 %v3039_v6, %v3071_v32  ;;  %v3293_v28 = vmax.f32 %v3229_v15, %v3071_v32  ;;  %v3484_v31 = vmax.f32 %v3420_v20, %v3071_v32 }
 0x29f   : > { %3579 = vst.msk [vmem:[%s5883_s22 + $0xd0] sm:$0xff] %vm2919_vm2, %v3547_v39 }
 0x2a0   : > { %v3198_v34 = vld [vmem:[#allocation2 + $0x180] sm:$0xff]  ;;  %v3548_v22 = vmax.f32 %v3484_v31, %v3135_v14  ;;  %v3167_v19 = vmax.f32 %v3103_v30, %v3135_v14  ;;  %v3357_v10 = vmax.f32 %v3293_v28, %v3135_v14 }
 0x2a1   : > { %v3230_v27 = vmax.f32 %v3166_v63, %v3198_v34  ;;  %v3421_v54 = vmax.f32 %v3356_v24, %v3198_v34  ;;  %v3262_v36 = vld [vmem:[#allocation2 + $0x181] sm:$0xff] }
 0x2a2   : > { %3580 = vst.msk [vmem:[%s5883_s22 + $0xd8] sm:$0xff] %vm2919_vm2, %v3548_v22 }
 0x2a3   : > { %v3294_v46 = vmax.f32 %v3230_v27, %v3262_v36  ;;  %v3485_v37 = vmax.f32 %v3421_v54, %v3262_v36 }
 0x2a4   : > { %v3199_v38 = vld [vmem:[#allocation2 + $0x188] sm:$0xff] }
 0x2a5   : > { %v3326_v21 = vld [vmem:[#allocation2 + $0x182] sm:$0xff]  ;;  %v3231_v18 = vmax.f32 %v3167_v19, %v3199_v38  ;;  %v3422_v2 = vmax.f32 %v3357_v10, %v3199_v38  ;;  %v3327_v4 = vld [vmem:[#allocation2 + $0x18a] sm:$0xff] }
 0x2a6   : > { %v3358_v55 = vmax.f32 %v3294_v46, %v3326_v21  ;;  %v3549_v11 = vmax.f32 %v3485_v37, %v3326_v21  ;;  %v3263_v41 = vld [vmem:[#allocation2 + $0x189] sm:$0xff] }
 0x2a7   : > { %v3295_v45 = vmax.f32 %v3231_v18, %v3263_v41  ;;  %v3486_v57 = vmax.f32 %v3422_v2, %v3263_v41 }
 0x2a8   : > { %v3423_v9 = vmax.f32 %v3358_v55, %v3391_v62  ;;  %3581 = vst.msk [vmem:[%s5883_s22 + $0xe0] sm:$0xff] %vm2919_vm2, %v3549_v11 }
 0x2a9   : > { %v3359_v5 = vmax.f32 %v3295_v45, %v3327_v4  ;;  %v3550_v43 = vmax.f32 %v3486_v57, %v3327_v4 }
 0x2aa   : > { %v3487_v8 = vmax.f32 %v3423_v9, %v3455_v26 }
 0x2ab   : > { %v3424_v49 = vmax.f32 %v3359_v5, %v3392_v29  ;;  %3582 = vst.msk [vmem:[%s5883_s22 + $0xe8] sm:$0xff] %vm2919_vm2, %v3550_v43 }
 0x2ac   : > { %v3551_v16 = vmax.f32 %v3487_v8, %v3519_v3 }
 0x2ad   : > { %v3488_v47 = vmax.f32 %v3424_v49, %v3456_v33 }
 0x2ae   : > { %3583 = vst.msk [vmem:[%s5883_s22 + $0xf0] sm:$0xff] %vm2919_vm2, %v3551_v16 }
 0x2af   : > { %v3552_v59 = vmax.f32 %v3488_v47, %v3520_v40 }
 0x2b1   : > { %3584 = vst.msk [vmem:[%s5883_s22 + $0xf8] sm:$0xff] %vm2919_vm2, %v3552_v59 }
 0x2b2   : > { %4185 = shalt.err (!%p4182_p3)
}
 0x2b3   : > { %s4186_s13 = scalar_lea.hbm %s6038_s8, 4096  ;;  %s4190_s22 = scalar_lea.hbm %s6091_s4, 8192 }
 0x2b4   : > { %p4187_p4 = scmp.ne.s32.totalorder %s6038_s8, %s4186_s13  ;;  %p4191_p9 = scmp.lt.u32.totalorder %s6038_s8, %s6091_s4 }
 0x2b5   : > { %p4192_p10 = scmp.lt.u32.totalorder %s4190_s22, %s4186_s13  ;;  %p4194_p12 = scmp.lt.u32.totalorder %s4186_s13, %s6038_s8 }
 0x2b6   : > { %p4188_p7 = pnand %p4187_p4, %p4304_p5 }
 0x2b7   : > { %p4193_p11 = por %p4192_p10, %p4191_p9 }
 0x2b8   : > { %p4189_p8 = pneg %p4188_p7 }
 0x2b9   : > { %p4195_p13 = por %p4194_p12, %p4193_p11 }
 0x2bb   : > { %p4196_p0 = pnand %p4195_p13, %p4189_p8 }
 0x2bd   : > { %4199 = shalt.err (!%p4196_p0)
}
 0x2be   : > { %s4239_s28 = smov 128   ;;  %s4240_s29 = smov 8  }
 0x2bf   : > { %4127 = dma.vmem_to_hbm [thread:$0]  (%p4304_p5), %s6040_s5, 4096, %s6038_s8, %s6046_s19, %s4239_s28, %s4239_s28, %s4240_s29  }
 0x2c0 PF: > { %p4133_p1 = scmp.ge.s32.totalorder %s4234_s18, 2  ;;  %s3614_s30 = sand.u32 1, %s4222_s15  }
 0x2c1   : > { %s3615_s6 = scalar_lea.sflag [#allocation4], %s3614_s30 }
 0x2c2   : > { %p4130_p2 = pnand %p4133_p1, %p4308_p6 }
 0x2c4   : > { %4217 = dma.done.wait (!%p4130_p2), %s3615_s6, 4096  }
 0x2c5   : > { %4219 = vsyncadd (!%p4130_p2), %s3615_s6, 4294963200  ;;  %p14_p3 = scmp.ge.s32.totalorder %s4291_s21, 4   ;;  %s6642_s15 = smov %s4226_s16 }
 0x2c6   : > { %s6643_s16 = smov %s4230_s17  ;;  %s6644_s17 = smov %s4302_s24 }
 0x2c7   : > { %s6645_s18 = smov %s4291_s21  ;;  %16 = sbr.rel (!%p14_p3) target bundleno = 3 (0x3), region = 73 }
 0x2ce   :  { %3620 = vsyncpa [#allocation4], 1 }
 0x2cf   :  { %3622 = vsyncpa [#allocation4 + $0x1], 1 }

</bundles_post_ra>
